<compile_context>
chip_gen: v7x
topology: tpu7x:2x2x1
jax: 0.10.0
libtpu: 0.0.40
codegen_flags: <defaults>
</compile_context>

<pallas_src>
import jax
import jax.numpy as jnp
from jax.experimental import pallas as pl
from jax.experimental.pallas import tpu as pltpu

EMBED_SIZE = 20
HEADS = 4
HEAD_DIM = EMBED_SIZE // HEADS          # 5
HEAD_PAD = 8                            # head dim padded to 8 lanes
QKV_OUT = HEADS * HEAD_PAD              # 32 (per Q / K / V group)
NUM_LAYERS = 6
FORWARD_EXPANSION = 4
FF = FORWARD_EXPANSION * EMBED_SIZE     # 80
LN_EPS = 1e-5


def _layernorm(x, gamma, beta):
    # PyTorch nn.LayerNorm semantics: biased variance over last dim, eps=1e-5.
    mean = jnp.mean(x, axis=-1, keepdims=True)
    var = jnp.mean((x - mean) ** 2, axis=-1, keepdims=True)
    return (x - mean) * jax.lax.rsqrt(var + LN_EPS) * gamma + beta


def classifier_kernel(
    x_ref,      # (B, S, E)      embedded tokens (word + position), B = batch tile
    mb_ref,     # (B, 1, S)      additive key-mask bias (0 or -1e20)
    wqkv_ref,   # (L, E, 96)     head-major padded block-diag fused QKV (in, out)
    wo_ref,     # (L, 32, E)     fc_out weight, head-major padded rows, (in, out)
    pk_ref,     # (L, 6, E)      packed [bo, g1, be1, g2, be2, bf2]
    bf1_ref,    # (L, 1, FF)
    w1_ref,     # (L, E, FF)     pre-transposed
    w2_ref,     # (L, FF, E)     pre-transposed
    wc_ref,     # (S, E)         classifier weight in row-major flatten order
    bc_ref,     # (1, 1)
    o_ref,      # (B, 1)
):
    B, S, E = x_ref.shape
    BS = B * S

    x0 = x_ref[...].reshape(BS, E)        # (B*S, E) 2-D activations for matmuls
    mb = mb_ref[...]                      # (B, 1, S), broadcasts over query rows

    def layer_body(l, x2):
        # per-layer weight slices (dynamic first-axis ref index: only this layer live)
        wqkv_l = wqkv_ref[l]              # (E, 96)
        wo_l = wo_ref[l]                  # (32, E)
        pk = pk_ref[l]                    # (6, E)
        bo, g1, be1 = pk[0:1], pk[1:2], pk[2:3]
        g2, be2, bf2 = pk[3:4], pk[4:5], pk[5:6]
        bf1 = bf1_ref[l]                  # (1, FF)
        w1_l = w1_ref[l]                  # (E, FF)
        w2_l = w2_ref[l]                  # (FF, E)

        # ---- SelfAttention: one fused QKV matmul for the whole batch tile ----
        # Q columns already carry the 1/sqrt(E) softmax scale.
        qkv = jnp.dot(x2, wqkv_l, preferred_element_type=jnp.float32)   # (BS, 96)
        qkv3 = qkv.reshape(B, S, 3 * QKV_OUT)

        head_outs = []
        for h in range(HEADS):
            q_lo = h * HEAD_PAD
            k_lo = QKV_OUT + h * HEAD_PAD
            v_lo = 2 * QKV_OUT + h * HEAD_PAD
            qh = qkv3[:, :, q_lo:q_lo + HEAD_PAD]     # (B, S, 8), last 3 lanes zero
            kh = qkv3[:, :, k_lo:k_lo + HEAD_PAD]     # (B, S, 8)
            vh = qkv3[:, :, v_lo:v_lo + HEAD_PAD]     # (B, S, 8)
            e = jnp.einsum('bqd,bkd->bqk', qh, kh,
                           preferred_element_type=jnp.float32) + mb      # (B, S, S)
            e = e - jnp.max(e, axis=-1, keepdims=True)
            p = jnp.exp(e)
            attn = p * pl.reciprocal(jnp.sum(p, axis=-1, keepdims=True),
                                     approx=True)
            head_outs.append(jnp.einsum('bqk,bkd->bqd', attn, vh,
                                        preferred_element_type=jnp.float32))

        # one fc_out matmul per layer on the lane-concatenated padded head outputs
        cat = jnp.concatenate(head_outs, axis=-1).reshape(BS, QKV_OUT)   # (BS, 32)
        attn_out = jnp.dot(cat, wo_l, preferred_element_type=jnp.float32) + bo

        # ---- TransformerBlock (dropout p=0 -> identity) ----
        x1 = _layernorm(attn_out + x2, g1, be1)
        hdn = jnp.maximum(
            jnp.dot(x1, w1_l, preferred_element_type=jnp.float32) + bf1, 0.0)
        ff = jnp.dot(hdn, w2_l, preferred_element_type=jnp.float32) + bf2
        return _layernorm(ff + x1, g2, be2)

    x2 = jax.lax.fori_loop(0, NUM_LAYERS, layer_body, x0)

    # ---- classifier head: Flatten -> Linear(S*E, 1) -> Sigmoid (stable, exact) ----
    t = x2.reshape(B, S, E) * wc_ref[...]                               # (B, S, E)
    logit = jnp.sum(jnp.sum(t, axis=2, keepdims=True), axis=1) + bc_ref[...]  # (B,1)
    neg = jnp.exp(-jnp.abs(logit))
    o_ref[...] = jnp.where(logit >= 0.0, 1.0 / (1.0 + neg), neg / (1.0 + neg))


def classifier_forward(tokens, params, src_pad_idx, b_tile=64):
    N, S = tokens.shape
    E, hd, H, HP, L, F = EMBED_SIZE, HEAD_DIM, HEADS, HEAD_PAD, NUM_LAYERS, FF
    OUT = QKV_OUT

    # ---- JAX glue: embedding gather, additive mask bias, weight packing ------
    positions = jnp.arange(S)
    x_emb = (params["word_emb"][tokens]
             + params["pos_emb"][positions][None, :, :]).astype(jnp.float32)
    mask_bias = jnp.where(tokens != src_pad_idx, 0.0, -1e20).astype(
        jnp.float32).reshape(N, 1, S)

    # batch tile: multiple of 8; clamp so grid >= 2 when N allows (v7x has 2 TCs)
    half = (N + 1) // 2
    bt_cap = max(8, ((half + 7) // 8) * 8)
    b_tile = max(8, min(b_tile, bt_cap))
    n_pad = pl.cdiv(N, b_tile) * b_tile
    if n_pad != N:
        x_emb = jnp.pad(x_emb, ((0, n_pad - N), (0, 0), (0, 0)))
        mask_bias = jnp.pad(mask_bias, ((0, n_pad - N), (0, 0), (0, 0)))

    # fused head-major, lane-padded block-diagonal QKV weight (softmax scale folded
    # into the Q columns): x @ Wqkv gives [Q heads | K heads | V heads], 8 lanes/head.
    scale = 1.0 / (float(E) ** 0.5)
    wqT = jnp.swapaxes(params["wq"], 1, 2).astype(jnp.float32) * scale   # (L, hd, hd)
    wkT = jnp.swapaxes(params["wk"], 1, 2).astype(jnp.float32)
    wvT = jnp.swapaxes(params["wv"], 1, 2).astype(jnp.float32)
    wqkv = jnp.zeros((L, E, 3 * OUT), jnp.float32)
    for g, wT in enumerate((wqT, wkT, wvT)):
        for h in range(H):
            wqkv = wqkv.at[:, h * hd:(h + 1) * hd,
                           g * OUT + h * HP: g * OUT + h * HP + hd].set(wT)

    # fc_out weight with zero rows at the padded head-dim positions: (L, 32, E)
    woT = jnp.swapaxes(params["wo"], 1, 2).astype(jnp.float32)           # (L, E, E)
    wo_pad = jnp.zeros((L, OUT, E), jnp.float32)
    for h in range(H):
        wo_pad = wo_pad.at[:, h * HP:h * HP + hd, :].set(
            woT[:, h * hd:(h + 1) * hd, :])

    w1T = jnp.swapaxes(params["w1"], 1, 2).astype(jnp.float32)           # (L, E, FF)
    w2T = jnp.swapaxes(params["w2"], 1, 2).astype(jnp.float32)           # (L, FF, E)
    pk = jnp.stack([params["bo"], params["g1"], params["be1"],
                    params["g2"], params["be2"], params["bf2"]],
                   axis=1).astype(jnp.float32)                           # (L, 6, E)
    bf1 = params["bf1"].reshape(L, 1, F).astype(jnp.float32)
    wc2d = params["wc"].reshape(S, E).astype(jnp.float32)   # row-major == Flatten order
    bc = params["bc"].reshape(1, 1).astype(jnp.float32)

    full = lambda shape: pl.BlockSpec(shape, lambda b: (0,) * len(shape))

    grid_spec = pltpu.PrefetchScalarGridSpec(
        num_scalar_prefetch=0,
        grid=(n_pad // b_tile,),
        in_specs=[
            pl.BlockSpec((b_tile, S, E), lambda b: (b, 0, 0)),   # x_emb
            pl.BlockSpec((b_tile, 1, S), lambda b: (b, 0, 0)),   # mask bias
            full((L, E, 3 * OUT)),                               # wqkv
            full((L, OUT, E)),                                   # wo_pad
            full((L, 6, E)),                                     # packed params
            full((L, 1, F)),                                     # bf1
            full((L, E, F)),                                     # w1T
            full((L, F, E)),                                     # w2T
            full((S, E)),                                        # wc2d
            full((1, 1)),                                        # bc
        ],
        out_specs=pl.BlockSpec((b_tile, 1), lambda b: (b, 0)),
    )

    out = pl.pallas_call(
        classifier_kernel,
        out_shape=jax.ShapeDtypeStruct((n_pad, 1), jnp.float32),
        grid_spec=grid_spec,
        compiler_params=pltpu.CompilerParams(
            dimension_semantics=("parallel",)),
    )(x_emb, mask_bias, wqkv, wo_pad, pk, bf1, w1T, w2T, wc2d, bc)
    return out[:N]


# ---------------------------- pure-JAX reference -----------------------------
def reference_forward(tokens, params, src_pad_idx):
    N, S = tokens.shape
    E = EMBED_SIZE
    x = (params["word_emb"][tokens]
         + params["pos_emb"][jnp.arange(S)][None, :, :]).astype(jnp.float32)
    mask = (tokens != src_pad_idx)[:, None, None, :]          # (N,1,1,S)
    for l in range(NUM_LAYERS):
        xh = x.reshape(N, S, HEADS, HEAD_DIM)
        v = xh @ params["wv"][l].T
        k = xh @ params["wk"][l].T
        q = xh @ params["wq"][l].T
        energy = jnp.einsum("nqhd,nkhd->nhqk", q, k)
        energy = jnp.where(mask, energy, -1e20)
        attn = jax.nn.softmax(energy / (E ** 0.5), axis=3)
        out = jnp.einsum("nhqk,nkhd->nqhd", attn, v).reshape(N, S, E)
        out = out @ params["wo"][l].T + params["bo"][l]
        x1 = _layernorm(out + x, params["g1"][l], params["be1"][l])
        hdn = jnp.maximum(x1 @ params["w1"][l].T + params["bf1"][l], 0.0)
        ff = hdn @ params["w2"][l].T + params["bf2"][l]
        x = _layernorm(ff + x1, params["g2"][l], params["be2"][l])
    flat = x.reshape(N, S * E)
    logit = flat @ params["wc"].T + params["bc"]
    return jax.nn.sigmoid(logit)


def init_params(key, vocab, max_len, seq_len):
    E, hd, L, F = EMBED_SIZE, HEAD_DIM, NUM_LAYERS, FF
    ks = jax.random.split(key, 17)
    rnd = lambda k, shape, s: jax.random.normal(k, shape, jnp.float32) * s
    return dict(
        word_emb=rnd(ks[0], (vocab, E), 0.2),
        pos_emb=rnd(ks[1], (max_len, E), 0.2),
        wq=rnd(ks[2], (L, hd, hd), 0.3),
        wk=rnd(ks[3], (L, hd, hd), 0.3),
        wv=rnd(ks[4], (L, hd, hd), 0.3),
        wo=rnd(ks[5], (L, E, E), 0.1),
        bo=rnd(ks[6], (L, E), 0.05),
        g1=1.0 + rnd(ks[7], (L, E), 0.05),
        be1=rnd(ks[8], (L, E), 0.05),
        g2=1.0 + rnd(ks[9], (L, E), 0.05),
        be2=rnd(ks[10], (L, E), 0.05),
        w1=rnd(ks[11], (L, F, E), 0.1),
        bf1=rnd(ks[12], (L, F), 0.05),
        w2=rnd(ks[13], (L, E, F), 0.1),
        bf2=rnd(ks[14], (L, E), 0.05),
        wc=rnd(ks[15], (1, seq_len * E), 0.1),
        bc=rnd(ks[16], (1,), 0.05),
    )


if __name__ == "__main__":
    N, S = 10, 8            # clamps to b_tile=8 -> 2 batch tiles (grid >= 2), padding
    VOCAB = 16
    MAX_LEN = 100
    SRC_PAD_IDX = 0

    key = jax.random.PRNGKey(0)
    k_tok, k_par = jax.random.split(key)
    tokens = jax.random.randint(k_tok, (N, S), 1, VOCAB, dtype=jnp.int32)
    tokens = tokens.at[0, -2:].set(SRC_PAD_IDX)   # exercise the padding mask
    tokens = tokens.at[3, -3:].set(SRC_PAD_IDX)

    params = init_params(k_par, VOCAB, MAX_LEN, S)

    out = classifier_forward(tokens, params, SRC_PAD_IDX)
    out = jax.block_until_ready(out)

    ref = reference_forward(tokens, params, SRC_PAD_IDX)
    assert out.shape == (N, 1)
    assert bool(jnp.all(jnp.isfinite(out)))
    assert bool(jnp.allclose(out, ref, atol=3e-3, rtol=3e-3)), (out, ref)

    print("KERNEL_OK")
</pallas_src>

<mosaic_0001>
module attributes {stable_mosaic.version = 11 : i64} {
  func.func @classifier_kernel(%arg0: i32, %arg1: memref<8x8x20xf32, #tpu.memory_space<vmem>>, %arg2: memref<8x1x8xf32, #tpu.memory_space<vmem>>, %arg3: memref<6x20x96xf32, #tpu.memory_space<vmem>>, %arg4: memref<6x32x20xf32, #tpu.memory_space<vmem>>, %arg5: memref<6x6x20xf32, #tpu.memory_space<vmem>>, %arg6: memref<6x1x80xf32, #tpu.memory_space<vmem>>, %arg7: memref<6x20x80xf32, #tpu.memory_space<vmem>>, %arg8: memref<6x80x20xf32, #tpu.memory_space<vmem>>, %arg9: memref<8x20xf32, #tpu.memory_space<vmem>>, %arg10: memref<1x1xf32, #tpu.memory_space<vmem>>, %arg11: memref<8x1xf32, #tpu.memory_space<vmem>>) attributes {dimension_semantics = [#tpu.dimension_semantics<parallel>], iteration_bounds = array<i64: 2>, scalar_prefetch = 0 : i64, scratch_operands = 0 : i64, tpu.core_type = #tpu.core_type<tc>, window_params = [{transform_indices = @transform_0, window_bounds = array<i64: 8, 8, 20>}, {transform_indices = @transform_1, window_bounds = array<i64: 8, 1, 8>}, {pipeline_mode = #tpu.pipeline_mode<synchronous>, transform_indices = @transform_2, window_bounds = array<i64: 6, 20, 96>}, {pipeline_mode = #tpu.pipeline_mode<synchronous>, transform_indices = @transform_3, window_bounds = array<i64: 6, 32, 20>}, {pipeline_mode = #tpu.pipeline_mode<synchronous>, transform_indices = @transform_4, window_bounds = array<i64: 6, 6, 20>}, {pipeline_mode = #tpu.pipeline_mode<synchronous>, transform_indices = @transform_5, window_bounds = array<i64: 6, 1, 80>}, {pipeline_mode = #tpu.pipeline_mode<synchronous>, transform_indices = @transform_6, window_bounds = array<i64: 6, 20, 80>}, {pipeline_mode = #tpu.pipeline_mode<synchronous>, transform_indices = @transform_7, window_bounds = array<i64: 6, 80, 20>}, {pipeline_mode = #tpu.pipeline_mode<synchronous>, transform_indices = @transform_8, window_bounds = array<i64: 8, 20>}, {pipeline_mode = #tpu.pipeline_mode<synchronous>, transform_indices = @transform_9, window_bounds = array<i64: 1, 1>}, {transform_indices = @transform_10, window_bounds = array<i64: 8, 1>}]} {
    %c0 = arith.constant 0 : index
    %c0_0 = arith.constant 0 : index
    %c0_1 = arith.constant 0 : index
    %0 = vector.load %arg1[%c0, %c0_0, %c0_1] : memref<8x8x20xf32, #tpu.memory_space<vmem>>, vector<8x8x20xf32>
    %1 = vector.shape_cast %0 : vector<8x8x20xf32> to vector<64x20xf32>
    %c0_2 = arith.constant 0 : index
    %c0_3 = arith.constant 0 : index
    %c0_4 = arith.constant 0 : index
    %2 = vector.load %arg2[%c0_2, %c0_3, %c0_4] : memref<8x1x8xf32, #tpu.memory_space<vmem>>, vector<8x1x8xf32>
    %c0_i32 = arith.constant 0 : i32
    %c6_i32 = arith.constant 6 : i32
    %3 = arith.addi %c0_i32, %c6_i32 : i32
    %c1_i32 = arith.constant 1 : i32
    %4 = scf.for %arg12 = %c0_i32 to %3 step %c1_i32 iter_args(%arg13 = %1) -> (vector<64x20xf32>)  : i32 {
      %31 = arith.index_cast %arg12 : i32 to index
      %c0_18 = arith.constant 0 : index
      %c0_19 = arith.constant 0 : index
      %32 = vector.load %arg3[%31, %c0_18, %c0_19] : memref<6x20x96xf32, #tpu.memory_space<vmem>>, vector<1x20x96xf32>
      %33 = vector.shape_cast %32 : vector<1x20x96xf32> to vector<20x96xf32>
      %34 = arith.index_cast %arg12 : i32 to index
      %c0_20 = arith.constant 0 : index
      %c0_21 = arith.constant 0 : index
      %35 = vector.load %arg4[%34, %c0_20, %c0_21] : memref<6x32x20xf32, #tpu.memory_space<vmem>>, vector<1x32x20xf32>
      %36 = vector.shape_cast %35 : vector<1x32x20xf32> to vector<32x20xf32>
      %37 = arith.index_cast %arg12 : i32 to index
      %c0_22 = arith.constant 0 : index
      %c0_23 = arith.constant 0 : index
      %38 = vector.load %arg5[%37, %c0_22, %c0_23] : memref<6x6x20xf32, #tpu.memory_space<vmem>>, vector<1x6x20xf32>
      %39 = vector.shape_cast %38 : vector<1x6x20xf32> to vector<6x20xf32>
      %40 = vector.extract_strided_slice %39 {offsets = [0, 0], sizes = [1, 20], strides = [1, 1]} : vector<6x20xf32> to vector<1x20xf32>
      %41 = vector.extract_strided_slice %39 {offsets = [1, 0], sizes = [1, 20], strides = [1, 1]} : vector<6x20xf32> to vector<1x20xf32>
      %42 = vector.extract_strided_slice %39 {offsets = [2, 0], sizes = [1, 20], strides = [1, 1]} : vector<6x20xf32> to vector<1x20xf32>
      %43 = vector.extract_strided_slice %39 {offsets = [3, 0], sizes = [1, 20], strides = [1, 1]} : vector<6x20xf32> to vector<1x20xf32>
      %44 = vector.extract_strided_slice %39 {offsets = [4, 0], sizes = [1, 20], strides = [1, 1]} : vector<6x20xf32> to vector<1x20xf32>
      %45 = vector.extract_strided_slice %39 {offsets = [5, 0], sizes = [1, 20], strides = [1, 1]} : vector<6x20xf32> to vector<1x20xf32>
      %46 = arith.index_cast %arg12 : i32 to index
      %c0_24 = arith.constant 0 : index
      %c0_25 = arith.constant 0 : index
      %47 = vector.load %arg6[%46, %c0_24, %c0_25] : memref<6x1x80xf32, #tpu.memory_space<vmem>>, vector<1x1x80xf32>
      %48 = vector.shape_cast %47 : vector<1x1x80xf32> to vector<1x80xf32>
      %49 = arith.index_cast %arg12 : i32 to index
      %c0_26 = arith.constant 0 : index
      %c0_27 = arith.constant 0 : index
      %50 = vector.load %arg7[%49, %c0_26, %c0_27] : memref<6x20x80xf32, #tpu.memory_space<vmem>>, vector<1x20x80xf32>
      %51 = vector.shape_cast %50 : vector<1x20x80xf32> to vector<20x80xf32>
      %52 = arith.index_cast %arg12 : i32 to index
      %c0_28 = arith.constant 0 : index
      %c0_29 = arith.constant 0 : index
      %53 = vector.load %arg8[%52, %c0_28, %c0_29] : memref<6x80x20xf32, #tpu.memory_space<vmem>>, vector<1x80x20xf32>
      %54 = vector.shape_cast %53 : vector<1x80x20xf32> to vector<80x20xf32>
      %cst_30 = arith.constant dense<0.000000e+00> : vector<64x96xf32>
      %55 = tpu.matmul %arg13, %33, %cst_30 {dimension_numbers = #tpu.dot_dimension_numbers<[1], [0], [0], [1], [0, 0, 1, 1], [], []>} : vector<64x20xf32>, vector<20x96xf32>, vector<64x96xf32> -> vector<64x96xf32>
      %56 = vector.shape_cast %55 : vector<64x96xf32> to vector<8x8x96xf32>
      %57 = vector.extract_strided_slice %56 {offsets = [0, 0, 0], sizes = [8, 8, 8], strides = [1, 1, 1]} : vector<8x8x96xf32> to vector<8x8x8xf32>
      %58 = vector.extract_strided_slice %56 {offsets = [0, 0, 32], sizes = [8, 8, 8], strides = [1, 1, 1]} : vector<8x8x96xf32> to vector<8x8x8xf32>
      %59 = vector.extract_strided_slice %56 {offsets = [0, 0, 64], sizes = [8, 8, 8], strides = [1, 1, 1]} : vector<8x8x96xf32> to vector<8x8x8xf32>
      "tpu.trace_start"() <{level = 10 : i32, message = "bqd,bkd->bqk"}> : () -> ()
      %cst_31 = arith.constant dense<0.000000e+00> : vector<8x8x8xf32>
      %60 = tpu.matmul %57, %58, %cst_31 {dimension_numbers = #tpu.dot_dimension_numbers<[2], [2], [1], [1], [0, 0, 0, 1, 1, 1], [0], [0]>} : vector<8x8x8xf32>, vector<8x8x8xf32>, vector<8x8x8xf32> -> vector<8x8x8xf32>
      "tpu.trace_stop"() : () -> ()
      %61 = vector.broadcast %2 : vector<8x1x8xf32> to vector<8x8x8xf32>
      %62 = arith.addf %60, %61 : vector<8x8x8xf32>
      %cst_32 = arith.constant dense<0xFF800000> : vector<8x8xf32>
      %63 = vector.multi_reduction <maximumf>, %62, %cst_32 [2] : vector<8x8x8xf32> to vector<8x8xf32>
      %64 = vector.shape_cast %63 : vector<8x8xf32> to vector<8x8x1xf32>
      %65 = vector.broadcast %64 : vector<8x8x1xf32> to vector<8x8x8xf32>
      %66 = arith.subf %62, %65 : vector<8x8x8xf32>
      %67 = math.exp %66 : vector<8x8x8xf32>
      %cst_33 = arith.constant dense<0.000000e+00> : vector<8x8xf32>
      %68 = vector.multi_reduction <add>, %67, %cst_33 [2] : vector<8x8x8xf32> to vector<8x8xf32>
      %69 = vector.shape_cast %68 : vector<8x8xf32> to vector<8x8x1xf32>
      %70 = tpu.reciprocal %69 {approx = true} : vector<8x8x1xf32> -> vector<8x8x1xf32>
      %71 = vector.broadcast %70 : vector<8x8x1xf32> to vector<8x8x8xf32>
      %72 = arith.mulf %67, %71 : vector<8x8x8xf32>
      "tpu.trace_start"() <{level = 10 : i32, message = "bqk,bkd->bqd"}> : () -> ()
      %cst_34 = arith.constant dense<0.000000e+00> : vector<8x8x8xf32>
      %73 = tpu.matmul %72, %59, %cst_34 {dimension_numbers = #tpu.dot_dimension_numbers<[2], [1], [1], [2], [0, 0, 0, 1, 1, 2], [0], [0]>} : vector<8x8x8xf32>, vector<8x8x8xf32>, vector<8x8x8xf32> -> vector<8x8x8xf32>
      "tpu.trace_stop"() : () -> ()
      %74 = vector.extract_strided_slice %56 {offsets = [0, 0, 8], sizes = [8, 8, 8], strides = [1, 1, 1]} : vector<8x8x96xf32> to vector<8x8x8xf32>
      %75 = vector.extract_strided_slice %56 {offsets = [0, 0, 40], sizes = [8, 8, 8], strides = [1, 1, 1]} : vector<8x8x96xf32> to vector<8x8x8xf32>
      %76 = vector.extract_strided_slice %56 {offsets = [0, 0, 72], sizes = [8, 8, 8], strides = [1, 1, 1]} : vector<8x8x96xf32> to vector<8x8x8xf32>
      "tpu.trace_start"() <{level = 10 : i32, message = "bqd,bkd->bqk"}> : () -> ()
      %cst_35 = arith.constant dense<0.000000e+00> : vector<8x8x8xf32>
      %77 = tpu.matmul %74, %75, %cst_35 {dimension_numbers = #tpu.dot_dimension_numbers<[2], [2], [1], [1], [0, 0, 0, 1, 1, 1], [0], [0]>} : vector<8x8x8xf32>, vector<8x8x8xf32>, vector<8x8x8xf32> -> vector<8x8x8xf32>
      "tpu.trace_stop"() : () -> ()
      %78 = vector.broadcast %2 : vector<8x1x8xf32> to vector<8x8x8xf32>
      %79 = arith.addf %77, %78 : vector<8x8x8xf32>
      %cst_36 = arith.constant dense<0xFF800000> : vector<8x8xf32>
      %80 = vector.multi_reduction <maximumf>, %79, %cst_36 [2] : vector<8x8x8xf32> to vector<8x8xf32>
      %81 = vector.shape_cast %80 : vector<8x8xf32> to vector<8x8x1xf32>
      %82 = vector.broadcast %81 : vector<8x8x1xf32> to vector<8x8x8xf32>
      %83 = arith.subf %79, %82 : vector<8x8x8xf32>
      %84 = math.exp %83 : vector<8x8x8xf32>
      %cst_37 = arith.constant dense<0.000000e+00> : vector<8x8xf32>
      %85 = vector.multi_reduction <add>, %84, %cst_37 [2] : vector<8x8x8xf32> to vector<8x8xf32>
      %86 = vector.shape_cast %85 : vector<8x8xf32> to vector<8x8x1xf32>
      %87 = tpu.reciprocal %86 {approx = true} : vector<8x8x1xf32> -> vector<8x8x1xf32>
      %88 = vector.broadcast %87 : vector<8x8x1xf32> to vector<8x8x8xf32>
      %89 = arith.mulf %84, %88 : vector<8x8x8xf32>
      "tpu.trace_start"() <{level = 10 : i32, message = "bqk,bkd->bqd"}> : () -> ()
      %cst_38 = arith.constant dense<0.000000e+00> : vector<8x8x8xf32>
      %90 = tpu.matmul %89, %76, %cst_38 {dimension_numbers = #tpu.dot_dimension_numbers<[2], [1], [1], [2], [0, 0, 0, 1, 1, 2], [0], [0]>} : vector<8x8x8xf32>, vector<8x8x8xf32>, vector<8x8x8xf32> -> vector<8x8x8xf32>
      "tpu.trace_stop"() : () -> ()
      %91 = vector.extract_strided_slice %56 {offsets = [0, 0, 16], sizes = [8, 8, 8], strides = [1, 1, 1]} : vector<8x8x96xf32> to vector<8x8x8xf32>
      %92 = vector.extract_strided_slice %56 {offsets = [0, 0, 48], sizes = [8, 8, 8], strides = [1, 1, 1]} : vector<8x8x96xf32> to vector<8x8x8xf32>
      %93 = vector.extract_strided_slice %56 {offsets = [0, 0, 80], sizes = [8, 8, 8], strides = [1, 1, 1]} : vector<8x8x96xf32> to vector<8x8x8xf32>
      "tpu.trace_start"() <{level = 10 : i32, message = "bqd,bkd->bqk"}> : () -> ()
      %cst_39 = arith.constant dense<0.000000e+00> : vector<8x8x8xf32>
      %94 = tpu.matmul %91, %92, %cst_39 {dimension_numbers = #tpu.dot_dimension_numbers<[2], [2], [1], [1], [0, 0, 0, 1, 1, 1], [0], [0]>} : vector<8x8x8xf32>, vector<8x8x8xf32>, vector<8x8x8xf32> -> vector<8x8x8xf32>
      "tpu.trace_stop"() : () -> ()
      %95 = vector.broadcast %2 : vector<8x1x8xf32> to vector<8x8x8xf32>
      %96 = arith.addf %94, %95 : vector<8x8x8xf32>
      %cst_40 = arith.constant dense<0xFF800000> : vector<8x8xf32>
      %97 = vector.multi_reduction <maximumf>, %96, %cst_40 [2] : vector<8x8x8xf32> to vector<8x8xf32>
      %98 = vector.shape_cast %97 : vector<8x8xf32> to vector<8x8x1xf32>
      %99 = vector.broadcast %98 : vector<8x8x1xf32> to vector<8x8x8xf32>
      %100 = arith.subf %96, %99 : vector<8x8x8xf32>
      %101 = math.exp %100 : vector<8x8x8xf32>
      %cst_41 = arith.constant dense<0.000000e+00> : vector<8x8xf32>
      %102 = vector.multi_reduction <add>, %101, %cst_41 [2] : vector<8x8x8xf32> to vector<8x8xf32>
      %103 = vector.shape_cast %102 : vector<8x8xf32> to vector<8x8x1xf32>
      %104 = tpu.reciprocal %103 {approx = true} : vector<8x8x1xf32> -> vector<8x8x1xf32>
      %105 = vector.broadcast %104 : vector<8x8x1xf32> to vector<8x8x8xf32>
      %106 = arith.mulf %101, %105 : vector<8x8x8xf32>
      "tpu.trace_start"() <{level = 10 : i32, message = "bqk,bkd->bqd"}> : () -> ()
      %cst_42 = arith.constant dense<0.000000e+00> : vector<8x8x8xf32>
      %107 = tpu.matmul %106, %93, %cst_42 {dimension_numbers = #tpu.dot_dimension_numbers<[2], [1], [1], [2], [0, 0, 0, 1, 1, 2], [0], [0]>} : vector<8x8x8xf32>, vector<8x8x8xf32>, vector<8x8x8xf32> -> vector<8x8x8xf32>
      "tpu.trace_stop"() : () -> ()
      %108 = vector.extract_strided_slice %56 {offsets = [0, 0, 24], sizes = [8, 8, 8], strides = [1, 1, 1]} : vector<8x8x96xf32> to vector<8x8x8xf32>
      %109 = vector.extract_strided_slice %56 {offsets = [0, 0, 56], sizes = [8, 8, 8], strides = [1, 1, 1]} : vector<8x8x96xf32> to vector<8x8x8xf32>
      %110 = vector.extract_strided_slice %56 {offsets = [0, 0, 88], sizes = [8, 8, 8], strides = [1, 1, 1]} : vector<8x8x96xf32> to vector<8x8x8xf32>
      "tpu.trace_start"() <{level = 10 : i32, message = "bqd,bkd->bqk"}> : () -> ()
      %cst_43 = arith.constant dense<0.000000e+00> : vector<8x8x8xf32>
      %111 = tpu.matmul %108, %109, %cst_43 {dimension_numbers = #tpu.dot_dimension_numbers<[2], [2], [1], [1], [0, 0, 0, 1, 1, 1], [0], [0]>} : vector<8x8x8xf32>, vector<8x8x8xf32>, vector<8x8x8xf32> -> vector<8x8x8xf32>
      "tpu.trace_stop"() : () -> ()
      %112 = vector.broadcast %2 : vector<8x1x8xf32> to vector<8x8x8xf32>
      %113 = arith.addf %111, %112 : vector<8x8x8xf32>
      %cst_44 = arith.constant dense<0xFF800000> : vector<8x8xf32>
      %114 = vector.multi_reduction <maximumf>, %113, %cst_44 [2] : vector<8x8x8xf32> to vector<8x8xf32>
      %115 = vector.shape_cast %114 : vector<8x8xf32> to vector<8x8x1xf32>
      %116 = vector.broadcast %115 : vector<8x8x1xf32> to vector<8x8x8xf32>
      %117 = arith.subf %113, %116 : vector<8x8x8xf32>
      %118 = math.exp %117 : vector<8x8x8xf32>
      %cst_45 = arith.constant dense<0.000000e+00> : vector<8x8xf32>
      %119 = vector.multi_reduction <add>, %118, %cst_45 [2] : vector<8x8x8xf32> to vector<8x8xf32>
      %120 = vector.shape_cast %119 : vector<8x8xf32> to vector<8x8x1xf32>
      %121 = tpu.reciprocal %120 {approx = true} : vector<8x8x1xf32> -> vector<8x8x1xf32>
      %122 = vector.broadcast %121 : vector<8x8x1xf32> to vector<8x8x8xf32>
      %123 = arith.mulf %118, %122 : vector<8x8x8xf32>
      "tpu.trace_start"() <{level = 10 : i32, message = "bqk,bkd->bqd"}> : () -> ()
      %cst_46 = arith.constant dense<0.000000e+00> : vector<8x8x8xf32>
      %124 = tpu.matmul %123, %110, %cst_46 {dimension_numbers = #tpu.dot_dimension_numbers<[2], [1], [1], [2], [0, 0, 0, 1, 1, 2], [0], [0]>} : vector<8x8x8xf32>, vector<8x8x8xf32>, vector<8x8x8xf32> -> vector<8x8x8xf32>
      "tpu.trace_stop"() : () -> ()
      %125 = tpu.concatenate %73, %90, %107, %124 in 2 : vector<8x8x8xf32>, vector<8x8x8xf32>, vector<8x8x8xf32>, vector<8x8x8xf32> -> vector<8x8x32xf32>
      %126 = vector.shape_cast %125 : vector<8x8x32xf32> to vector<64x32xf32>
      %cst_47 = arith.constant dense<0.000000e+00> : vector<64x20xf32>
      %127 = tpu.matmul %126, %36, %cst_47 {dimension_numbers = #tpu.dot_dimension_numbers<[1], [0], [0], [1], [0, 0, 1, 1], [], []>} : vector<64x32xf32>, vector<32x20xf32>, vector<64x20xf32> -> vector<64x20xf32>
      %128 = vector.broadcast %40 : vector<1x20xf32> to vector<64x20xf32>
      %129 = arith.addf %127, %128 : vector<64x20xf32>
      %130 = arith.addf %129, %arg13 : vector<64x20xf32>
      %cst_48 = arith.constant dense<0.000000e+00> : vector<64xf32>
      %131 = vector.multi_reduction <add>, %130, %cst_48 [1] : vector<64x20xf32> to vector<64xf32>
      %132 = vector.shape_cast %131 : vector<64xf32> to vector<64x1xf32>
      %cst_49 = arith.constant 2.000000e+01 : f32
      %133 = vector.broadcast %cst_49 : f32 to vector<64x1xf32>
      %134 = arith.divf %132, %133 : vector<64x1xf32>
      %135 = vector.broadcast %134 : vector<64x1xf32> to vector<64x20xf32>
      %136 = arith.subf %130, %135 : vector<64x20xf32>
      %137 = arith.mulf %136, %136 : vector<64x20xf32>
      %cst_50 = arith.constant dense<0.000000e+00> : vector<64xf32>
      %138 = vector.multi_reduction <add>, %137, %cst_50 [1] : vector<64x20xf32> to vector<64xf32>
      %139 = vector.shape_cast %138 : vector<64xf32> to vector<64x1xf32>
      %cst_51 = arith.constant 2.000000e+01 : f32
      %140 = vector.broadcast %cst_51 : f32 to vector<64x1xf32>
      %141 = arith.divf %139, %140 : vector<64x1xf32>
      %142 = vector.broadcast %134 : vector<64x1xf32> to vector<64x20xf32>
      %143 = arith.subf %130, %142 : vector<64x20xf32>
      %cst_52 = arith.constant 9.99999974E-6 : f32
      %144 = vector.broadcast %cst_52 : f32 to vector<64x1xf32>
      %145 = arith.addf %141, %144 : vector<64x1xf32>
      %146 = math.rsqrt %145 : vector<64x1xf32>
      %147 = vector.broadcast %146 : vector<64x1xf32> to vector<64x20xf32>
      %148 = arith.mulf %143, %147 : vector<64x20xf32>
      %149 = vector.broadcast %41 : vector<1x20xf32> to vector<64x20xf32>
      %150 = arith.mulf %148, %149 : vector<64x20xf32>
      %151 = vector.broadcast %42 : vector<1x20xf32> to vector<64x20xf32>
      %152 = arith.addf %150, %151 : vector<64x20xf32>
      %cst_53 = arith.constant dense<0.000000e+00> : vector<64x80xf32>
      %153 = tpu.matmul %152, %51, %cst_53 {dimension_numbers = #tpu.dot_dimension_numbers<[1], [0], [0], [1], [0, 0, 1, 1], [], []>} : vector<64x20xf32>, vector<20x80xf32>, vector<64x80xf32> -> vector<64x80xf32>
      %154 = vector.broadcast %48 : vector<1x80xf32> to vector<64x80xf32>
      %155 = arith.addf %153, %154 : vector<64x80xf32>
      %cst_54 = arith.constant 0.000000e+00 : f32
      %156 = vector.broadcast %cst_54 : f32 to vector<64x80xf32>
      %157 = arith.maximumf %155, %156 : vector<64x80xf32>
      %cst_55 = arith.constant dense<0.000000e+00> : vector<64x20xf32>
      %158 = tpu.matmul %157, %54, %cst_55 {dimension_numbers = #tpu.dot_dimension_numbers<[1], [0], [0], [1], [0, 0, 1, 1], [], []>} : vector<64x80xf32>, vector<80x20xf32>, vector<64x20xf32> -> vector<64x20xf32>
      %159 = vector.broadcast %45 : vector<1x20xf32> to vector<64x20xf32>
      %160 = arith.addf %158, %159 : vector<64x20xf32>
      %161 = arith.addf %160, %152 : vector<64x20xf32>
      %cst_56 = arith.constant dense<0.000000e+00> : vector<64xf32>
      %162 = vector.multi_reduction <add>, %161, %cst_56 [1] : vector<64x20xf32> to vector<64xf32>
      %163 = vector.shape_cast %162 : vector<64xf32> to vector<64x1xf32>
      %cst_57 = arith.constant 2.000000e+01 : f32
      %164 = vector.broadcast %cst_57 : f32 to vector<64x1xf32>
      %165 = arith.divf %163, %164 : vector<64x1xf32>
      %166 = vector.broadcast %165 : vector<64x1xf32> to vector<64x20xf32>
      %167 = arith.subf %161, %166 : vector<64x20xf32>
      %168 = arith.mulf %167, %167 : vector<64x20xf32>
      %cst_58 = arith.constant dense<0.000000e+00> : vector<64xf32>
      %169 = vector.multi_reduction <add>, %168, %cst_58 [1] : vector<64x20xf32> to vector<64xf32>
      %170 = vector.shape_cast %169 : vector<64xf32> to vector<64x1xf32>
      %cst_59 = arith.constant 2.000000e+01 : f32
      %171 = vector.broadcast %cst_59 : f32 to vector<64x1xf32>
      %172 = arith.divf %170, %171 : vector<64x1xf32>
      %173 = vector.broadcast %165 : vector<64x1xf32> to vector<64x20xf32>
      %174 = arith.subf %161, %173 : vector<64x20xf32>
      %cst_60 = arith.constant 9.99999974E-6 : f32
      %175 = vector.broadcast %cst_60 : f32 to vector<64x1xf32>
      %176 = arith.addf %172, %175 : vector<64x1xf32>
      %177 = math.rsqrt %176 : vector<64x1xf32>
      %178 = vector.broadcast %177 : vector<64x1xf32> to vector<64x20xf32>
      %179 = arith.mulf %174, %178 : vector<64x20xf32>
      %180 = vector.broadcast %43 : vector<1x20xf32> to vector<64x20xf32>
      %181 = arith.mulf %179, %180 : vector<64x20xf32>
      %182 = vector.broadcast %44 : vector<1x20xf32> to vector<64x20xf32>
      %183 = arith.addf %181, %182 : vector<64x20xf32>
      scf.yield %183 : vector<64x20xf32>
    }
    %c6_i32_5 = arith.constant 6 : i32
    %5 = vector.shape_cast %4 : vector<64x20xf32> to vector<8x8x20xf32>
    %c0_6 = arith.constant 0 : index
    %c0_7 = arith.constant 0 : index
    %6 = vector.load %arg9[%c0_6, %c0_7] : memref<8x20xf32, #tpu.memory_space<vmem>>, vector<8x20xf32>
    %7 = vector.shape_cast %6 : vector<8x20xf32> to vector<1x8x20xf32>
    %8 = vector.broadcast %7 : vector<1x8x20xf32> to vector<8x8x20xf32>
    %9 = arith.mulf %5, %8 : vector<8x8x20xf32>
    %cst = arith.constant dense<0.000000e+00> : vector<8x8xf32>
    %10 = vector.multi_reduction <add>, %9, %cst [2] : vector<8x8x20xf32> to vector<8x8xf32>
    %11 = vector.shape_cast %10 : vector<8x8xf32> to vector<8x8x1xf32>
    %cst_8 = arith.constant dense<0.000000e+00> : vector<8x1xf32>
    %12 = vector.multi_reduction <add>, %11, %cst_8 [1] : vector<8x8x1xf32> to vector<8x1xf32>
    %c0_9 = arith.constant 0 : index
    %c0_10 = arith.constant 0 : index
    %13 = vector.load %arg10[%c0_9, %c0_10] : memref<1x1xf32, #tpu.memory_space<vmem>>, vector<1x1xf32>
    %14 = vector.broadcast %13 : vector<1x1xf32> to vector<8x1xf32>
    %15 = arith.addf %12, %14 : vector<8x1xf32>
    %16 = math.absf %15 : vector<8x1xf32>
    %cst_11 = arith.constant 0.000000e+00 : f32
    %17 = vector.broadcast %cst_11 : f32 to vector<8x1xf32>
    %18 = arith.subf %17, %16 : vector<8x1xf32>
    %19 = math.exp %18 : vector<8x1xf32>
    %cst_12 = arith.constant 0.000000e+00 : f32
    %20 = vector.broadcast %cst_12 : f32 to vector<8x1xf32>
    %21 = arith.cmpf oge, %15, %20 : vector<8x1xf32>
    %cst_13 = arith.constant 1.000000e+00 : f32
    %22 = vector.broadcast %cst_13 : f32 to vector<8x1xf32>
    %23 = arith.addf %22, %19 : vector<8x1xf32>
    %cst_14 = arith.constant 1.000000e+00 : f32
    %24 = vector.broadcast %cst_14 : f32 to vector<8x1xf32>
    %25 = arith.divf %24, %23 : vector<8x1xf32>
    %cst_15 = arith.constant 1.000000e+00 : f32
    %26 = vector.broadcast %cst_15 : f32 to vector<8x1xf32>
    %27 = arith.addf %26, %19 : vector<8x1xf32>
    %28 = arith.divf %19, %27 : vector<8x1xf32>
    %29 = arith.select %21, %25, %28 : vector<8x1xi1>, vector<8x1xf32>
    %c0_16 = arith.constant 0 : index
    %c0_17 = arith.constant 0 : index
    %30 = vector.load %arg11[%c0_16, %c0_17] : memref<8x1xf32, #tpu.memory_space<vmem>>, vector<8x1xf32>
    tpu.vector_store %arg11[%c0_16, %c0_17], %29 {strides = array<i32>} : memref<8x1xf32, #tpu.memory_space<vmem>>, vector<8x1xf32>,
    return
  }
  func.func @transform_0(%arg0: i32) -> (i32, i32, i32) {
    %c0_i32 = arith.constant 0 : i32
    %c0_i32_0 = arith.constant 0 : i32
    %c0_i32_1 = arith.constant 0 : i32
    return %arg0, %c0_i32, %c0_i32_0 : i32, i32, i32
  }
  func.func @transform_1(%arg0: i32) -> (i32, i32, i32) {
    %c0_i32 = arith.constant 0 : i32
    %c0_i32_0 = arith.constant 0 : i32
    %c0_i32_1 = arith.constant 0 : i32
    return %arg0, %c0_i32, %c0_i32_0 : i32, i32, i32
  }
  func.func @transform_2(%arg0: i32) -> (i32, i32, i32) {
    %c0_i32 = arith.constant 0 : i32
    %c0_i32_0 = arith.constant 0 : i32
    %c0_i32_1 = arith.constant 0 : i32
    %c0_i32_2 = arith.constant 0 : i32
    return %c0_i32, %c0_i32_0, %c0_i32_1 : i32, i32, i32
  }
  func.func @transform_3(%arg0: i32) -> (i32, i32, i32) {
    %c0_i32 = arith.constant 0 : i32
    %c0_i32_0 = arith.constant 0 : i32
    %c0_i32_1 = arith.constant 0 : i32
    %c0_i32_2 = arith.constant 0 : i32
    return %c0_i32, %c0_i32_0, %c0_i32_1 : i32, i32, i32
  }
  func.func @transform_4(%arg0: i32) -> (i32, i32, i32) {
    %c0_i32 = arith.constant 0 : i32
    %c0_i32_0 = arith.constant 0 : i32
    %c0_i32_1 = arith.constant 0 : i32
    %c0_i32_2 = arith.constant 0 : i32
    return %c0_i32, %c0_i32_0, %c0_i32_1 : i32, i32, i32
  }
  func.func @transform_5(%arg0: i32) -> (i32, i32, i32) {
    %c0_i32 = arith.constant 0 : i32
    %c0_i32_0 = arith.constant 0 : i32
    %c0_i32_1 = arith.constant 0 : i32
    %c0_i32_2 = arith.constant 0 : i32
    return %c0_i32, %c0_i32_0, %c0_i32_1 : i32, i32, i32
  }
  func.func @transform_6(%arg0: i32) -> (i32, i32, i32) {
    %c0_i32 = arith.constant 0 : i32
    %c0_i32_0 = arith.constant 0 : i32
    %c0_i32_1 = arith.constant 0 : i32
    %c0_i32_2 = arith.constant 0 : i32
    return %c0_i32, %c0_i32_0, %c0_i32_1 : i32, i32, i32
  }
  func.func @transform_7(%arg0: i32) -> (i32, i32, i32) {
    %c0_i32 = arith.constant 0 : i32
    %c0_i32_0 = arith.constant 0 : i32
    %c0_i32_1 = arith.constant 0 : i32
    %c0_i32_2 = arith.constant 0 : i32
    return %c0_i32, %c0_i32_0, %c0_i32_1 : i32, i32, i32
  }
  func.func @transform_8(%arg0: i32) -> (i32, i32) {
    %c0_i32 = arith.constant 0 : i32
    %c0_i32_0 = arith.constant 0 : i32
    %c0_i32_1 = arith.constant 0 : i32
    return %c0_i32, %c0_i32_0 : i32, i32
  }
  func.func @transform_9(%arg0: i32) -> (i32, i32) {
    %c0_i32 = arith.constant 0 : i32
    %c0_i32_0 = arith.constant 0 : i32
    %c0_i32_1 = arith.constant 0 : i32
    return %c0_i32, %c0_i32_0 : i32, i32
  }
  func.func @transform_10(%arg0: i32) -> (i32, i32) {
    %c0_i32 = arith.constant 0 : i32
    %c0_i32_0 = arith.constant 0 : i32
    return %arg0, %c0_i32 : i32, i32
  }
}

</mosaic_0001>

<bundles_post_ra>
// kernel: tpu_custom_call.1
= control target key start
LH: loop header
LB: loop body
LE: loop exit
PB: predicated region body
PF: predicated region fallthrough
CT: control target
= control target key end

     0   :  { %s8241_s15 = smov 0   ;;  %s9511_s0 = inlined_call_operand.vmem [shape: f32[16,8,20], index: 0, kind: input, shape index: {}]   ;;  %s9512_s1 = inlined_call_operand.vmem [shape: f32[16,1,8], index: 1, kind: input, shape index: {}]   ;;  %s9513_s2 = inlined_call_operand.vmem [shape: f32[6,20,96], index: 2, kind: input, shape index: {}]   ;;  %s9514_s3 = inlined_call_operand.vmem [shape: f32[6,32,20], index: 3, kind: input, shape index: {}]   ;;  %s9515_s4 = inlined_call_operand.vmem [shape: f32[6,6,20], index: 4, kind: input, shape index: {}]   ;;  %s9516_s5 = inlined_call_operand.vmem [shape: f32[6,1,80], index: 5, kind: input, shape index: {}]   ;;  %s9517_s6 = inlined_call_operand.vmem [shape: f32[6,20,80], index: 6, kind: input, shape index: {}]   ;;  %s9518_s7 = inlined_call_operand.vmem [shape: f32[6,80,20], index: 7, kind: input, shape index: {}]   ;;  %s9519_s8 = inlined_call_operand.vmem [shape: f32[8,20], index: 8, kind: input, shape index: {}]   ;;  %s9520_s9 = inlined_call_operand.<no memory space> [shape: f32[1,1], index: 9, kind: input, shape index: {}]   ;;  %s9521_s10 = inlined_call_operand.vmem [shape: f32[16,1], index: 10, kind: output, shape index: {}]  }
   0x1   :  { %v15_v0 = vstv %s9520_s9 }
   0x2   :  { %16 = vst [vmem:[#allocation2] sm:$0x1] %v15_v0 }
   0x3 LB: > { %s7018_s16 = sadd.s32 4294967295, %s8129_s15   ;;  %p7022_p0 = scmp.ge.s32.totalorder %s8129_s15, 1  ;;  %s8129_s15 = sphi %s8241_s15, %s22_s15  }
   0x4   : > { %p325_p1 = scmp.lt.s32.totalorder %s8129_s15, 3 }
   0x6   : > { %p326_p2 = pnand %p7022_p0, %p325_p1 }
   0x7   : > { %s7023_s17 = sshll.u32 (!%p326_p2), %s7018_s16, 3  ;;  %p377_p3 = scmp.lt.s32.totalorder (!%p326_p2), %s7018_s16, 1 }
   0x8   : > { %329 = sbr.rel (%p326_p2) target bundleno = 4522 (0x11aa), region = 60  ;;  %p367_p4 = scmp.lt.s32.totalorder (!%p326_p2), %s7023_s17, 15 }
   0x9   : > { %s8292_s28 = smov (!%p326_p2), 0  }
   0xf   : > { %s9562_s16 = smov (!%p377_p3, %s7018_s16), 1  ;;  %s9564_s17 = smov (!%p367_p4, %s7023_s17), 15 }
  0x10   : > { %s7026_s9 = sshll.u32 %s9562_s16, 3  ;;  %s7024_s18 = sshll.u32 %s9564_s17, 3 }
  0x11   : > { %s375_s21 = scalar_lea.vmem %s9512_s1, %s9564_s17  ;;  %s370_s24 = scalar_lea.vmem %s9511_s0, %s7024_s18 }
  0x12   : > { %s8258_s27 = scalar_lea.vmem %s9521_s10, %s7026_s9  ;;  %v8260_v1 = vld [vmem:[%s375_s21] ss:$0 sm:$0xff]  ;;  %v8262_v2 = vld [vmem:[%s375_s21 + $0x1] ss:$0 sm:$0xff]  ;;  %v8264_v3 = vld [vmem:[%s375_s21 + $0x2] ss:$0 sm:$0xff] }
  0x13   : > { %v381_v4 = vld [vmem:[%s370_s24] sm:$0xff]   ;;  %v382_v5 = vld [vmem:[%s370_s24 + $0x8] sm:$0xff]   ;;  %v383_v6 = vld [vmem:[%s370_s24 + $0x10] sm:$0xff]  }
  0x14   : > { %v384_v7 = vld [vmem:[%s370_s24 + $0x18] sm:$0xff]   ;;  %v385_v8 = vld [vmem:[%s370_s24 + $0x20] sm:$0xff]   ;;  %v386_v9 = vld [vmem:[%s370_s24 + $0x28] sm:$0xff]  }
  0x15   : > { %v387_v10 = vld [vmem:[%s370_s24 + $0x30] sm:$0xff]   ;;  %v388_v11 = vld [vmem:[%s370_s24 + $0x38] sm:$0xff]   ;;  %v8266_v12 = vld [vmem:[%s375_s21 + $0x3] ss:$0 sm:$0xff] }
  0x16   : > { %v8268_v13 = vld [vmem:[%s375_s21 + $0x4] ss:$0 sm:$0xff]  ;;  %v8270_v14 = vld [vmem:[%s375_s21 + $0x5] ss:$0 sm:$0xff]  ;;  %v8272_v15 = vld [vmem:[%s375_s21 + $0x6] ss:$0 sm:$0xff] }
  0x17   : > { %v8274_v16 = vld [vmem:[%s375_s21 + $0x7] ss:$0 sm:$0xff] }
  0x18 LB: >> { %9532 = vst [vmem:[#allocation3_spill] sm:$0xff] %v8133_v11  ;;  %9533 = vst [vmem:[#allocation4_spill] sm:$0xff] %v8137_v10  ;;  %vm443_vm0 = vcmask 162816   ;;  %s411_s29 = smul.u32 24, %s8165_s28  ;;  %vm468_vm1 = vcmask 1043456   ;;  %v9522_v21 = vmov 0.0   ;;  %s8165_s28 = sphi %s8292_s28, %s402_s28   ;;  %v8161_v4 = vphi %v381_v4, %v9560_v4   ;;  %v8157_v5 = vphi %v382_v5, %v9559_v5   ;;  %v8153_v6 = vphi %v383_v6, %v9558_v6   ;;  %v8149_v7 = vphi %v384_v7, %v9557_v7   ;;  %v8145_v8 = vphi %v385_v8, %v9556_v8   ;;  %v8141_v9 = vphi %v386_v9, %v9555_v9   ;;  %v8137_v10 = vphi %v387_v10, %v9554_v10   ;;  %v8133_v11 = vphi %v388_v11, %v9553_v11  }
  0x19   : >> { %9534 = vst [vmem:[#allocation5_spill] sm:$0xff] %v8141_v9  ;;  %9535 = vst [vmem:[#allocation6_spill] sm:$0xff] %v8145_v8  ;;  %7357 = vmatprep.mubr.msk.f32.mxu0 %vm443_vm0, %v8161_v4  ;;  %7363 = vmatprep.mubr.msk.f32.mxu1 %vm443_vm0, %v8145_v8  ;;  %vm8168_vm2 = vmmov 0   ;;  %s8169_s13 = smov 96   ;;  %vm628_vm3 = vcmask 64512   ;;  %s8170_s14 = smov 64  }
  0x1a   : >> { %9536 = vst [vmem:[#allocation7_spill] sm:$0xff] %v8149_v7  ;;  %9537 = vst [vmem:[#allocation8_spill] sm:$0xff] %v8153_v6  ;;  %s412_s12 = scalar_lea.vmem %s9513_s2, %s411_s29  ;;  %s8171_s16 = smov 88   ;;  %vm6011_vm4 = vcmask 195584   ;;  %vm6002_vm5 = vcmask 130048   ;;  %vm6024_vm6 = vcmask 261120  }
  0x1b   : >> { %9538 = vst [vmem:[#allocation9_spill] sm:$0xff] %v8157_v5  ;;  %9539 = vst [vmem:[#allocation10_spill] sm:$0xff] %v8161_v4  ;;  %v413_v17 = vld [vmem:[%s412_s12] sm:$0xff]  ;;  %v414_v18 = vld [vmem:[%s412_s12 + $0x8] sm:$0xff]  ;;  %s8172_s17 = smov 120   ;;  %s8173_s9 = smov 56  }
  0x1c   : >> { %v7759_v19 = vpack.c.bf16 %v414_v18, %v413_v17  ;;  %v415_v20 = vld [vmem:[%s412_s12 + $0x10] sm:$0xf]  ;;  %s8174_s18 = smov 80   ;;  %s8175_s19 = smov 112   ;;  %vm6441_vm7 = vcmask 654336  }
  0x1d   : >> { %s8176_s20 = smov 48   ;;  %s8177_s21 = smov 72  }
  0x1e   : >> { %7760 = vmatprep.subr.bf16.mxu0 %v7759_v19  ;;  %7795 = vmatprep.subr.bf16.mxu1 %v7759_v19  ;;  %s8178_s22 = smov 104   ;;  %s8179_s23 = smov 40  }
  0x1f   : >> { %7762 = vmatpush3.bf16.msra.mxu0 %v7759_v19  ;;  %7797 = vmatpush3.bf16.msra.mxu1 %v7759_v19  ;;  %s8180_s24 = smov 8   ;;  %s8181_s25 = smov 16  }
  0x20   : >> { %7355 = vmatprep.subr.msk.mxu0 %vm468_vm1, %v415_v20  ;;  %7796 = vmatprep.subr.msk.mxu1 %vm468_vm1, %v415_v20  ;;  %s7027_s26 = sshll.u32 %s8165_s28, 5 }
  0x21   : >> { %s417_s12 = scalar_lea.vmem %s9514_s3, %s7027_s26  ;;  %s425_s26 = scalar_lea.vmem %s9516_s5, %s8165_s28 }
  0x23   : >> { %7356 = vmatpush3.msk.msra.mxu0 %vm468_vm1, %v415_v20  ;;  %7798 = vmatpush3.msk.msra.mxu1 %vm468_vm1, %v415_v20 }
  0x24   : >> { %7358 = vmatmul.mubr.msk.f32.vlgmr.msra.gmra.mrb[0].mxu0 %vm443_vm0, %v8157_v5  ;;  %7364 = vmatmul.mubr.msk.f32.vlgmr.msra.gmra.mrb[0].mxu1 %vm443_vm0, %v8141_v9 }
  0x25   : >> { %7360 = vmatprep.mubr.msk.f32.mxu0 %vm443_vm0, %v8153_v6  ;;  %7366 = vmatprep.mubr.msk.f32.mxu1 %vm443_vm0, %v8137_v10 }
  0x26   : >> { %7369 = vmatprep.subr.mxu1 %v9522_v21  ;;  %7394 = vmatprep.subr.mxu0 %v9522_v21 }
  0x28   : >> { %7361 = vmatmul.mubr.msk.f32.gmra.mrb[2].mxu0 %vm443_vm0, %v8149_v7  ;;  %7367 = vmatmul.mubr.msk.f32.gmra.mrb[2].mxu1 %vm443_vm0, %v8133_v11 }
  0x29   : >> { %7371 = vmatprep.mubr.msk.f32.mxu1 %vm8168_vm2, %v9522_v21  ;;  %7396 = vmatprep.mubr.msk.f32.mxu0 %vm8168_vm2, %v9522_v21 }
  0xf7   : >> { %v8353_v22 = vpop.f32.mrb[0].mxu0  ;;  %v8355_v23 = vpop.f32.mrb[0].mxu1 }
  0xf8   : >> { %v8357_v24 = vpop.f32.mrb[1].mxu0  ;;  %v8359_v25 = vpop.f32.mrb[1].mxu1 }
  0xf9   : >> { %626 = vrot.lane.b32.xlu0 %v8357_v24, %s8169_s13 }
  0xfb   : >> { %v8362_v26 = vpop.f32.mrb[2].mxu0  ;;  %v8364_v27 = vpop.f32.mrb[2].mxu1 }
  0xfc   : >> { %v8366_v28 = vpop.f32.mrb[3].mxu0  ;;  %v8368_v29 = vpop.f32.mrb[3].mxu1 }
  0xfd   : >> { %704 = vrot.lane.b32.xlu0 %v8353_v22, %s8169_s13  ;;  %781 = vrot.lane.b32.xlu1 %v8366_v28, %s8169_s13 }
 0x101   : >> { %858 = vrot.lane.b32.xlu1 %v8362_v26, %s8169_s13  ;;  %935 = vrot.lane.b32.xlu0 %v8359_v25, %s8169_s13 }
 0x105   : >> { %1012 = vrot.lane.b32.xlu1 %v8355_v23, %s8169_s13  ;;  %1089 = vrot.lane.b32.xlu0 %v8368_v29, %s8169_s13 }
 0x109   : >> { %1166 = vrot.lane.b32.xlu1 %v8364_v27, %s8169_s13  ;;  %s8182_s13 = smov 24  }
 0x16b   : >> { %v627_v30 = vpop.permute.xlu0 %626 }
 0x16c   : >> { %7370 = vmatpush3.xpose.msk.msra.mxu1 %vm628_vm3, %v627_v30 }
 0x16d   : >> { %7374 = vmatprep.subr.mxu1 %v9522_v21 }
 0x16f   : >> { %v705_v31 = vpop.permute.xlu0 %704  ;;  %v782_v32 = vpop.permute.xlu1 %781  ;;  %7372 = vmatmul.mubr.msk.f32.vlgmr.msra.gmra.mrb[4].mxu1 %vm628_vm3, %v8357_v24 }
 0x170   : >> { %7375 = vmatpush3.xpose.msk.msra.mxu1 %vm628_vm3, %v705_v31  ;;  %7376 = vmatprep.mubr.msk.f32.mxu1 %vm8168_vm2, %v9522_v21 }
 0x171   : >> { %7379 = vmatprep.subr.mxu1 %v9522_v21 }
 0x173   : >> { %v859_v33 = vpop.permute.xlu1 %858  ;;  %7377 = vmatmul.mubr.msk.f32.vlgmr.msra.gmra.mrb[6].mxu1 %vm628_vm3, %v8353_v22  ;;  %v936_v35 = vpop.permute.xlu0 %935 }
 0x174   : >> { %7380 = vmatpush3.xpose.msk.msra.mxu1 %vm628_vm3, %v782_v32  ;;  %7381 = vmatprep.mubr.msk.f32.mxu1 %vm8168_vm2, %v9522_v21 }
 0x175   : >> { %7384 = vmatprep.subr.mxu1 %v9522_v21 }
 0x177   : >> { %v1013_v34 = vpop.permute.xlu1 %1012  ;;  %7382 = vmatmul.mubr.msk.f32.vlgmr.msra.gmra.mrb[8].mxu1 %vm628_vm3, %v8366_v28  ;;  %v1090_v37 = vpop.permute.xlu0 %1089 }
 0x178   : >> { %7385 = vmatpush3.xpose.msk.msra.mxu1 %vm628_vm3, %v859_v33  ;;  %7395 = vmatpush3.xpose.msk.msra.mxu0 %vm628_vm3, %v1013_v34 }
 0x179   : >> { %7386 = vmatprep.mubr.msk.f32.mxu1 %vm8168_vm2, %v9522_v21  ;;  %7404 = vmatprep.subr.mxu0 %v9522_v21 }
 0x17a   : >> { %7389 = vmatprep.subr.mxu1 %v9522_v21 }
 0x17b   : >> { %7397 = vmatmul.mubr.msk.f32.vlgmr.msra.gmra.mrb[4].mxu0 %vm628_vm3, %v8355_v23  ;;  %7387 = vmatmul.mubr.msk.f32.vlgmr.msra.gmra.mrb[10].mxu1 %vm628_vm3, %v8362_v26  ;;  %v1167_v36 = vpop.permute.xlu1 %1166 }
 0x17c   : >> { %7390 = vmatpush3.xpose.msk.msra.mxu1 %vm628_vm3, %v936_v35  ;;  %7405 = vmatpush3.xpose.msk.msra.mxu0 %vm628_vm3, %v1167_v36 }
 0x17d   : >> { %7391 = vmatprep.mubr.msk.f32.mxu1 %vm8168_vm2, %v9522_v21  ;;  %7406 = vmatprep.mubr.msk.f32.mxu0 %vm8168_vm2, %v9522_v21 }
 0x17e   : >> { %7399 = vmatprep.subr.mxu1 %v9522_v21  ;;  %7414 = vmatprep.subr.mxu0 %v9522_v21 }
 0x17f   : >> { %7392 = vmatmul.mubr.msk.f32.vlgmr.msra.gmra.mrb[12].mxu1 %vm628_vm3, %v8359_v25  ;;  %7407 = vmatmul.mubr.msk.f32.vlgmr.msra.gmra.mrb[6].mxu0 %vm628_vm3, %v8364_v27 }
 0x180   : >> { %7400 = vmatpush3.xpose.msk.msra.mxu1 %vm628_vm3, %v1090_v37  ;;  %7401 = vmatprep.mubr.msk.f32.mxu1 %vm8168_vm2, %v9522_v21 }
 0x181   : >> { %7409 = vmatprep.subr.mxu1 %v9522_v21  ;;  %7416 = vmatprep.mubr.msk.f32.mxu0 %vm8168_vm2, %v9522_v21 }
 0x183   : >> { %7402 = vmatmul.mubr.msk.f32.vlgmr.msra.gmra.mrb[14].mxu1 %vm628_vm3, %v8368_v29 }
 0x184   : >> { %7411 = vmatprep.mubr.msk.f32.mxu1 %vm8168_vm2, %v9522_v21 }
 0x242   : >> { %v699_v38 = vpop.f32.mrb[4].mxu1 }
 0x243   : >> { %v700_v39 = vadd.f32 %v8260_v1, %v699_v38  ;;  %v7373_v40 = vpop.f32.mrb[5].mxu1 }
 0x245   : >> { %v1242_v41 = vsel %vm628_vm3, %v700_v39, -inf }
 0x246   : >> { %1243 = vmax.xlane.f32.xlu0 %v1242_v41  ;;  %v776_v42 = vpop.f32.mrb[6].mxu1 }
 0x247   : >> { %v8428_v43 = vadd.f32 %v8262_v2, %v776_v42  ;;  %v7378_v44 = vpop.f32.mrb[7].mxu1 }
 0x249   : >> { %v1245_v45 = vsel %vm628_vm3, %v8428_v43, -inf }
 0x24a   : >> { %1246 = vmax.xlane.f32.xlu1 %v1245_v45  ;;  %v853_v46 = vpop.f32.mrb[8].mxu1 }
 0x24b   : >> { %v854_v47 = vadd.f32 %v8264_v3, %v853_v46  ;;  %v7383_v48 = vpop.f32.mrb[9].mxu1 }
 0x24d   : >> { %v1248_v49 = vsel %vm628_vm3, %v854_v47, -inf }
 0x24e   : >> { %v1084_v50 = vpop.f32.mrb[4].mxu0  ;;  %1249 = vmax.xlane.f32.xlu0 %v1248_v49  ;;  %v930_v51 = vpop.f32.mrb[10].mxu1 }
 0x24f   : >> { %v8435_v52 = vadd.f32 %v8266_v12, %v930_v51  ;;  %v7388_v53 = vpop.f32.mrb[11].mxu1  ;;  %v7398_v54 = vpop.f32.mrb[5].mxu0  ;;  %v1085_v55 = vadd.f32 %v8270_v14, %v1084_v50 }
 0x251   : >> { %v1251_v56 = vsel %vm628_vm3, %v8435_v52, -inf  ;;  %v1257_v62 = vsel %vm628_vm3, %v1085_v55, -inf }
 0x252   : >> { %v1238_v57 = vpop.f32.mrb[6].mxu0  ;;  %1252 = vmax.xlane.f32.xlu0 %v1251_v56  ;;  %v1007_v58 = vpop.f32.mrb[12].mxu1 }
 0x253   : >> { %v7393_v59 = vpop.f32.mrb[13].mxu1  ;;  %v7408_v60 = vpop.f32.mrb[7].mxu0  ;;  %v1239_v61 = vadd.f32 %v8274_v16, %v1238_v57  ;;  %v8454_v18 = vadd.f32 %v8268_v13, %v1007_v58 }
 0x255   : >> { %v1263_v17 = vsel %vm628_vm3, %v1239_v61, -inf  ;;  %v1254_v20 = vsel %vm628_vm3, %v8454_v18, -inf }
 0x256   : >> { %1258 = vmax.xlane.f32.xlu0 %v1257_v62  ;;  %v1161_v63 = vpop.f32.mrb[14].mxu1 }
 0x257   : >> { %v7403_v0 = vpop.f32.mrb[15].mxu1  ;;  %v8457_v19 = vadd.f32 %v8272_v15, %v1161_v63 }
 0x259   : >> { %v1260_v30 = vsel %vm628_vm3, %v8457_v19, -inf }
 0x25a   : >> { %1264 = vmax.xlane.f32.xlu0 %v1263_v17 }
 0x25b   : >> { %1330 = vrot.lane.b32.xlu1 %v8357_v24, %s8170_s14 }
 0x25f   : >> { %1482 = vrot.lane.b32.xlu1 %v8366_v28, %s8170_s14 }
 0x263   : >> { %1558 = vrot.lane.b32.xlu1 %v8362_v26, %s8170_s14 }
 0x267   : >> { %1710 = vrot.lane.b32.xlu1 %v8355_v23, %s8170_s14 }
 0x26b   : >> { %1862 = vrot.lane.b32.xlu1 %v8364_v27, %s8170_s14 }
 0x270   : >> { %1406 = vrot.lane.b32.xlu0 %v8353_v22, %s8170_s14 }
 0x274   : >> { %1634 = vrot.lane.b32.xlu0 %v8359_v25, %s8170_s14 }
 0x278   : >> { %1786 = vrot.lane.b32.xlu0 %v8368_v29, %s8170_s14  ;;  %s7028_s14 = sshll.u32 %s8165_s28, 3 }
 0x27c   : >> { %1940 = vrot.lane.b32.xlu0 %v8357_v24, %s8171_s16 }
 0x28f   : >> { %1255 = vmax.xlane.f32.xlu1 %v1254_v20 }
 0x293   : >> { %1261 = vmax.xlane.f32.xlu1 %v1260_v30 }
 0x2a4   : >> { %2018 = vrot.lane.b32.xlu1 %v8353_v22, %s8171_s16 }
 0x2d3   : >> { %v1244_v31 = vpop.xlane.xlu0 %1243 }
 0x2d4   : >> { %v1266_v32 = vsub.f32 %v700_v39, %v1244_v31 }
 0x2d6   : >> { %v1274_v33 = vmul.f32 1.442695, %v1266_v32 }
 0x2d7   : >> { %v1247_v34 = vpop.xlane.xlu1 %1246 }
 0x2d8   : >> { %7895 = vpow2.f32 %v1274_v33  ;;  %v1267_v39 = vsub.f32 %v8428_v43, %v1247_v34 }
 0x2da   : >> { %v1276_v50 = vmul.f32 1.442695, %v1267_v39 }
 0x2db   : >> { %v1331_v35 = vpop.permute.xlu1 %1330  ;;  %v1250_v36 = vpop.xlane.xlu0 %1249 }
 0x2dc   : >> { %v1268_v37 = vsub.f32 %v854_v47, %v1250_v36  ;;  %7410 = vmatpush3.msra.mxu1 %v1331_v35 }
 0x2dd   : >> { %7419 = vmatprep.subr.mxu1 %v9522_v21 }
 0x2de   : >> { %v1278_v38 = vmul.f32 1.442695, %v1268_v37 }
 0x2df   : >> { %v1253_v40 = vpop.xlane.xlu0 %1252  ;;  %v1483_v63 = vpop.permute.xlu1 %1482 }
 0x2e0   : >> { %7897 = vpow2.f32 %v1278_v38  ;;  %v1269_v51 = vsub.f32 %v8435_v52, %v1253_v40 }
 0x2e2   : >> { %v8466_v41 = vpop.eup %7895  ;;  %v1280_v43 = vmul.f32 1.442695, %v1269_v51 }
 0x2e3   : >> { %v1259_v42 = vpop.xlane.xlu0 %1258  ;;  %v1290_v44 = vsel %vm628_vm3, %v8466_v41, 0.0  ;;  %v1559_v0 = vpop.permute.xlu1 %1558 }
 0x2e4   : >> { %v1271_v45 = vsub.f32 %v1085_v55, %v1259_v42  ;;  %1291 = vadd.xlane.f32.xlu1 %v1290_v44 }
 0x2e6   : >> { %v1284_v46 = vmul.f32 1.442695, %v1271_v45 }
 0x2e7   : >> { %v1265_v48 = vpop.xlane.xlu0 %1264  ;;  %v8499_v17 = vpop.permute.xlu1 %1710 }
 0x2e8   : >> { %7899 = vpow2.f32 %v1284_v46  ;;  %v1273_v47 = vsub.f32 %v1239_v61, %v1265_v48 }
 0x2ea   : >> { %v8471_v49 = vpop.eup %7897  ;;  %v1288_v53 = vmul.f32 1.442695, %v1273_v47 }
 0x2eb   : >> { %v1407_v54 = vpop.permute.xlu0 %1406  ;;  %v1296_v56 = vsel %vm628_vm3, %v8471_v49, 0.0  ;;  %v8503_v20 = vpop.permute.xlu1 %1862 }
 0x2ec   : >> { %7901 = vpow2.f32 %v1288_v53  ;;  %7415 = vmatpush3.msra.mxu0 %v1407_v54  ;;  %1297 = vadd.xlane.f32.xlu1 %v1296_v56 }
 0x2ed   : >> { %7424 = vmatprep.subr.mxu0 %v9522_v21  ;;  %7903 = vpow2.f32 %v1276_v50 }
 0x2ee   : >> { %7905 = vpow2.f32 %v1280_v43 }
 0x2ef   : >> { %v1635_v40 = vpop.permute.xlu0 %1634 }
 0x2f2   : >> { %v8477_v55 = vpop.eup %7899 }
 0x2f3   : >> { %v1305_v57 = vsel %vm628_vm3, %v8477_v55, 0.0  ;;  %v8535_v44 = vpop.permute.xlu0 %1786 }
 0x2f4   : >> { %1306 = vadd.xlane.f32.xlu0 %v1305_v57 }
 0x2f6   : >> { %v8481_v52 = vpop.eup %7901 }
 0x2f7   : >> { %v1311_v58 = vsel %vm628_vm3, %v8481_v52, 0.0  ;;  %v8485_v59 = vpop.eup %7903  ;;  %v8537_v46 = vpop.permute.xlu0 %1940 }
 0x2f8   : >> { %1312 = vadd.xlane.f32.xlu0 %v1311_v58  ;;  %v1293_v60 = vsel %vm628_vm3, %v8485_v59, 0.0  ;;  %v8489_v61 = vpop.eup %7905 }
 0x2f9   : >> { %v1299_v62 = vsel %vm628_vm3, %v8489_v61, 0.0 }
 0x2fc   : >> { %1294 = vadd.xlane.f32.xlu0 %v1293_v60 }
 0x2fd   : >> { %2016 = vrot.lane.b32.xlu1 %v8353_v22, %s8172_s17 }
 0x300   : >> { %1300 = vadd.xlane.f32.xlu0 %v1299_v62 }
 0x301   : >> { %2174 = vrot.lane.b32.xlu1 %v8362_v26, %s8171_s16 }
 0x305   : >> { %2172 = vrot.lane.b32.xlu1 %v8362_v26, %s8172_s17 }
 0x316   : >> { %1938 = vrot.lane.b32.xlu0 %v8357_v24, %s8172_s17 }
 0x31a   : >> { %2096 = vrot.lane.b32.xlu0 %v8366_v28, %s8171_s16 }
 0x31c   : >> { %v1256_v30 = vpop.xlane.xlu1 %1255 }
 0x31d   : >> { %v1270_v31 = vsub.f32 %v8454_v18, %v1256_v30 }
 0x31e   : >> { %2094 = vrot.lane.b32.xlu0 %v8366_v28, %s8172_s17 }
 0x31f   : >> { %v1282_v32 = vmul.f32 1.442695, %v1270_v31 }
 0x320   : >> { %v1262_v33 = vpop.xlane.xlu1 %1261 }
 0x321   : >> { %7907 = vpow2.f32 %v1282_v32  ;;  %v1272_v34 = vsub.f32 %v8457_v19, %v1262_v33 }
 0x322   : >> { %2252 = vrot.lane.b32.xlu0 %v8359_v25, %s8171_s16 }
 0x323   : >> { %v1286_v35 = vmul.f32 1.442695, %v1272_v34 }
 0x324   : >> { %v2019_v38 = vpop.permute.xlu1 %2018 }
 0x325   : >> { %7909 = vpow2.f32 %v1286_v35 }
 0x326   : >> { %2250 = vrot.lane.b32.xlu0 %v8359_v25, %s8172_s17 }
 0x32a   : >> { %2408 = vrot.lane.b32.xlu0 %v8368_v29, %s8171_s16 }
 0x32b   : >> { %v8517_v18 = vpop.eup %7907 }
 0x32c   : >> { %v1302_v36 = vsel %vm628_vm3, %v8517_v18, 0.0 }
 0x32d   : >> { %1303 = vadd.xlane.f32.xlu1 %v1302_v36 }
 0x32e   : >> { %2406 = vrot.lane.b32.xlu0 %v8368_v29, %s8172_s17 }
 0x32f   : >> { %v8523_v19 = vpop.eup %7909 }
 0x330   : >> { %v1308_v37 = vsel %vm628_vm3, %v8523_v19, 0.0 }
 0x331   : >> { %1309 = vadd.xlane.f32.xlu1 %v1308_v37 }
 0x342   : >> { %2330 = vrot.lane.b32.xlu1 %v8355_v23, %s8171_s16 }
 0x346   : >> { %2328 = vrot.lane.b32.xlu1 %v8355_v23, %s8172_s17 }
 0x34a   : >> { %2486 = vrot.lane.b32.xlu1 %v8364_v27, %s8171_s16 }
 0x34e   : >> { %2484 = vrot.lane.b32.xlu1 %v8364_v27, %s8172_s17 }
 0x371   : >> { %v1292_v42 = vpop.xlane.xlu1 %1291 }
 0x372   : >> { %7911 = vrcp.f32 %v1292_v42 }
 0x379   : >> { %v1298_v45 = vpop.xlane.xlu1 %1297 }
 0x37a   : >> { %7913 = vrcp.f32 %v1298_v45 }
 0x37c   : >> { %v7912_v39 = vpop.eup %7911 }
 0x37d   : >> { %v1322_v48 = vmul.f32 %v7912_v39, %v8466_v41 }
 0x37f   : >> { %7412 = vmatmul.mubr.msk.f32.vlgmr.msra.gmra.mrb[16].mxu1 %vm628_vm3, %v1322_v48 }
 0x380   : >> { %7420 = vmatpush3.msra.mxu1 %v1483_v63  ;;  %7421 = vmatprep.mubr.msk.f32.mxu1 %vm8168_vm2, %v9522_v21 }
 0x381   : >> { %v1307_v47 = vpop.xlane.xlu0 %1306  ;;  %7429 = vmatprep.subr.mxu1 %v9522_v21 }
 0x384   : >> { %v7914_v50 = vpop.eup %7913 }
 0x385   : >> { %v1313_v51 = vpop.xlane.xlu0 %1312  ;;  %v1324_v53 = vmul.f32 %v7914_v50, %v8471_v49 }
 0x387   : >> { %7422 = vmatmul.mubr.msk.f32.vlgmr.msra.gmra.mrb[18].mxu1 %vm628_vm3, %v1324_v53 }
 0x388   : >> { %7430 = vmatpush3.msra.mxu1 %v1635_v40  ;;  %7431 = vmatprep.mubr.msk.f32.mxu1 %vm8168_vm2, %v9522_v21 }
 0x389   : >> { %v1295_v41 = vpop.xlane.xlu0 %1294  ;;  %7439 = vmatprep.subr.mxu1 %v9522_v21 }
 0x38a   : >> { %7915 = vrcp.f32 %v1295_v41 }
 0x38d   : >> { %v1301_v54 = vpop.xlane.xlu0 %1300 }
 0x38e   : >> { %7917 = vrcp.f32 %v1301_v54 }
 0x38f   : >> { %7919 = vrcp.f32 %v1307_v47 }
 0x390   : >> { %7921 = vrcp.f32 %v1313_v51 }
 0x394   : >> { %v7916_v56 = vpop.eup %7915 }
 0x395   : >> { %v1323_v43 = vmul.f32 %v7916_v56, %v8485_v59 }
 0x397   : >> { %7417 = vmatmul.mubr.msk.f32.vlgmr.msra.gmra.mrb[8].mxu0 %vm628_vm3, %v1323_v43 }
 0x398   : >> { %v7918_v49 = vpop.eup %7917  ;;  %7425 = vmatpush3.msra.mxu0 %v1559_v0  ;;  %7426 = vmatprep.mubr.msk.f32.mxu0 %vm8168_vm2, %v9522_v21 }
 0x399   : >> { %7434 = vmatprep.subr.mxu0 %v9522_v21  ;;  %v1325_v57 = vmul.f32 %v7918_v49, %v8489_v61  ;;  %v7920_v58 = vpop.eup %7919  ;;  %v2017_v61 = vpop.permute.xlu1 %2016 }
 0x39a   : >> { %v1327_v59 = vmul.f32 %v7920_v58, %v8477_v55  ;;  %v7922_v60 = vpop.eup %7921 }
 0x39b   : >> { %7427 = vmatmul.mubr.msk.f32.vlgmr.msra.gmra.mrb[10].mxu0 %vm628_vm3, %v1325_v57  ;;  %v1329_v62 = vmul.f32 %v7922_v60, %v8481_v52  ;;  %v1939_v52 = vpop.permute.xlu0 %1938 }
 0x39c   : >> { %7435 = vmatpush3.msra.mxu0 %v8499_v17  ;;  %7436 = vmatprep.mubr.msk.f32.mxu0 %vm8168_vm2, %v9522_v21 }
 0x39d   : >> { %7444 = vmatprep.subr.mxu0 %v9522_v21  ;;  %v2175_v63 = vpop.permute.xlu1 %2174 }
 0x39f   : >> { %7437 = vmatmul.mubr.msk.f32.vlgmr.msra.gmra.mrb[12].mxu0 %vm628_vm3, %v1327_v59 }
 0x3a0   : >> { %7445 = vmatpush3.msra.mxu0 %v8503_v20  ;;  %7446 = vmatprep.mubr.msk.f32.mxu0 %vm8168_vm2, %v9522_v21  ;;  %v2097_v20 = vpop.permute.xlu0 %2096 }
 0x3a1   : >> { %7454 = vmatprep.subr.mxu0 %v9522_v21  ;;  %v2173_v55 = vpop.permute.xlu1 %2172 }
 0x3a3   : >> { %7447 = vmatmul.mubr.msk.f32.vlgmr.msra.gmra.mrb[14].mxu0 %vm628_vm3, %v1329_v62 }
 0x3a4   : >> { %7456 = vmatprep.mubr.msk.f32.mxu0 %vm8168_vm2, %v9522_v21  ;;  %v2095_v32 = vpop.permute.xlu0 %2094 }
 0x3a7   : >> { %7455 = vmatpush3.xpose.msk.msra.mxu0 %vm628_vm3, %v2019_v38 }
 0x3a8   : >> { %7464 = vmatprep.subr.mxu0 %v9522_v21 }
 0x3aa   : >> { %7457 = vmatmul.mubr.msk.f32.vlgmr.msra.gmra.mrb[16].mxu0 %vm628_vm3, %v2017_v61 }
 0x3ab   : >> { %7465 = vmatpush3.xpose.msk.msra.mxu0 %vm628_vm3, %v2175_v63  ;;  %7466 = vmatprep.mubr.msk.f32.mxu0 %vm8168_vm2, %v9522_v21 }
 0x3ac   : >> { %7474 = vmatprep.subr.mxu0 %v9522_v21 }
 0x3ae   : >> { %7467 = vmatmul.mubr.msk.f32.vlgmr.msra.gmra.mrb[18].mxu0 %vm628_vm3, %v2173_v55 }
 0x3af   : >> { %7476 = vmatprep.mubr.msk.f32.mxu0 %vm8168_vm2, %v9522_v21 }
 0x3ba   : >> { %v1304_v0 = vpop.xlane.xlu1 %1303 }
 0x3bb   : >> { %7923 = vrcp.f32 %v1304_v0 }
 0x3be   : >> { %v1310_v17 = vpop.xlane.xlu1 %1309 }
 0x3bf   : >> { %7925 = vrcp.f32 %v1310_v17 }
 0x3c2   : >> { %v2331_v30 = vpop.permute.xlu1 %2330 }
 0x3c3   : >> { %7475 = vmatpush3.xpose.msk.msra.mxu0 %vm628_vm3, %v2331_v30 }
 0x3c4   : >> { %7484 = vmatprep.subr.mxu0 %v9522_v21 }
 0x3c5   : >> { %v7924_v31 = vpop.eup %7923 }
 0x3c6   : >> { %v2329_v33 = vpop.permute.xlu1 %2328  ;;  %v1326_v34 = vmul.f32 %v7924_v31, %v8517_v18  ;;  %v2253_v18 = vpop.permute.xlu0 %2252 }
 0x3c7   : >> { %7477 = vmatmul.mubr.msk.f32.vlgmr.msra.gmra.mrb[20].mxu0 %vm628_vm3, %v2329_v33 }
 0x3c8   : >> { %7432 = vmatmul.mubr.msk.f32.vlgmr.msra.gmra.mrb[20].mxu1 %vm628_vm3, %v1326_v34  ;;  %7486 = vmatprep.mubr.msk.f32.mxu0 %vm8168_vm2, %v9522_v21 }
 0x3c9   : >> { %v7926_v35 = vpop.eup %7925  ;;  %7440 = vmatpush3.msra.mxu1 %v8535_v44  ;;  %7441 = vmatprep.mubr.msk.f32.mxu1 %vm8168_vm2, %v9522_v21 }
 0x3ca   : >> { %v2487_v36 = vpop.permute.xlu1 %2486  ;;  %v1328_v37 = vmul.f32 %v7926_v35, %v8523_v19  ;;  %7449 = vmatprep.subr.mxu1 %v9522_v21  ;;  %v2251_v19 = vpop.permute.xlu0 %2250 }
 0x3cb   : >> { %7485 = vmatpush3.xpose.msk.msra.mxu0 %vm628_vm3, %v2487_v36 }
 0x3cc   : >> { %7442 = vmatmul.mubr.msk.f32.vlgmr.msra.gmra.mrb[22].mxu1 %vm628_vm3, %v1328_v37  ;;  %7494 = vmatprep.subr.mxu0 %v9522_v21 }
 0x3cd   : >> { %7451 = vmatprep.mubr.msk.f32.mxu1 %vm8168_vm2, %v9522_v21 }
 0x3ce   : >> { %v2485_v38 = vpop.permute.xlu1 %2484  ;;  %v2409_v40 = vpop.permute.xlu0 %2408 }
 0x3cf   : >> { %7487 = vmatmul.mubr.msk.f32.vlgmr.msra.gmra.mrb[22].mxu0 %vm628_vm3, %v2485_v38 }
 0x3d0   : >> { %7450 = vmatpush3.xpose.msk.msra.mxu1 %vm628_vm3, %v8537_v46  ;;  %7496 = vmatprep.mubr.msk.f32.mxu0 %vm8168_vm2, %v9522_v21 }
 0x3d1   : >> { %7459 = vmatprep.subr.mxu1 %v9522_v21 }
 0x3d2   : >> { %v2407_v42 = vpop.permute.xlu0 %2406 }
 0x3d3   : >> { %7452 = vmatmul.mubr.msk.f32.vlgmr.msra.gmra.mrb[24].mxu1 %vm628_vm3, %v1939_v52 }
 0x3d4   : >> { %7460 = vmatpush3.xpose.msk.msra.mxu1 %vm628_vm3, %v2097_v20  ;;  %7461 = vmatprep.mubr.msk.f32.mxu1 %vm8168_vm2, %v9522_v21 }
 0x3d5   : >> { %7469 = vmatprep.subr.mxu1 %v9522_v21 }
 0x3d7   : >> { %7462 = vmatmul.mubr.msk.f32.vlgmr.msra.gmra.mrb[26].mxu1 %vm628_vm3, %v2095_v32 }
 0x3d8   : >> { %7470 = vmatpush3.xpose.msk.msra.mxu1 %vm628_vm3, %v2253_v18  ;;  %7471 = vmatprep.mubr.msk.f32.mxu1 %vm8168_vm2, %v9522_v21 }
 0x3d9   : >> { %7479 = vmatprep.subr.mxu1 %v9522_v21 }
 0x3db   : >> { %7472 = vmatmul.mubr.msk.f32.vlgmr.msra.gmra.mrb[28].mxu1 %vm628_vm3, %v2251_v19 }
 0x3dc   : >> { %7480 = vmatpush3.xpose.msk.msra.mxu1 %vm628_vm3, %v2409_v40  ;;  %7481 = vmatprep.mubr.msk.f32.mxu1 %vm8168_vm2, %v9522_v21 }
 0x3dd   : >> { %7489 = vmatprep.subr.mxu1 %v9522_v21 }
 0x3df   : >> { %7482 = vmatmul.mubr.msk.f32.vlgmr.msra.gmra.mrb[30].mxu1 %vm628_vm3, %v2407_v42 }
 0x3e0   : >> { %7491 = vmatprep.mubr.msk.f32.mxu1 %vm8168_vm2, %v9522_v21 }
 0x452   : >> { %v8621_v44 = vpop.f32.mrb[16].mxu1 }
 0x453   : >> { %v7413_v45 = vpop.f32.mrb[17].mxu1 }
 0x45a   : >> { %v8623_v39 = vpop.f32.mrb[18].mxu1 }
 0x45b   : >> { %v7423_v46 = vpop.f32.mrb[19].mxu1 }
 0x46a   : >> { %v8625_v48 = vpop.f32.mrb[8].mxu0 }
 0x46b   : >> { %v7418_v47 = vpop.f32.mrb[9].mxu0 }
 0x46e   : >> { %v8627_v50 = vpop.f32.mrb[10].mxu0 }
 0x46f   : >> { %v7428_v51 = vpop.f32.mrb[11].mxu0 }
 0x472   : >> { %v8629_v53 = vpop.f32.mrb[12].mxu0 }
 0x473   : >> { %v7438_v41 = vpop.f32.mrb[13].mxu0 }
 0x476   : >> { %v8631_v54 = vpop.f32.mrb[14].mxu0 }
 0x477   : >> { %9540 = vst [vmem:[#allocation11_spill] sm:$0xff] %v8631_v54  ;;  %v7448_v56 = vpop.f32.mrb[15].mxu0 }
 0x47d   : >> { %v2090_v43 = vpop.f32.mrb[16].mxu0 }
 0x47e   : >> { %v2091_v49 = vadd.f32 %v8262_v2, %v2090_v43  ;;  %v7458_v57 = vpop.f32.mrb[17].mxu0 }
 0x480   : >> { %v2565_v58 = vsel %vm628_vm3, %v2091_v49, -inf }
 0x481   : >> { %2566 = vmax.xlane.f32.xlu1 %v2565_v58  ;;  %v2246_v59 = vpop.f32.mrb[18].mxu0 }
 0x482   : >> { %v7468_v60 = vpop.f32.mrb[19].mxu0  ;;  %v2247_v37 = vadd.f32 %v8266_v12, %v2246_v59 }
 0x484   : >> { %v2571_v45 = vsel %vm628_vm3, %v2247_v37, -inf }
 0x49a   : >> { %v2402_v61 = vpop.f32.mrb[20].mxu0 }
 0x49b   : >> { %v8635_v62 = vpop.f32.mrb[20].mxu1  ;;  %v7478_v63 = vpop.f32.mrb[21].mxu0  ;;  %v2403_v42 = vadd.f32 %v8270_v14, %v2402_v61 }
 0x49c   : >> { %v7433_v55 = vpop.f32.mrb[21].mxu1 }
 0x49d   : >> { %v2577_v56 = vsel %vm628_vm3, %v2403_v42, -inf }
 0x49f   : >> { %v8637_v52 = vpop.f32.mrb[22].mxu1 }
 0x4a0   : >> { %9541 = vst [vmem:[#allocation12_spill] sm:$0xff] %v8637_v52  ;;  %v7443_v0 = vpop.f32.mrb[23].mxu1 }
 0x4a2   : >> { %v2558_v17 = vpop.f32.mrb[22].mxu0 }
 0x4a3   : >> { %v7488_v20 = vpop.f32.mrb[23].mxu0  ;;  %v2559_v41 = vadd.f32 %v8274_v16, %v2558_v17 }
 0x4a5   : >> { %v2583_v43 = vsel %vm628_vm3, %v2559_v41, -inf }
 0x4a6   : >> { %v2012_v30 = vpop.f32.mrb[24].mxu1 }
 0x4a7   : >> { %v2013_v31 = vadd.f32 %v8260_v1, %v2012_v30  ;;  %v7453_v32 = vpop.f32.mrb[25].mxu1 }
 0x4a9   : >> { %v2562_v33 = vsel %vm628_vm3, %v2013_v31, -inf }
 0x4aa   : >> { %2563 = vmax.xlane.f32.xlu0 %v2562_v33  ;;  %v2168_v34 = vpop.f32.mrb[26].mxu1 }
 0x4ab   : >> { %v2169_v35 = vadd.f32 %v8264_v3, %v2168_v34  ;;  %v7463_v36 = vpop.f32.mrb[27].mxu1 }
 0x4ad   : >> { %v2568_v18 = vsel %vm628_vm3, %v2169_v35, -inf }
 0x4ae   : >> { %2569 = vmax.xlane.f32.xlu0 %v2568_v18  ;;  %v2324_v38 = vpop.f32.mrb[28].mxu1 }
 0x4af   : >> { %v2325_v19 = vadd.f32 %v8268_v13, %v2324_v38  ;;  %v7473_v40 = vpop.f32.mrb[29].mxu1 }
 0x4b1   : >> { %v2574_v46 = vsel %vm628_vm3, %v2325_v19, -inf }
 0x4b2   : >> { %2572 = vmax.xlane.f32.xlu0 %v2571_v45  ;;  %2575 = vmax.xlane.f32.xlu1 %v2574_v46  ;;  %v2480_v47 = vpop.f32.mrb[30].mxu1 }
 0x4b3   : >> { %v7483_v51 = vpop.f32.mrb[31].mxu1  ;;  %v8660_v57 = vadd.f32 %v8272_v15, %v2480_v47 }
 0x4b5   : >> { %v2580_v58 = vsel %vm628_vm3, %v8660_v57, -inf }
 0x4b6   : >> { %2578 = vmax.xlane.f32.xlu0 %v2577_v56 }
 0x4ba   : >> { %2584 = vmax.xlane.f32.xlu0 %v2583_v43 }
 0x4c3   : >> { %2650 = vrot.lane.b32.xlu1 %v8357_v24, %s8173_s9 }
 0x4d0   : >> { %2726 = vrot.lane.b32.xlu0 %v8353_v22, %s8173_s9 }
 0x4d4   : >> { %2954 = vrot.lane.b32.xlu0 %v8359_v25, %s8173_s9 }
 0x4d8   : >> { %3106 = vrot.lane.b32.xlu0 %v8368_v29, %s8173_s9 }
 0x4dc   : >> { %3260 = vrot.lane.b32.xlu0 %v8357_v24, %s8174_s18 }
 0x4e0   : >> { %3258 = vrot.lane.b32.xlu0 %v8357_v24, %s8175_s19 }
 0x4e4   : >> { %3416 = vrot.lane.b32.xlu0 %v8366_v28, %s8174_s18 }
 0x4e7   : >> { %2581 = vmax.xlane.f32.xlu1 %v2580_v58 }
 0x4f8   : >> { %2802 = vrot.lane.b32.xlu1 %v8366_v28, %s8173_s9 }
 0x4fc   : >> { %2878 = vrot.lane.b32.xlu1 %v8362_v26, %s8173_s9 }
 0x500   : >> { %3030 = vrot.lane.b32.xlu1 %v8355_v23, %s8173_s9 }
 0x504   : >> { %3182 = vrot.lane.b32.xlu1 %v8364_v27, %s8173_s9  ;;  %s423_s9 = scalar_lea.vmem %s9515_s4, %s7028_s14 }
 0x508   : >> { %3338 = vrot.lane.b32.xlu1 %v8353_v22, %s8174_s18 }
 0x50c   : >> { %3336 = vrot.lane.b32.xlu1 %v8353_v22, %s8175_s19 }
 0x50e   : >> { %v2567_v59 = vpop.xlane.xlu1 %2566 }
 0x50f   : >> { %v2587_v60 = vsub.f32 %v2091_v49, %v2567_v59 }
 0x510   : >> { %3494 = vrot.lane.b32.xlu1 %v8362_v26, %s8174_s18 }
 0x511   : >> { %v2596_v61 = vmul.f32 1.442695, %v2587_v60 }
 0x513   : >> { %7927 = vpow2.f32 %v2596_v61 }
 0x51d   : >> { %v8676_v63 = vpop.eup %7927 }
 0x51e   : >> { %v2613_v55 = vsel %vm628_vm3, %v8676_v63, 0.0 }
 0x51f   : >> { %2614 = vadd.xlane.f32.xlu0 %v2613_v55 }
 0x537   : >> { %v2564_v0 = vpop.xlane.xlu0 %2563 }
 0x538   : >> { %v2586_v17 = vsub.f32 %v2013_v31, %v2564_v0 }
 0x53a   : >> { %v2594_v20 = vmul.f32 1.442695, %v2586_v17 }
 0x53b   : >> { %v2570_v30 = vpop.xlane.xlu0 %2569 }
 0x53c   : >> { %7929 = vpow2.f32 %v2594_v20  ;;  %v2588_v32 = vsub.f32 %v2169_v35, %v2570_v30 }
 0x53e   : >> { %v2598_v33 = vmul.f32 1.442695, %v2588_v32 }
 0x53f   : >> { %v2573_v34 = vpop.xlane.xlu0 %2572  ;;  %v2576_v49 = vpop.xlane.xlu1 %2575 }
 0x540   : >> { %7931 = vpow2.f32 %v2598_v33  ;;  %v2589_v36 = vsub.f32 %v2247_v37, %v2573_v34  ;;  %v2590_v18 = vsub.f32 %v2325_v19, %v2576_v49 }
 0x542   : >> { %v2600_v38 = vmul.f32 1.442695, %v2589_v36  ;;  %v2602_v40 = vmul.f32 1.442695, %v2590_v18 }
 0x543   : >> { %v2579_v45 = vpop.xlane.xlu0 %2578  ;;  %v2651_v46 = vpop.permute.xlu1 %2650 }
 0x544   : >> { %7933 = vpow2.f32 %v2600_v38  ;;  %v2591_v47 = vsub.f32 %v2403_v42, %v2579_v45  ;;  %7490 = vmatpush3.msra.mxu1 %v2651_v46 }
 0x545   : >> { %7935 = vpow2.f32 %v2602_v40  ;;  %7499 = vmatprep.subr.mxu1 %v9522_v21 }
 0x546   : >> { %v8681_v31 = vpop.eup %7929  ;;  %v2604_v51 = vmul.f32 1.442695, %v2591_v47 }
 0x547   : >> { %v2585_v35 = vpop.xlane.xlu0 %2584  ;;  %v2610_v56 = vsel %vm628_vm3, %v8681_v31, 0.0 }
 0x548   : >> { %7937 = vpow2.f32 %v2604_v51  ;;  %v2593_v37 = vsub.f32 %v2559_v41, %v2585_v35  ;;  %2611 = vadd.xlane.f32.xlu1 %v2610_v56 }
 0x54a   : >> { %v8685_v19 = vpop.eup %7931  ;;  %v2608_v43 = vmul.f32 1.442695, %v2593_v37 }
 0x54b   : >> { %v2727_v58 = vpop.permute.xlu0 %2726  ;;  %v2616_v42 = vsel %vm628_vm3, %v8685_v19, 0.0 }
 0x54c   : >> { %7939 = vpow2.f32 %v2608_v43  ;;  %7495 = vmatpush3.msra.mxu0 %v2727_v58  ;;  %2617 = vadd.xlane.f32.xlu1 %v2616_v42 }
 0x54d   : >> { %7504 = vmatprep.subr.mxu0 %v9522_v21 }
 0x54e   : >> { %v8690_v59 = vpop.eup %7933 }
 0x54f   : >> { %v8692_v60 = vpop.eup %7935  ;;  %v2619_v41 = vsel %vm628_vm3, %v8690_v59, 0.0  ;;  %v2955_v49 = vpop.permute.xlu0 %2954 }
 0x550   : >> { %2620 = vadd.xlane.f32.xlu0 %v2619_v41  ;;  %v2622_v61 = vsel %vm628_vm3, %v8692_v60, 0.0 }
 0x551   : >> { %2623 = vadd.xlane.f32.xlu1 %v2622_v61 }
 0x552   : >> { %v8698_v55 = vpop.eup %7937 }
 0x553   : >> { %v2625_v0 = vsel %vm628_vm3, %v8698_v55, 0.0  ;;  %v3107_v36 = vpop.permute.xlu0 %3106 }
 0x554   : >> { %2626 = vadd.xlane.f32.xlu0 %v2625_v0 }
 0x556   : >> { %v8702_v17 = vpop.eup %7939 }
 0x557   : >> { %v2631_v20 = vsel %vm628_vm3, %v8702_v17, 0.0  ;;  %v8735_v18 = vpop.permute.xlu0 %3260 }
 0x558   : >> { %2632 = vadd.xlane.f32.xlu0 %v2631_v20 }
 0x55b   : >> { %v8739_v38 = vpop.permute.xlu0 %3258 }
 0x55f   : >> { %v8745_v40 = vpop.permute.xlu0 %3416 }
 0x56e   : >> { %3414 = vrot.lane.b32.xlu0 %v8366_v28, %s8175_s19 }
 0x572   : >> { %3572 = vrot.lane.b32.xlu0 %v8359_v25, %s8174_s18 }
 0x574   : >> { %v2582_v30 = vpop.xlane.xlu1 %2581 }
 0x575   : >> { %v2592_v32 = vsub.f32 %v8660_v57, %v2582_v30 }
 0x576   : >> { %3570 = vrot.lane.b32.xlu0 %v8359_v25, %s8175_s19 }
 0x577   : >> { %v2606_v33 = vmul.f32 1.442695, %v2592_v32 }
 0x578   : >> { %v2803_v46 = vpop.permute.xlu1 %2802 }
 0x579   : >> { %7941 = vpow2.f32 %v2606_v33 }
 0x57a   : >> { %3728 = vrot.lane.b32.xlu0 %v8368_v29, %s8174_s18 }
 0x57c   : >> { %v2879_v47 = vpop.permute.xlu1 %2878 }
 0x57e   : >> { %3726 = vrot.lane.b32.xlu0 %v8368_v29, %s8175_s19 }
 0x580   : >> { %v3031_v56 = vpop.permute.xlu1 %3030 }
 0x582   : >> { %4046 = vrot.lane.b32.xlu0 %v8353_v22, %s8176_s20 }
 0x583   : >> { %v8719_v34 = vpop.eup %7941 }
 0x584   : >> { %v2628_v57 = vsel %vm628_vm3, %v8719_v34, 0.0  ;;  %v3183_v37 = vpop.permute.xlu1 %3182 }
 0x585   : >> { %2629 = vadd.xlane.f32.xlu1 %v2628_v57 }
 0x586   : >> { %4274 = vrot.lane.b32.xlu0 %v8359_v25, %s8176_s20 }
 0x58a   : >> { %4426 = vrot.lane.b32.xlu0 %v8368_v29, %s8176_s20 }
 0x58e   : >> { %4580 = vrot.lane.b32.xlu0 %v8357_v24, %s8177_s21 }
 0x592   : >> { %4578 = vrot.lane.b32.xlu0 %v8357_v24, %s8178_s22 }
 0x596   : >> { %3492 = vrot.lane.b32.xlu1 %v8362_v26, %s8175_s19 }
 0x59a   : >> { %3650 = vrot.lane.b32.xlu1 %v8355_v23, %s8174_s18 }
 0x59e   : >> { %3648 = vrot.lane.b32.xlu1 %v8355_v23, %s8175_s19 }
 0x5a2   : >> { %3806 = vrot.lane.b32.xlu1 %v8364_v27, %s8174_s18 }
 0x5a6   : >> { %3804 = vrot.lane.b32.xlu1 %v8364_v27, %s8175_s19 }
 0x5aa   : >> { %3970 = vrot.lane.b32.xlu1 %v8357_v24, %s8176_s20 }
 0x5ac   : >> { %v2615_v45 = vpop.xlane.xlu0 %2614 }
 0x5ad   : >> { %7943 = vrcp.f32 %v2615_v45 }
 0x5ae   : >> { %4122 = vrot.lane.b32.xlu1 %v8366_v28, %s8176_s20 }
 0x5b2   : >> { %4198 = vrot.lane.b32.xlu1 %v8362_v26, %s8176_s20 }
 0x5b6   : >> { %4350 = vrot.lane.b32.xlu1 %v8355_v23, %s8176_s20 }
 0x5b7   : >> { %v7944_v51 = vpop.eup %7943 }
 0x5b8   : >> { %v2643_v35 = vmul.f32 %v7944_v51, %v8676_v63  ;;  %v3339_v63 = vpop.permute.xlu1 %3338 }
 0x5ba   : >> { %7497 = vmatmul.mubr.msk.f32.vlgmr.msra.gmra.mrb[24].mxu0 %vm628_vm3, %v2643_v35  ;;  %4502 = vrot.lane.b32.xlu1 %v8364_v27, %s8176_s20  ;;  %s427_s20 = scalar_lea.vmem %s9517_s6, %s411_s29 }
 0x5bb   : >> { %7505 = vmatpush3.msra.mxu0 %v2879_v47  ;;  %7506 = vmatprep.mubr.msk.f32.mxu0 %vm8168_vm2, %v9522_v21 }
 0x5bc   : >> { %7514 = vmatprep.subr.mxu0 %v9522_v21  ;;  %v3337_v43 = vpop.permute.xlu1 %3336 }
 0x5be   : >> { %4658 = vrot.lane.b32.xlu1 %v8353_v22, %s8177_s21 }
 0x5c0   : >> { %v3495_v58 = vpop.permute.xlu1 %3494 }
 0x5c2   : >> { %4656 = vrot.lane.b32.xlu1 %v8353_v22, %s8178_s22 }
 0x5d5   : >> { %v2612_v42 = vpop.xlane.xlu1 %2611 }
 0x5d6   : >> { %7945 = vrcp.f32 %v2612_v42 }
 0x5d9   : >> { %v2618_v41 = vpop.xlane.xlu1 %2617 }
 0x5da   : >> { %7947 = vrcp.f32 %v2618_v41 }
 0x5dd   : >> { %v2621_v61 = vpop.xlane.xlu0 %2620 }
 0x5de   : >> { %7949 = vrcp.f32 %v2621_v61  ;;  %v2624_v0 = vpop.xlane.xlu1 %2623 }
 0x5df   : >> { %7951 = vrcp.f32 %v2624_v0 }
 0x5e0   : >> { %v7946_v20 = vpop.eup %7945 }
 0x5e1   : >> { %v2627_v30 = vpop.xlane.xlu0 %2626  ;;  %v2642_v32 = vmul.f32 %v7946_v20, %v8681_v31 }
 0x5e2   : >> { %7953 = vrcp.f32 %v2627_v30 }
 0x5e3   : >> { %7492 = vmatmul.mubr.msk.f32.vlgmr.msra.gmra.mrb[32].mxu1 %vm628_vm3, %v2642_v32 }
 0x5e4   : >> { %v7948_v33 = vpop.eup %7947  ;;  %7500 = vmatpush3.msra.mxu1 %v2803_v46  ;;  %7501 = vmatprep.mubr.msk.f32.mxu1 %vm8168_vm2, %v9522_v21 }
 0x5e5   : >> { %v2633_v57 = vpop.xlane.xlu0 %2632  ;;  %7509 = vmatprep.subr.mxu1 %v9522_v21  ;;  %v2644_v45 = vmul.f32 %v7948_v33, %v8685_v19 }
 0x5e6   : >> { %7955 = vrcp.f32 %v2633_v57 }
 0x5e7   : >> { %7502 = vmatmul.mubr.msk.f32.vlgmr.msra.gmra.mrb[34].mxu1 %vm628_vm3, %v2644_v45 }
 0x5e8   : >> { %v7950_v47 = vpop.eup %7949  ;;  %7510 = vmatpush3.msra.mxu1 %v2955_v49  ;;  %7511 = vmatprep.mubr.msk.f32.mxu1 %vm8168_vm2, %v9522_v21 }
 0x5e9   : >> { %v7952_v31 = vpop.eup %7951  ;;  %7519 = vmatprep.subr.mxu1 %v9522_v21  ;;  %v2645_v46 = vmul.f32 %v7950_v47, %v8690_v59 }
 0x5ea   : >> { %v2646_v51 = vmul.f32 %v7952_v31, %v8692_v60 }
 0x5eb   : >> { %7507 = vmatmul.mubr.msk.f32.vlgmr.msra.gmra.mrb[26].mxu0 %vm628_vm3, %v2645_v46 }
 0x5ec   : >> { %v7954_v35 = vpop.eup %7953  ;;  %7512 = vmatmul.mubr.msk.f32.vlgmr.msra.gmra.mrb[36].mxu1 %vm628_vm3, %v2646_v51  ;;  %7515 = vmatpush3.msra.mxu0 %v3031_v56 }
 0x5ed   : >> { %7520 = vmatpush3.msra.mxu1 %v3107_v36  ;;  %7516 = vmatprep.mubr.msk.f32.mxu0 %vm8168_vm2, %v9522_v21  ;;  %v2647_v19 = vmul.f32 %v7954_v35, %v8698_v55  ;;  %v3415_v55 = vpop.permute.xlu0 %3414 }
 0x5ee   : >> { %7524 = vmatprep.subr.mxu0 %v9522_v21  ;;  %7521 = vmatprep.mubr.msk.f32.mxu1 %vm8168_vm2, %v9522_v21 }
 0x5ef   : >> { %7517 = vmatmul.mubr.msk.f32.vlgmr.msra.gmra.mrb[28].mxu0 %vm628_vm3, %v2647_v19  ;;  %7529 = vmatprep.subr.mxu1 %v9522_v21 }
 0x5f0   : >> { %v7956_v59 = vpop.eup %7955  ;;  %7525 = vmatpush3.msra.mxu0 %v3183_v37  ;;  %7526 = vmatprep.mubr.msk.f32.mxu0 %vm8168_vm2, %v9522_v21 }
 0x5f1   : >> { %v2649_v60 = vmul.f32 %v7956_v59, %v8702_v17  ;;  %7534 = vmatprep.subr.mxu0 %v9522_v21  ;;  %v3573_v17 = vpop.permute.xlu0 %3572 }
 0x5f3   : >> { %7527 = vmatmul.mubr.msk.f32.vlgmr.msra.gmra.mrb[30].mxu0 %vm628_vm3, %v2649_v60 }
 0x5f4   : >> { %7536 = vmatprep.mubr.msk.f32.mxu0 %vm8168_vm2, %v9522_v21 }
 0x5f5   : >> { %v3571_v36 = vpop.permute.xlu0 %3570 }
 0x5f7   : >> { %7535 = vmatpush3.xpose.msk.msra.mxu0 %vm628_vm3, %v3339_v63 }
 0x5f8   : >> { %7544 = vmatprep.subr.mxu0 %v9522_v21 }
 0x5f9   : >> { %v3729_v63 = vpop.permute.xlu0 %3728 }
 0x5fa   : >> { %7537 = vmatmul.mubr.msk.f32.vlgmr.msra.gmra.mrb[32].mxu0 %vm628_vm3, %v3337_v43 }
 0x5fb   : >> { %7545 = vmatpush3.xpose.msk.msra.mxu0 %vm628_vm3, %v3495_v58  ;;  %7546 = vmatprep.mubr.msk.f32.mxu0 %vm8168_vm2, %v9522_v21 }
 0x5fc   : >> { %7554 = vmatprep.subr.mxu0 %v9522_v21 }
 0x5fd   : >> { %v3727_v41 = vpop.permute.xlu0 %3726 }
 0x612   : >> { %v2630_v49 = vpop.xlane.xlu1 %2629 }
 0x613   : >> { %7957 = vrcp.f32 %v2630_v49 }
 0x616   : >> { %v3493_v56 = vpop.permute.xlu1 %3492 }
 0x617   : >> { %7547 = vmatmul.mubr.msk.f32.vlgmr.msra.gmra.mrb[34].mxu0 %vm628_vm3, %v3493_v56 }
 0x618   : >> { %7556 = vmatprep.mubr.msk.f32.mxu0 %vm8168_vm2, %v9522_v21 }
 0x61a   : >> { %v3651_v37 = vpop.permute.xlu1 %3650 }
 0x61b   : >> { %7555 = vmatpush3.xpose.msk.msra.mxu0 %vm628_vm3, %v3651_v37 }
 0x61c   : >> { %7564 = vmatprep.subr.mxu0 %v9522_v21 }
 0x61d   : >> { %v7958_v43 = vpop.eup %7957 }
 0x61e   : >> { %v3649_v58 = vpop.permute.xlu1 %3648  ;;  %v2648_v42 = vmul.f32 %v7958_v43, %v8719_v34 }
 0x61f   : >> { %7557 = vmatmul.mubr.msk.f32.vlgmr.msra.gmra.mrb[36].mxu0 %vm628_vm3, %v3649_v58 }
 0x620   : >> { %7522 = vmatmul.mubr.msk.f32.vlgmr.msra.gmra.mrb[38].mxu1 %vm628_vm3, %v2648_v42  ;;  %7566 = vmatprep.mubr.msk.f32.mxu0 %vm8168_vm2, %v9522_v21 }
 0x621   : >> { %7530 = vmatpush3.xpose.msk.msra.mxu1 %vm628_vm3, %v8735_v18  ;;  %7531 = vmatprep.mubr.msk.f32.mxu1 %vm8168_vm2, %v9522_v21  ;;  %v4047_v18 = vpop.permute.xlu0 %4046 }
 0x622   : >> { %v3807_v61 = vpop.permute.xlu1 %3806  ;;  %7539 = vmatprep.subr.mxu1 %v9522_v21 }
 0x623   : >> { %7565 = vmatpush3.xpose.msk.msra.mxu0 %vm628_vm3, %v3807_v61 }
 0x624   : >> { %7532 = vmatmul.mubr.msk.f32.vlgmr.msra.gmra.mrb[40].mxu1 %vm628_vm3, %v8739_v38  ;;  %7574 = vmatprep.subr.mxu0 %v9522_v21 }
 0x625   : >> { %7540 = vmatpush3.xpose.msk.msra.mxu1 %vm628_vm3, %v8745_v40  ;;  %7541 = vmatprep.mubr.msk.f32.mxu1 %vm8168_vm2, %v9522_v21 }
 0x626   : >> { %v3805_v34 = vpop.permute.xlu1 %3804  ;;  %7549 = vmatprep.subr.mxu1 %v9522_v21 }
 0x627   : >> { %7567 = vmatmul.mubr.msk.f32.vlgmr.msra.gmra.mrb[38].mxu0 %vm628_vm3, %v3805_v34 }
 0x628   : >> { %7575 = vmatpush3.msra.mxu0 %v4047_v18  ;;  %7542 = vmatmul.mubr.msk.f32.vlgmr.msra.gmra.mrb[42].mxu1 %vm628_vm3, %v3415_v55 }
 0x629   : >> { %7550 = vmatpush3.xpose.msk.msra.mxu1 %vm628_vm3, %v3573_v17  ;;  %7551 = vmatprep.mubr.msk.f32.mxu1 %vm8168_vm2, %v9522_v21 }
 0x62a   : >> { %7559 = vmatprep.subr.mxu1 %v9522_v21  ;;  %7576 = vmatprep.mubr.msk.f32.mxu0 %vm8168_vm2, %v9522_v21  ;;  %v3971_v38 = vpop.permute.xlu1 %3970 }
 0x62b   : >> { %7584 = vmatprep.subr.mxu0 %v9522_v21 }
 0x62c   : >> { %7552 = vmatmul.mubr.msk.f32.vlgmr.msra.gmra.mrb[44].mxu1 %vm628_vm3, %v3571_v36 }
 0x62d   : >> { %7560 = vmatpush3.xpose.msk.msra.mxu1 %vm628_vm3, %v3729_v63  ;;  %7561 = vmatprep.mubr.msk.f32.mxu1 %vm8168_vm2, %v9522_v21 }
 0x62e   : >> { %7569 = vmatprep.subr.mxu1 %v9522_v21 }
 0x630   : >> { %7562 = vmatmul.mubr.msk.f32.vlgmr.msra.gmra.mrb[46].mxu1 %vm628_vm3, %v3727_v41 }
 0x631   : >> { %7570 = vmatpush3.msra.mxu1 %v3971_v38  ;;  %7571 = vmatprep.mubr.msk.f32.mxu1 %vm8168_vm2, %v9522_v21 }
 0x632   : >> { %7579 = vmatprep.subr.mxu1 %v9522_v21 }
 0x68d   : >> { %v8844_v40 = vpop.f32.mrb[24].mxu0 }
 0x68e   : >> { %v7498_v0 = vpop.f32.mrb[25].mxu0 }
 0x6b6   : >> { %v8846_v20 = vpop.f32.mrb[32].mxu1 }
 0x6b7   : >> { %v7493_v30 = vpop.f32.mrb[33].mxu1 }
 0x6ba   : >> { %v8848_v32 = vpop.f32.mrb[34].mxu1 }
 0x6bb   : >> { %v7503_v33 = vpop.f32.mrb[35].mxu1 }
 0x6be   : >> { %v8850_v57 = vpop.f32.mrb[26].mxu0 }
 0x6bf   : >> { %v8852_v45 = vpop.f32.mrb[36].mxu1  ;;  %v7508_v47 = vpop.f32.mrb[27].mxu0 }
 0x6c0   : >> { %v7513_v31 = vpop.f32.mrb[37].mxu1 }
 0x6c2   : >> { %v8854_v46 = vpop.f32.mrb[28].mxu0 }
 0x6c3   : >> { %v7518_v51 = vpop.f32.mrb[29].mxu0 }
 0x6c6   : >> { %v8856_v35 = vpop.f32.mrb[30].mxu0 }
 0x6c7   : >> { %v7528_v19 = vpop.f32.mrb[31].mxu0 }
 0x6cd   : >> { %v3410_v59 = vpop.f32.mrb[32].mxu0 }
 0x6ce   : >> { %v3411_v60 = vadd.f32 %v8262_v2, %v3410_v59  ;;  %v7538_v55 = vpop.f32.mrb[33].mxu0 }
 0x6d0   : >> { %v3885_v17 = vsel %vm628_vm3, %v3411_v60, -inf }
 0x6d1   : >> { %3886 = vmax.xlane.f32.xlu1 %v3885_v17 }
 0x6ea   : >> { %v3566_v49 = vpop.f32.mrb[34].mxu0 }
 0x6eb   : >> { %v7548_v36 = vpop.f32.mrb[35].mxu0  ;;  %v3567_v33 = vadd.f32 %v8266_v12, %v3566_v49 }
 0x6ed   : >> { %v3891_v55 = vsel %vm628_vm3, %v3567_v33, -inf }
 0x6f2   : >> { %v3722_v56 = vpop.f32.mrb[36].mxu0 }
 0x6f3   : >> { %v8860_v37 = vpop.f32.mrb[38].mxu1  ;;  %v7558_v63 = vpop.f32.mrb[37].mxu0  ;;  %v3723_v59 = vadd.f32 %v8270_v14, %v3722_v56 }
 0x6f4   : >> { %v7523_v43 = vpop.f32.mrb[39].mxu1 }
 0x6f7   : >> { %v3332_v58 = vpop.f32.mrb[40].mxu1 }
 0x6f8   : >> { %v3333_v42 = vadd.f32 %v8260_v1, %v3332_v58  ;;  %v7533_v41 = vpop.f32.mrb[41].mxu1  ;;  %v3897_v58 = vsel %vm628_vm3, %v3723_v59, -inf }
 0x6fa   : >> { %v3878_v61 = vpop.f32.mrb[38].mxu0  ;;  %v3882_v34 = vsel %vm628_vm3, %v3333_v42, -inf }
 0x6fb   : >> { %v7568_v18 = vpop.f32.mrb[39].mxu0  ;;  %3883 = vmax.xlane.f32.xlu0 %v3882_v34  ;;  %v3488_v38 = vpop.f32.mrb[42].mxu1  ;;  %v8875_v43 = vadd.f32 %v8274_v16, %v3878_v61 }
 0x6fc   : >> { %v3489_v0 = vadd.f32 %v8264_v3, %v3488_v38  ;;  %v7543_v30 = vpop.f32.mrb[43].mxu1  ;;  %v8886_v34 = vpop.permute.xlu1 %4122 }
 0x6fd   : >> { %v3903_v56 = vsel %vm628_vm3, %v8875_v43, -inf }
 0x6fe   : >> { %v3888_v47 = vsel %vm628_vm3, %v3489_v0, -inf }
 0x6ff   : >> { %3889 = vmax.xlane.f32.xlu0 %v3888_v47  ;;  %v3644_v31 = vpop.f32.mrb[44].mxu1 }
 0x700   : >> { %v3645_v51 = vadd.f32 %v8268_v13, %v3644_v31  ;;  %v7553_v19 = vpop.f32.mrb[45].mxu1  ;;  %v8888_v61 = vpop.permute.xlu1 %4198 }
 0x702   : >> { %v3894_v17 = vsel %vm628_vm3, %v3645_v51, -inf }
 0x703   : >> { %3892 = vmax.xlane.f32.xlu0 %v3891_v55  ;;  %3895 = vmax.xlane.f32.xlu1 %v3894_v17  ;;  %v3800_v36 = vpop.f32.mrb[46].mxu1 }
 0x704   : >> { %v8872_v63 = vadd.f32 %v8272_v15, %v3800_v36  ;;  %v7563_v49 = vpop.f32.mrb[47].mxu1  ;;  %v8890_v18 = vpop.permute.xlu1 %4350 }
 0x705   : >> { %v8902_v49 = vpop.permute.xlu0 %4274 }
 0x706   : >> { %v3900_v41 = vsel %vm628_vm3, %v8872_v63, -inf }
 0x707   : >> { %3898 = vmax.xlane.f32.xlu0 %v3897_v58  ;;  %3901 = vmax.xlane.f32.xlu1 %v3900_v41 }
 0x708   : >> { %v8892_v38 = vpop.permute.xlu1 %4502 }
 0x709   : >> { %v8904_v58 = vpop.permute.xlu0 %4426 }
 0x70b   : >> { %3904 = vmax.xlane.f32.xlu0 %v3903_v56 }
 0x70c   : >> { %v8894_v30 = vpop.permute.xlu1 %4658 }
 0x70d   : >> { %v8906_v41 = vpop.permute.xlu0 %4580 }
 0x710   : >> { %v8896_v47 = vpop.permute.xlu1 %4656 }
 0x711   : >> { %v8908_v56 = vpop.permute.xlu0 %4578 }
 0x718   : >> { %4814 = vrot.lane.b32.xlu1 %v8362_v26, %s8177_s21 }
 0x721   : >> { %4736 = vrot.lane.b32.xlu0 %v8366_v28, %s8177_s21 }
 0x75e   : >> { %v3887_v31 = vpop.xlane.xlu1 %3886 }
 0x75f   : >> { %v3907_v19 = vsub.f32 %v3411_v60, %v3887_v31 }
 0x761   : >> { %v3916_v55 = vmul.f32 1.442695, %v3907_v19 }
 0x763   : >> { %7959 = vpow2.f32 %v3916_v55 }
 0x76d   : >> { %v8898_v17 = vpop.eup %7959 }
 0x76e   : >> { %v3933_v36 = vsel %vm628_vm3, %v8898_v17, 0.0 }
 0x76f   : >> { %3934 = vadd.xlane.f32.xlu0 %v3933_v36 }
 0x788   : >> { %v3884_v21 = vpop.xlane.xlu0 %3883 }
 0x789   : >> { %v3906_v11 = vsub.f32 %v3333_v42, %v3884_v21 }
 0x78b   : >> { %v3914_v10 = vmul.f32 1.442695, %v3906_v11 }
 0x78c   : >> { %v3890_v60 = vpop.xlane.xlu0 %3889 }
 0x78d   : >> { %7961 = vpow2.f32 %v3914_v10  ;;  %v3908_v31 = vsub.f32 %v3489_v0, %v3890_v60 }
 0x78f   : >> { %v3918_v19 = vmul.f32 1.442695, %v3908_v31 }
 0x790   : >> { %v3893_v55 = vpop.xlane.xlu0 %3892  ;;  %v3896_v9 = vpop.xlane.xlu1 %3895 }
 0x791   : >> { %7963 = vpow2.f32 %v3918_v19  ;;  %v3909_v8 = vsub.f32 %v3567_v33, %v3893_v55  ;;  %v3910_v36 = vsub.f32 %v3645_v51, %v3896_v9 }
 0x793   : >> { %v3920_v7 = vmul.f32 1.442695, %v3909_v8  ;;  %v3922_v6 = vmul.f32 1.442695, %v3910_v36 }
 0x794   : >> { %v3899_v4 = vpop.xlane.xlu0 %3898 }
 0x795   : >> { %7965 = vpow2.f32 %v3920_v7  ;;  %v3911_v5 = vsub.f32 %v3723_v59, %v3899_v4  ;;  %v3902_v7 = vpop.xlane.xlu1 %3901 }
 0x796   : >> { %7967 = vpow2.f32 %v3922_v6  ;;  %v3912_v9 = vsub.f32 %v8872_v63, %v3902_v7 }
 0x797   : >> { %v7962_v54 = vpop.eup %7961  ;;  %v3924_v52 = vmul.f32 1.442695, %v3911_v5 }
 0x798   : >> { %v3930_v21 = vsel %vm628_vm3, %v7962_v54, 0.0  ;;  %v3926_v51 = vmul.f32 1.442695, %v3912_v9 }
 0x799   : >> { %7969 = vpow2.f32 %v3924_v52  ;;  %3931 = vadd.xlane.f32.xlu1 %v3930_v21  ;;  %v3905_v52 = vpop.xlane.xlu0 %3904 }
 0x79a   : >> { %v3913_v33 = vsub.f32 %v8875_v43, %v3905_v52  ;;  %7971 = vpow2.f32 %v3926_v51 }
 0x79b   : >> { %v7964_v10 = vpop.eup %7963 }
 0x79c   : >> { %v3936_v11 = vsel %vm628_vm3, %v7964_v10, 0.0  ;;  %v3928_v59 = vmul.f32 1.442695, %v3913_v33 }
 0x79d   : >> { %3937 = vadd.xlane.f32.xlu1 %v3936_v11  ;;  %v8950_v63 = vpop.permute.xlu0 %4736  ;;  %v9542_v11 = vmov 0.0  }
 0x79e   : >> { %7973 = vpow2.f32 %v3928_v59 }
 0x79f   : >> { %v8912_v42 = vpop.eup %7965 }
 0x7a0   : >> { %v8914_v0 = vpop.eup %7967  ;;  %v3939_v8 = vsel %vm628_vm3, %v8912_v42, 0.0 }
 0x7a1   : >> { %3940 = vadd.xlane.f32.xlu0 %v3939_v8  ;;  %v3942_v4 = vsel %vm628_vm3, %v8914_v0, 0.0  ;;  %v8962_v8 = vpop.permute.xlu1 %4814 }
 0x7a2   : >> { %3943 = vadd.xlane.f32.xlu1 %v3942_v4 }
 0x7a3   : >> { %v8920_v5 = vpop.eup %7969 }
 0x7a4   : >> { %v3945_v6 = vsel %vm628_vm3, %v8920_v5, 0.0  ;;  %v8930_v60 = vpop.eup %7971 }
 0x7a5   : >> { %3946 = vadd.xlane.f32.xlu0 %v3945_v6  ;;  %v3948_v19 = vsel %vm628_vm3, %v8930_v60, 0.0 }
 0x7a8   : >> { %v8932_v31 = vpop.eup %7973 }
 0x7a9   : >> { %v3951_v55 = vsel %vm628_vm3, %v8932_v31, 0.0 }
 0x7b3   : >> { %4812 = vrot.lane.b32.xlu1 %v8362_v26, %s8178_s22 }
 0x7bb   : >> { %4734 = vrot.lane.b32.xlu0 %v8366_v28, %s8178_s22 }
 0x7d7   : >> { %3949 = vadd.xlane.f32.xlu1 %v3948_v19 }
 0x7da   : >> { %3952 = vadd.xlane.f32.xlu0 %v3951_v55 }
 0x7e8   : >> { %4970 = vrot.lane.b32.xlu1 %v8355_v23, %s8177_s21 }
 0x7ec   : >> { %4968 = vrot.lane.b32.xlu1 %v8355_v23, %s8178_s22 }
 0x7f0   : >> { %5126 = vrot.lane.b32.xlu1 %v8364_v27, %s8177_s21  ;;  %4892 = vrot.lane.b32.xlu0 %v8359_v25, %s8177_s21 }
 0x7f4   : >> { %5124 = vrot.lane.b32.xlu1 %v8364_v27, %s8178_s22  ;;  %4890 = vrot.lane.b32.xlu0 %v8359_v25, %s8178_s22 }
 0x7f8   : >> { %5048 = vrot.lane.b32.xlu0 %v8368_v29, %s8177_s21  ;;  %s431_s21 = smul.u32 80, %s8165_s28  ;;  %s402_s28 = sadd.s32 1, %s8165_s28  }
 0x7f9   : >> { %p399_p5 = scmp.ge.s32.totalorder %s402_s28, 6  }
 0x7fa   : > { %vm6893_vm11 = vcmask (%p399_p5), 1041409   ;;  %vm6896_vm13 = vcmask (%p399_p5), 1042434   ;;  %vm6899_vm15 = vcmask (%p399_p5), 1043459  }
 0x7fc   : >> { %v3935_v43 = vpop.xlane.xlu0 %3934  ;;  %5046 = vrot.lane.b32.xlu0 %v8368_v29, %s8178_s22 }
 0x7fd   : >> { %7975 = vrcp.f32 %v3935_v43 }
 0x807   : >> { %v7976_v36 = vpop.eup %7975 }
 0x808   : >> { %v3963_v21 = vmul.f32 %v7976_v36, %v8898_v17 }
 0x80a   : >> { %7577 = vmatmul.mubr.msk.f32.vlgmr.msra.gmra.mrb[40].mxu0 %vm628_vm3, %v3963_v21 }
 0x80b   : >> { %7585 = vmatpush3.msra.mxu0 %v8888_v61  ;;  %7586 = vmatprep.mubr.msk.f32.mxu0 %vm8168_vm2, %v9542_v11 }
 0x80c   : >> { %7594 = vmatprep.subr.mxu0 %v9542_v11 }
 0x826   : >> { %v3932_v4 = vpop.xlane.xlu1 %3931 }
 0x827   : >> { %7977 = vrcp.f32 %v3932_v4 }
 0x82a   : >> { %v3938_v6 = vpop.xlane.xlu1 %3937 }
 0x82b   : >> { %7979 = vrcp.f32 %v3938_v6 }
 0x82e   : >> { %v3941_v7 = vpop.xlane.xlu0 %3940 }
 0x82f   : >> { %7981 = vrcp.f32 %v3941_v7  ;;  %v3944_v9 = vpop.xlane.xlu1 %3943 }
 0x830   : >> { %7983 = vrcp.f32 %v3944_v9 }
 0x831   : >> { %v7978_v17 = vpop.eup %7977 }
 0x832   : >> { %v3962_v52 = vmul.f32 %v7978_v17, %v7962_v54  ;;  %v3947_v33 = vpop.xlane.xlu0 %3946 }
 0x833   : >> { %7985 = vrcp.f32 %v3947_v33 }
 0x834   : >> { %7572 = vmatmul.mubr.msk.f32.vlgmr.msra.gmra.mrb[48].mxu1 %vm628_vm3, %v3962_v52 }
 0x835   : >> { %v7980_v61 = vpop.eup %7979  ;;  %7580 = vmatpush3.msra.mxu1 %v8886_v34  ;;  %7581 = vmatprep.mubr.msk.f32.mxu1 %vm8168_vm2, %v9542_v11 }
 0x836   : >> { %v3964_v51 = vmul.f32 %v7980_v61, %v7964_v10  ;;  %7589 = vmatprep.subr.mxu1 %v9542_v11 }
 0x838   : >> { %7582 = vmatmul.mubr.msk.f32.vlgmr.msra.gmra.mrb[50].mxu1 %vm628_vm3, %v3964_v51 }
 0x839   : >> { %v7982_v59 = vpop.eup %7981  ;;  %7590 = vmatpush3.msra.mxu1 %v8902_v49  ;;  %7591 = vmatprep.mubr.msk.f32.mxu1 %vm8168_vm2, %v9542_v11  ;;  %v4735_v49 = vpop.permute.xlu0 %4734 }
 0x83a   : >> { %v7984_v54 = vpop.eup %7983  ;;  %v3965_v19 = vmul.f32 %v7982_v59, %v8912_v42  ;;  %7599 = vmatprep.subr.mxu1 %v9542_v11 }
 0x83b   : >> { %v3966_v34 = vmul.f32 %v7984_v54, %v8914_v0 }
 0x83c   : >> { %7587 = vmatmul.mubr.msk.f32.vlgmr.msra.gmra.mrb[42].mxu0 %vm628_vm3, %v3965_v19 }
 0x83d   : >> { %v7986_v10 = vpop.eup %7985  ;;  %7592 = vmatmul.mubr.msk.f32.vlgmr.msra.gmra.mrb[52].mxu1 %vm628_vm3, %v3966_v34  ;;  %7595 = vmatpush3.msra.mxu0 %v8890_v18  ;;  %v4813_v18 = vpop.permute.xlu1 %4812 }
 0x83e   : >> { %v3967_v55 = vmul.f32 %v7986_v10, %v8920_v5  ;;  %7600 = vmatpush3.msra.mxu1 %v8904_v58  ;;  %7596 = vmatprep.mubr.msk.f32.mxu0 %vm8168_vm2, %v9542_v11 }
 0x83f   : >> { %7604 = vmatprep.subr.mxu0 %v9542_v11  ;;  %7601 = vmatprep.mubr.msk.f32.mxu1 %vm8168_vm2, %v9542_v11 }
 0x840   : >> { %7597 = vmatmul.mubr.msk.f32.vlgmr.msra.gmra.mrb[44].mxu0 %vm628_vm3, %v3967_v55  ;;  %7609 = vmatprep.subr.mxu1 %v9542_v11 }
 0x841   : >> { %7605 = vmatpush3.msra.mxu0 %v8892_v38  ;;  %7606 = vmatprep.mubr.msk.f32.mxu0 %vm8168_vm2, %v9542_v11 }
 0x842   : >> { %7614 = vmatprep.subr.mxu0 %v9542_v11 }
 0x864   : >> { %v3950_v58 = vpop.xlane.xlu1 %3949 }
 0x865   : >> { %7987 = vrcp.f32 %v3950_v58 }
 0x867   : >> { %v3953_v42 = vpop.xlane.xlu0 %3952 }
 0x868   : >> { %7989 = vrcp.f32 %v3953_v42  ;;  %v4971_v21 = vpop.permute.xlu1 %4970 }
 0x86b   : >> { %v4893_v5 = vpop.permute.xlu0 %4892 }
 0x86f   : >> { %v7988_v0 = vpop.eup %7987  ;;  %v4891_v4 = vpop.permute.xlu0 %4890 }
 0x870   : >> { %v3968_v43 = vmul.f32 %v7988_v0, %v8930_v60 }
 0x872   : >> { %v7990_v36 = vpop.eup %7989  ;;  %7602 = vmatmul.mubr.msk.f32.vlgmr.msra.gmra.mrb[54].mxu1 %vm628_vm3, %v3968_v43 }
 0x873   : >> { %v3969_v38 = vmul.f32 %v7990_v36, %v8932_v31  ;;  %7610 = vmatpush3.xpose.msk.msra.mxu1 %vm628_vm3, %v8906_v41  ;;  %7611 = vmatprep.mubr.msk.f32.mxu1 %vm8168_vm2, %v9542_v11  ;;  %v4969_v41 = vpop.permute.xlu1 %4968 }
 0x874   : >> { %7619 = vmatprep.subr.mxu1 %v9542_v11 }
 0x875   : >> { %7607 = vmatmul.mubr.msk.f32.vlgmr.msra.gmra.mrb[46].mxu0 %vm628_vm3, %v3969_v38 }
 0x876   : >> { %7612 = vmatmul.mubr.msk.f32.vlgmr.msra.gmra.mrb[56].mxu1 %vm628_vm3, %v8908_v56  ;;  %7615 = vmatpush3.xpose.msk.msra.mxu0 %vm628_vm3, %v8894_v30  ;;  %v5049_v30 = vpop.permute.xlu0 %5048 }
 0x877   : >> { %7620 = vmatpush3.xpose.msk.msra.mxu1 %vm628_vm3, %v8950_v63  ;;  %7616 = vmatprep.mubr.msk.f32.mxu0 %vm8168_vm2, %v9542_v11 }
 0x878   : >> { %7621 = vmatprep.mubr.msk.f32.mxu1 %vm8168_vm2, %v9542_v11  ;;  %7624 = vmatprep.subr.mxu0 %v9542_v11 }
 0x879   : >> { %7629 = vmatprep.subr.mxu1 %v9542_v11  ;;  %7617 = vmatmul.mubr.msk.f32.vlgmr.msra.gmra.mrb[48].mxu0 %vm628_vm3, %v8896_v47  ;;  %v5127_v47 = vpop.permute.xlu1 %5126 }
 0x87a   : >> { %7622 = vmatmul.mubr.msk.f32.vlgmr.msra.gmra.mrb[58].mxu1 %vm628_vm3, %v4735_v49  ;;  %7625 = vmatpush3.xpose.msk.msra.mxu0 %vm628_vm3, %v8962_v8  ;;  %v5047_v56 = vpop.permute.xlu0 %5046 }
 0x87b   : >> { %7630 = vmatpush3.xpose.msk.msra.mxu1 %vm628_vm3, %v4893_v5  ;;  %7626 = vmatprep.mubr.msk.f32.mxu0 %vm8168_vm2, %v9542_v11 }
 0x87c   : >> { %7631 = vmatprep.mubr.msk.f32.mxu1 %vm8168_vm2, %v9542_v11  ;;  %7634 = vmatprep.subr.mxu0 %v9542_v11 }
 0x87d   : >> { %7639 = vmatprep.subr.mxu1 %v9542_v11  ;;  %7627 = vmatmul.mubr.msk.f32.vlgmr.msra.gmra.mrb[50].mxu0 %vm628_vm3, %v4813_v18  ;;  %v5125_v60 = vpop.permute.xlu1 %5124 }
 0x87e   : >> { %7632 = vmatmul.mubr.msk.f32.vlgmr.msra.gmra.mrb[60].mxu1 %vm628_vm3, %v4891_v4  ;;  %7635 = vmatpush3.xpose.msk.msra.mxu0 %vm628_vm3, %v4971_v21 }
 0x87f   : >> { %7640 = vmatpush3.xpose.msk.msra.mxu1 %vm628_vm3, %v5049_v30  ;;  %7636 = vmatprep.mubr.msk.f32.mxu0 %vm8168_vm2, %v9542_v11 }
 0x880   : >> { %7641 = vmatprep.mubr.msk.f32.mxu1 %vm8168_vm2, %v9542_v11  ;;  %7644 = vmatprep.subr.mxu0 %v9542_v11 }
 0x881   : >> { %7637 = vmatmul.mubr.msk.f32.vlgmr.msra.gmra.mrb[52].mxu0 %vm628_vm3, %v4969_v41  ;;  %7649 = vmatprep.subr.mxu1 %v9542_v11 }
 0x882   : >> { %7642 = vmatmul.mubr.msk.f32.vlgmr.msra.gmra.mrb[62].mxu1 %vm628_vm3, %v5047_v56  ;;  %7645 = vmatpush3.xpose.msk.msra.mxu0 %vm628_vm3, %v5127_v47 }
 0x883   : >> { %7646 = vmatprep.mubr.msk.f32.mxu0 %vm8168_vm2, %v9542_v11  ;;  %7654 = vmatprep.subr.mxu0 %v9542_v11 }
 0x884   : >> { %7651 = vmatprep.mubr.msk.f32.mxu1 %vm8168_vm2, %v9542_v11 }
 0x885   : >> { %7647 = vmatmul.mubr.msk.f32.vlgmr.msra.gmra.mrb[54].mxu0 %vm628_vm3, %v5125_v60 }
 0x886   : >> { %7656 = vmatprep.mubr.msk.f32.mxu0 %vm8168_vm2, %v9542_v11 }
 0x8dd   : >> { %v9046_v31 = vpop.f32.mrb[40].mxu0 }
 0x8de   : >> { %v7578_v63 = vpop.f32.mrb[41].mxu0 }
 0x907   : >> { %v9048_v8 = vpop.f32.mrb[48].mxu1 }
 0x908   : >> { %v7573_v6 = vpop.f32.mrb[49].mxu1 }
 0x90b   : >> { %v9050_v7 = vpop.f32.mrb[50].mxu1 }
 0x90c   : >> { %v7583_v9 = vpop.f32.mrb[51].mxu1 }
 0x90f   : >> { %v9052_v17 = vpop.f32.mrb[42].mxu0 }
 0x910   : >> { %v9054_v52 = vpop.f32.mrb[52].mxu1  ;;  %v7588_v33 = vpop.f32.mrb[43].mxu0 }
 0x911   : >> { %v7593_v61 = vpop.f32.mrb[53].mxu1 }
 0x913   : >> { %v9056_v51 = vpop.f32.mrb[44].mxu0 }
 0x914   : >> { %v7598_v59 = vpop.f32.mrb[45].mxu0 }
 0x945   : >> { %v9058_v54 = vpop.f32.mrb[54].mxu1 }
 0x946   : >> { %v7603_v19 = vpop.f32.mrb[55].mxu1 }
 0x948   : >> { %v9060_v34 = vpop.f32.mrb[46].mxu0 }
 0x949   : >> { %v4652_v10 = vpop.f32.mrb[56].mxu1  ;;  %v7608_v55 = vpop.f32.mrb[47].mxu0 }
 0x94a   : >> { %v4653_v18 = vadd.f32 %v8260_v1, %v4652_v10  ;;  %v7613_v49 = vpop.f32.mrb[57].mxu1 }
 0x94c   : >> { %v4730_v58 = vpop.f32.mrb[48].mxu0  ;;  %v5202_v42 = vsel %vm628_vm3, %v4653_v18, -inf }
 0x94d   : >> { %v4731_v0 = vadd.f32 %v8262_v2, %v4730_v58  ;;  %5203 = vmax.xlane.f32.xlu0 %v5202_v42  ;;  %v4808_v5 = vpop.f32.mrb[58].mxu1  ;;  %v7618_v43 = vpop.f32.mrb[49].mxu0 }
 0x94e   : >> { %v4809_v36 = vadd.f32 %v8264_v3, %v4808_v5  ;;  %v7623_v21 = vpop.f32.mrb[59].mxu1 }
 0x94f   : >> { %v5205_v38 = vsel %vm628_vm3, %v4731_v0, -inf }
 0x950   : >> { %5206 = vmax.xlane.f32.xlu1 %v5205_v38  ;;  %v4886_v4 = vpop.f32.mrb[50].mxu0  ;;  %v5208_v41 = vsel %vm628_vm3, %v4809_v36, -inf }
 0x951   : >> { %v4887_v30 = vadd.f32 %v8266_v12, %v4886_v4  ;;  %5209 = vmax.xlane.f32.xlu0 %v5208_v41  ;;  %v4964_v47 = vpop.f32.mrb[60].mxu1  ;;  %v7628_v56 = vpop.f32.mrb[51].mxu0 }
 0x952   : >> { %v4965_v60 = vadd.f32 %v8268_v13, %v4964_v47  ;;  %v7633_v63 = vpop.f32.mrb[61].mxu1 }
 0x953   : >> { %v5211_v6 = vsel %vm628_vm3, %v4887_v30, -inf }
 0x954   : >> { %v5042_v9 = vpop.f32.mrb[52].mxu0  ;;  %v5214_v33 = vsel %vm628_vm3, %v4965_v60, -inf }
 0x955   : >> { %v5043_v61 = vadd.f32 %v8270_v14, %v5042_v9  ;;  %5212 = vmax.xlane.f32.xlu0 %v5211_v6  ;;  %5215 = vmax.xlane.f32.xlu1 %v5214_v33  ;;  %v5120_v59 = vpop.f32.mrb[62].mxu1  ;;  %v7638_v19 = vpop.f32.mrb[53].mxu0 }
 0x956   : >> { %v5121_v10 = vadd.f32 %v8272_v15, %v5120_v59  ;;  %v7643_v55 = vpop.f32.mrb[63].mxu1 }
 0x957   : >> { %v5217_v49 = vsel %vm628_vm3, %v5043_v61, -inf }
 0x958   : >> { %v5198_v58 = vpop.f32.mrb[54].mxu0  ;;  %v5220_v42 = vsel %vm628_vm3, %v5121_v10, -inf }
 0x959   : >> { %v5199_v5 = vadd.f32 %v8274_v16, %v5198_v58  ;;  %5218 = vmax.xlane.f32.xlu0 %v5217_v49  ;;  %5221 = vmax.xlane.f32.xlu1 %v5220_v42  ;;  %v7648_v43 = vpop.f32.mrb[55].mxu0 }
 0x95b   : >> { %v5223_v21 = vsel %vm628_vm3, %v5199_v5, -inf }
 0x95d   : >> { %5224 = vmax.xlane.f32.xlu0 %v5223_v21 }
 0x96a   : >> { %5290 = vrot.lane.b32.xlu1 %v8357_v24, %s8179_s23 }
 0x96e   : >> { %5442 = vrot.lane.b32.xlu1 %v8366_v28, %s8179_s23 }
 0x972   : >> { %5518 = vrot.lane.b32.xlu1 %v8362_v26, %s8179_s23 }
 0x973   : >> { %5366 = vrot.lane.b32.xlu0 %v8353_v22, %s8179_s23 }
 0x976   : >> { %5670 = vrot.lane.b32.xlu1 %v8355_v23, %s8179_s23 }
 0x977   : >> { %5594 = vrot.lane.b32.xlu0 %v8359_v25, %s8179_s23 }
 0x9da   : >> { %v5204_v38 = vpop.xlane.xlu0 %5203 }
 0x9db   : >> { %v5226_v4 = vsub.f32 %v4653_v18, %v5204_v38 }
 0x9dd   : >> { %v5234_v41 = vmul.f32 1.442695, %v5226_v4  ;;  %v5207_v47 = vpop.xlane.xlu1 %5206 }
 0x9de   : >> { %v5227_v24 = vsub.f32 %v4731_v0, %v5207_v47  ;;  %v5210_v56 = vpop.xlane.xlu0 %5209 }
 0x9df   : >> { %7991 = vpow2.f32 %v5234_v41  ;;  %v5228_v28 = vsub.f32 %v4809_v36, %v5210_v56 }
 0x9e0   : >> { %v5236_v63 = vmul.f32 1.442695, %v5227_v24 }
 0x9e1   : >> { %v5238_v6 = vmul.f32 1.442695, %v5228_v28 }
 0x9e2   : >> { %7993 = vpow2.f32 %v5236_v63  ;;  %v5213_v26 = vpop.xlane.xlu0 %5212  ;;  %v5216_v9 = vpop.xlane.xlu1 %5215 }
 0x9e3   : >> { %7995 = vpow2.f32 %v5238_v6  ;;  %v5229_v22 = vsub.f32 %v4887_v30, %v5213_v26  ;;  %v5230_v33 = vsub.f32 %v4965_v60, %v5216_v9 }
 0x9e5   : >> { %v5240_v23 = vmul.f32 1.442695, %v5229_v22  ;;  %v5242_v59 = vmul.f32 1.442695, %v5230_v33 }
 0x9e6   : >> { %v5219_v19 = vpop.xlane.xlu0 %5218  ;;  %v5222_v25 = vpop.xlane.xlu1 %5221 }
 0x9e7   : >> { %7997 = vpow2.f32 %v5240_v23  ;;  %v5231_v18 = vsub.f32 %v5043_v61, %v5219_v19  ;;  %v5232_v55 = vsub.f32 %v5121_v10, %v5222_v25 }
 0x9e8   : >> { %7999 = vpow2.f32 %v5242_v59 }
 0x9e9   : >> { %v9090_v0 = vpop.eup %7991  ;;  %v5244_v49 = vmul.f32 1.442695, %v5231_v18  ;;  %v5246_v36 = vmul.f32 1.442695, %v5232_v55 }
 0x9ea   : >> { %v5225_v58 = vpop.xlane.xlu0 %5224  ;;  %v5291_v42 = vpop.permute.xlu1 %5290  ;;  %v5250_v43 = vsel %vm628_vm3, %v9090_v0, 0.0 }
 0x9eb   : >> { %8001 = vpow2.f32 %v5244_v49  ;;  %v5233_v30 = vsub.f32 %v5199_v5, %v5225_v58  ;;  %5251 = vadd.xlane.f32.xlu1 %v5250_v43  ;;  %7650 = vmatpush3.msra.mxu1 %v5291_v42  ;;  %v418_v42 = vld [vmem:[%s417_s12] sm:$0xff]  ;;  %v419_v43 = vld [vmem:[%s417_s12 + $0x8] sm:$0xff] }
 0x9ec   : >> { %v9094_v60 = vpop.eup %7993  ;;  %8003 = vpow2.f32 %v5246_v36  ;;  %7659 = vmatprep.subr.mxu1 %v9542_v11 }
 0x9ed   : >> { %v9097_v61 = vpop.eup %7995  ;;  %v5248_v10 = vmul.f32 1.442695, %v5233_v30  ;;  %v5253_v21 = vsel %vm628_vm3, %v9094_v60, 0.0  ;;  %v7763_v30 = vpack.c.bf16 %v419_v43, %v418_v42 }
 0x9ee   : >> { %v5367_v38 = vpop.permute.xlu0 %5366  ;;  %5254 = vadd.xlane.f32.xlu0 %v5253_v21  ;;  %v5256_v4 = vsel %vm628_vm3, %v9097_v61, 0.0 }
 0x9ef   : >> { %8005 = vpow2.f32 %v5248_v10  ;;  %7655 = vmatpush3.msra.mxu0 %v5367_v38  ;;  %5257 = vadd.xlane.f32.xlu1 %v5256_v4 }
 0x9f0   : >> { %7664 = vmatprep.subr.mxu0 %v9542_v11 }
 0x9f1   : >> { %v9104_v5 = vpop.eup %7997 }
 0x9f2   : >> { %v9106_v41 = vpop.eup %7999  ;;  %v5259_v47 = vsel %vm628_vm3, %v9104_v5, 0.0 }
 0x9f3   : >> { %5260 = vadd.xlane.f32.xlu0 %v5259_v47  ;;  %v5262_v24 = vsel %vm628_vm3, %v9106_v41, 0.0 }
 0x9f4   : >> { %5263 = vadd.xlane.f32.xlu1 %v5262_v24 }
 0x9f5   : >> { %v9112_v56 = vpop.eup %8001 }
 0x9f6   : >> { %v9114_v28 = vpop.eup %8003  ;;  %v5265_v63 = vsel %vm628_vm3, %v9112_v56, 0.0 }
 0x9f7   : >> { %5266 = vadd.xlane.f32.xlu0 %v5265_v63  ;;  %v5268_v6 = vsel %vm628_vm3, %v9114_v28, 0.0 }
 0x9f8   : >> { %5269 = vadd.xlane.f32.xlu1 %v5268_v6 }
 0x9f9   : >> { %v9120_v26 = vpop.eup %8005 }
 0x9fa   : >> { %v5271_v9 = vsel %vm628_vm3, %v9120_v26, 0.0 }
 0x9fb   : >> { %5272 = vadd.xlane.f32.xlu0 %v5271_v9 }
 0xa09   : >> { %5822 = vrot.lane.b32.xlu1 %v8364_v27, %s8179_s23  ;;  %v5443_v27 = vpop.permute.xlu1 %5442 }
 0xa0d   : >> { %5908 = vrot.lane.b32.xlu1 %v8844_v40, %s8180_s24 }
 0xa11   : >> { %5940 = vrot.lane.b32.xlu1 %v9046_v31, %s8181_s25  ;;  %5746 = vrot.lane.b32.xlu0 %v8368_v29, %s8179_s23  ;;  %v5519_v29 = vpop.permute.xlu1 %5518 }
 0xa15   : >> { %5912 = vrot.lane.b32.xlu1 %v8850_v57, %s8180_s24  ;;  %5906 = vrot.lane.b32.xlu0 %v8846_v20, %s8180_s24  ;;  %v5671_v40 = vpop.permute.xlu1 %5670  ;;  %v5595_v20 = vpop.permute.xlu0 %5594 }
 0xa19   : >> { %5944 = vrot.lane.b32.xlu1 %v9052_v17, %s8181_s25  ;;  %5938 = vrot.lane.b32.xlu0 %v9048_v8, %s8181_s25 }
 0xa1d   : >> { %5916 = vrot.lane.b32.xlu1 %v8854_v46, %s8180_s24  ;;  %5910 = vrot.lane.b32.xlu0 %v8848_v32, %s8180_s24 }
 0xa21   : >> { %5948 = vrot.lane.b32.xlu1 %v9056_v51, %s8181_s25  ;;  %5942 = vrot.lane.b32.xlu0 %v9050_v7, %s8181_s25 }
 0xa25   : >> { %5920 = vrot.lane.b32.xlu1 %v8856_v35, %s8180_s24  ;;  %5914 = vrot.lane.b32.xlu0 %v8852_v45, %s8180_s24 }
 0xa29   : >> { %5952 = vrot.lane.b32.xlu1 %v9060_v34, %s8181_s25  ;;  %5946 = vrot.lane.b32.xlu0 %v9054_v52, %s8181_s25 }
 0xa2d   : >> { %5918 = vrot.lane.b32.xlu0 %v8860_v37, %s8180_s24  ;;  %s9297_s24 = scalar_lea.vmem %s9518_s7, %s431_s21 }
 0xa31   : >> { %5950 = vrot.lane.b32.xlu0 %v9058_v54, %s8181_s25 }
 0xa78   : >> { %v5252_v32 = vpop.xlane.xlu1 %5251 }
 0xa79   : >> { %8007 = vrcp.f32 %v5252_v32 }
 0xa7b   : >> { %v5255_v57 = vpop.xlane.xlu0 %5254 }
 0xa7c   : >> { %8009 = vrcp.f32 %v5255_v57  ;;  %v5258_v46 = vpop.xlane.xlu1 %5257 }
 0xa7d   : >> { %8011 = vrcp.f32 %v5258_v46 }
 0xa80   : >> { %v5261_v35 = vpop.xlane.xlu0 %5260 }
 0xa81   : >> { %8013 = vrcp.f32 %v5261_v35  ;;  %v5264_v45 = vpop.xlane.xlu1 %5263 }
 0xa82   : >> { %8015 = vrcp.f32 %v5264_v45 }
 0xa83   : >> { %v8008_v31 = vpop.eup %8007 }
 0xa84   : >> { %v5282_v8 = vmul.f32 %v8008_v31, %v9090_v0  ;;  %v5267_v37 = vpop.xlane.xlu0 %5266 }
 0xa85   : >> { %8017 = vrcp.f32 %v5267_v37  ;;  %v5270_v7 = vpop.xlane.xlu1 %5269 }
 0xa86   : >> { %v8010_v17 = vpop.eup %8009  ;;  %8019 = vrcp.f32 %v5270_v7  ;;  %7652 = vmatmul.mubr.msk.f32.vlgmr.msra.gmra.mrb[64].mxu1 %vm628_vm3, %v5282_v8 }
 0xa87   : >> { %v8012_v52 = vpop.eup %8011  ;;  %v5283_v51 = vmul.f32 %v8010_v17, %v9094_v60  ;;  %7660 = vmatpush3.msra.mxu1 %v5443_v27  ;;  %7661 = vmatprep.mubr.msk.f32.mxu1 %vm8168_vm2, %v9542_v11  ;;  %v420_v60 = vld [vmem:[%s417_s12 + $0x10] sm:$0xff] }
 0xa88   : >> { %v5284_v54 = vmul.f32 %v8012_v52, %v9097_v61  ;;  %v5273_v34 = vpop.xlane.xlu0 %5272  ;;  %7669 = vmatprep.subr.mxu1 %v9542_v11  ;;  %v421_v61 = vld [vmem:[%s417_s12 + $0x18] sm:$0xff] }
 0xa89   : >> { %8021 = vrcp.f32 %v5273_v34  ;;  %7657 = vmatmul.mubr.msk.f32.vlgmr.msra.gmra.mrb[56].mxu0 %vm628_vm3, %v5283_v51  ;;  %v5823_v49 = vpop.permute.xlu1 %5822  ;;  %v7767_v10 = vpack.c.bf16 %v421_v61, %v420_v60 }
 0xa8a   : >> { %7662 = vmatmul.mubr.msk.f32.vlgmr.msra.gmra.mrb[66].mxu1 %vm628_vm3, %v5284_v54  ;;  %7665 = vmatpush3.msra.mxu0 %v5519_v29 }
 0xa8b   : >> { %v8014_v22 = vpop.eup %8013  ;;  %7670 = vmatpush3.msra.mxu1 %v5595_v20  ;;  %7666 = vmatprep.mubr.msk.f32.mxu0 %vm8168_vm2, %v9542_v11 }
 0xa8c   : >> { %v8016_v33 = vpop.eup %8015  ;;  %v5285_v23 = vmul.f32 %v8014_v22, %v9104_v5  ;;  %7671 = vmatprep.mubr.msk.f32.mxu1 %vm8168_vm2, %v9542_v11  ;;  %7674 = vmatprep.subr.mxu0 %v9542_v11  ;;  %v5747_v19 = vpop.permute.xlu0 %5746 }
 0xa8d   : >> { %v5286_v59 = vmul.f32 %v8016_v33, %v9106_v41  ;;  %7679 = vmatprep.subr.mxu1 %v9542_v11  ;;  %v5909_v20 = vpop.permute.xlu1 %5908 }
 0xa8e   : >> { %7667 = vmatmul.mubr.msk.f32.vlgmr.msra.gmra.mrb[58].mxu0 %vm628_vm3, %v5285_v23 }
 0xa8f   : >> { %v8018_v25 = vpop.eup %8017  ;;  %7672 = vmatmul.mubr.msk.f32.vlgmr.msra.gmra.mrb[68].mxu1 %vm628_vm3, %v5286_v59  ;;  %7675 = vmatpush3.msra.mxu0 %v5671_v40 }
 0xa90   : >> { %v8020_v18 = vpop.eup %8019  ;;  %v5287_v55 = vmul.f32 %v8018_v25, %v9112_v56  ;;  %7680 = vmatpush3.msra.mxu1 %v5747_v19  ;;  %7676 = vmatprep.mubr.msk.f32.mxu0 %vm8168_vm2, %v9542_v11  ;;  %v5907_v40 = vpop.permute.xlu0 %5906  ;;  %v5995_v19 = vsel %vm628_vm3, %v8625_v48, %v5909_v20 }
 0xa91   : >> { %v5288_v0 = vmul.f32 %v8020_v18, %v9114_v28  ;;  %7681 = vmatprep.mubr.msk.f32.mxu1 %vm8168_vm2, %v9542_v11  ;;  %7684 = vmatprep.subr.mxu0 %v9542_v11  ;;  %v5941_v57 = vpop.permute.xlu1 %5940  ;;  %v5994_v34 = vsel %vm628_vm3, %v8621_v44, %v5907_v40 }
 0xa92   : >> { %7677 = vmatmul.mubr.msk.f32.vlgmr.msra.gmra.mrb[60].mxu0 %vm628_vm3, %v5287_v55  ;;  %7764 = vmatprep.subr.bf16.mxu1 %v7763_v30  ;;  %v6004_v25 = vsel %vm6002_vm5, %v5995_v19, %v5941_v57  ;;  %v9545_v57 = vld [vmem:[#allocation9_spill] sm:$0xff] }
 0xa93   : >> { %v8022_v36 = vpop.eup %8021  ;;  %7682 = vmatmul.mubr.msk.f32.vlgmr.msra.gmra.mrb[70].mxu1 %vm628_vm3, %v5288_v0  ;;  %7685 = vmatpush3.msra.mxu0 %v5823_v49 }
 0xa94   : >> { %v5289_v58 = vmul.f32 %v8022_v36, %v9120_v26  ;;  %7686 = vmatprep.mubr.msk.f32.mxu0 %vm8168_vm2, %v9542_v11  ;;  %7766 = vmatpush3.bf16.msra.mxu1 %v7763_v30  ;;  %v5939_v32 = vpop.permute.xlu0 %5938  ;;  %vm6905_vm2 = vcmask (%p399_p5), 1045509  }
 0xa95   : >> { %7768 = vmatprep.subr.bf16.mxu1 %v7767_v10  ;;  %v5913_v35 = vpop.permute.xlu1 %5912  ;;  %v6003_v33 = vsel %vm6002_vm5, %v5994_v34, %v5939_v32 }
 0xa96   : >> { %7687 = vmatmul.mubr.msk.f32.vlgmr.msra.gmra.mrb[62].mxu0 %vm628_vm3, %v5289_v58  ;;  %v5997_v48 = vsel %vm628_vm3, %v8627_v50, %v5913_v35  ;;  %v9546_v35 = vld [vmem:[#allocation10_spill] sm:$0xff] }
 0xa98   : >> { %7770 = vmatpush3.bf16.msra.mxu1 %v7767_v10  ;;  %v5911_v46 = vpop.permute.xlu0 %5910 }
 0xa99   : >> { %v5945_v31 = vpop.permute.xlu1 %5944  ;;  %v5996_v18 = vsel %vm628_vm3, %v8623_v39, %v5911_v46 }
 0xa9a   : >> { %v6006_v58 = vsel %vm6002_vm5, %v5997_v48, %v5945_v31 }
 0xa9c   : >> { %v5943_v45 = vpop.permute.xlu0 %5942 }
 0xa9d   : >> { %v5917_v37 = vpop.permute.xlu1 %5916  ;;  %v6005_v44 = vsel %vm6002_vm5, %v5996_v18, %v5943_v45  ;;  %v9549_v18 = vld [vmem:[#allocation6_spill] sm:$0xff] }
 0xa9e   : >> { %v5999_v10 = vsel %vm628_vm3, %v8629_v53, %v5917_v37 }
 0xaa0   : >> { %v5915_v8 = vpop.permute.xlu0 %5914 }
 0xaa1   : >> { %v5949_v17 = vpop.permute.xlu1 %5948  ;;  %v5998_v39 = vsel %vm628_vm3, %v8635_v62, %v5915_v8 }
 0xaa2   : >> { %v6008_v50 = vsel %vm6002_vm5, %v5999_v10, %v5949_v17 }
 0xaa4   : >> { %v5947_v7 = vpop.permute.xlu0 %5946 }
 0xaa5   : >> { %v5921_v51 = vpop.permute.xlu1 %5920  ;;  %v6007_v43 = vsel %vm6002_vm5, %v5998_v39, %v5947_v7 }
 0xaa8   : >> { %v5919_v52 = vpop.permute.xlu0 %5918 }
 0xaa9   : >> { %v5953_v22 = vpop.permute.xlu1 %5952 }
 0xaac   : >> { %v5951_v54 = vpop.permute.xlu0 %5950 }
 0xb59   : >> { %v5362_v21 = vpop.f32.mrb[64].mxu1 }
 0xb5a   : >> { %5970 = vrot.lane.b32.xlu0 %v5362_v21, %s8182_s13  ;;  %v7653_v11 = vpop.f32.mrb[65].mxu1  ;;  %v9543_v21 = vld [vmem:[#allocation12_spill] sm:$0xff] }
 0xb5b   : >> { %v6000_v62 = vsel %vm628_vm3, %v9543_v21, %v5919_v52 }
 0xb5c   : >> { %v5438_v38 = vpop.f32.mrb[56].mxu0 }
 0xb5d   : >> { %v5514_v4 = vpop.f32.mrb[66].mxu1  ;;  %v7658_v5 = vpop.f32.mrb[57].mxu0  ;;  %5972 = vrot.lane.b32.xlu1 %v5438_v38, %s8182_s13  ;;  %v6009_v38 = vsel %vm6002_vm5, %v6000_v62, %v5951_v54 }
 0xb5e   : >> { %5974 = vrot.lane.b32.xlu0 %v5514_v4, %s8182_s13  ;;  %v7663_v41 = vpop.f32.mrb[67].mxu1 }
 0xb61   : >> { %v5590_v47 = vpop.f32.mrb[58].mxu0 }
 0xb62   : >> { %v5666_v24 = vpop.f32.mrb[68].mxu1  ;;  %5976 = vrot.lane.b32.xlu1 %v5590_v47, %s8182_s13  ;;  %v7668_v56 = vpop.f32.mrb[59].mxu0  ;;  %v9544_v47 = vld [vmem:[#allocation11_spill] sm:$0xff] }
 0xb63   : >> { %5978 = vrot.lane.b32.xlu0 %v5666_v24, %s8182_s13  ;;  %v7673_v28 = vpop.f32.mrb[69].mxu1  ;;  %v6001_v53 = vsel %vm628_vm3, %v9544_v47, %v5921_v51  ;;  %v9547_v51 = vld [vmem:[#allocation8_spill] sm:$0xff] }
 0xb64   : >> { %v6010_v24 = vsel %vm6002_vm5, %v6001_v53, %v5953_v22  ;;  %v9548_v22 = vld [vmem:[#allocation7_spill] sm:$0xff] }
 0xb65   : >> { %v5742_v63 = vpop.f32.mrb[60].mxu0 }
 0xb66   : >> { %v5818_v6 = vpop.f32.mrb[70].mxu1  ;;  %5980 = vrot.lane.b32.xlu1 %v5742_v63, %s8182_s13  ;;  %v7678_v26 = vpop.f32.mrb[61].mxu0  ;;  %v6020_v63 = vlaneseq }
 0xb67   : >> { %5982 = vrot.lane.b32.xlu0 %v5818_v6, %s8182_s13  ;;  %v7683_v9 = vpop.f32.mrb[71].mxu1 }
 0xb68   : >> { %v9221_v6 = vshrl.u32 %v6020_v63, 7  ;;  %v9227_v9 = vld [vmem:[%s423_s9] sm:$0x3f] }
 0xb69   : >> { %v5894_v27 = vpop.f32.mrb[62].mxu0 }
 0xb6a   : >> { %5984 = vrot.lane.b32.xlu1 %v5894_v27, %s8182_s13  ;;  %v7688_v29 = vpop.f32.mrb[63].mxu0  ;;  %v6022_v26 = vsub.s32 0, %v9221_v6 }
 0xb6c   : >> { %v6023_v27 = vrot.slane %v9227_v9, %v6022_v26 }
 0xbcc   : >> { %v5971_v23 = vpop.permute.xlu0 %5970 }
 0xbcd   : >> { %v6012_v59 = vsel %vm6011_vm4, %v6003_v33, %v5971_v23 }
 0xbce   : >> { %7697 = vmatprep.mubr.msk.f32.mxu1 %vm6024_vm6, %v6012_v59 }
 0xbcf   : >> { %v5973_v55 = vpop.permute.xlu1 %5972 }
 0xbd0   : >> { %v6013_v0 = vsel %vm6011_vm4, %v6004_v25, %v5973_v55  ;;  %v5975_v49 = vpop.permute.xlu0 %5974 }
 0xbd1   : >> { %v6014_v36 = vsel %vm6011_vm4, %v6005_v44, %v5975_v49  ;;  %7698 = vmatmul.mubr.msk.f32.vlgmr.msra.gmra.mrb[72].mxu1 %vm6024_vm6, %v6013_v0 }
 0xbd2   : >> { %7700 = vmatprep.mubr.msk.f32.mxu1 %vm6024_vm6, %v6014_v36  ;;  %v9550_v36 = vld [vmem:[#allocation5_spill] sm:$0xff] }
 0xbd4   : >> { %v5977_v42 = vpop.permute.xlu1 %5976 }
 0xbd5   : >> { %v6015_v30 = vsel %vm6011_vm4, %v6006_v58, %v5977_v42  ;;  %v5979_v60 = vpop.permute.xlu0 %5978 }
 0xbd6   : >> { %v6016_v61 = vsel %vm6011_vm4, %v6007_v43, %v5979_v60  ;;  %7701 = vmatmul.mubr.msk.f32.gmra.mrb[74].mxu1 %vm6024_vm6, %v6015_v30  ;;  %v9551_v43 = vld [vmem:[#allocation4_spill] sm:$0xff]  ;;  %v9552_v60 = vld [vmem:[#allocation3_spill] sm:$0xff] }
 0xbd7   : >> { %7703 = vmatprep.mubr.msk.f32.mxu1 %vm6024_vm6, %v6016_v61 }
 0xbd8   : >> { %v5981_v11 = vpop.permute.xlu1 %5980 }
 0xbd9   : >> { %v6017_v4 = vsel %vm6011_vm4, %v6008_v50, %v5981_v11  ;;  %v5983_v5 = vpop.permute.xlu0 %5982 }
 0xbda   : >> { %v6018_v41 = vsel %vm6011_vm4, %v6009_v38, %v5983_v5  ;;  %7704 = vmatmul.mubr.msk.f32.gmra.mrb[76].mxu1 %vm6024_vm6, %v6017_v4 }
 0xbdb   : >> { %7706 = vmatprep.mubr.msk.f32.mxu1 %vm6024_vm6, %v6018_v41 }
 0xbdc   : >> { %v5985_v56 = vpop.permute.xlu1 %5984 }
 0xbdd   : >> { %v6019_v28 = vsel %vm6011_vm4, %v6010_v24, %v5985_v56  ;;  %vm6908_vm4 = vcmask (%p399_p5), 1046534  }
 0xbde   : >> { %7707 = vmatmul.mubr.msk.f32.gmra.mrb[78].mxu1 %vm6024_vm6, %v6019_v28  ;;  %vm6911_vm6 = vcmask (%p399_p5), 1047559  }
 0xca4   : >> { %v7699_v29 = vpop.f32.mrb[72].mxu1 }
 0xca5   : >> { %v6121_v40 = vadd.f32 %v7699_v29, %v6023_v27  ;;  %v6115_v20 = vpop.f32.mrb[73].mxu1 }
 0xca6   : >> { %v6116_v32 = vadd.f32 %v6115_v20, %v6023_v27 }
 0xca7   : >> { %v6155_v46 = vadd.f32 %v9545_v57, %v6121_v40 }
 0xca8   : >> { %v6154_v45 = vadd.f32 %v9546_v35, %v6116_v32 }
 0xca9   : >> { %v7702_v31 = vpop.f32.mrb[74].mxu1  ;;  %v6165_v8 = vsel %vm443_vm0, %v6155_v46, 0.0 }
 0xcaa   : >> { %v6131_v37 = vadd.f32 %v7702_v31, %v6023_v27  ;;  %v6125_v7 = vpop.f32.mrb[75].mxu1  ;;  %6166 = vadd.xlane.f32.xlu1 %v6165_v8  ;;  %v6162_v17 = vsel %vm443_vm0, %v6154_v45, 0.0 }
 0xcab   : >> { %v6126_v52 = vadd.f32 %v6125_v7, %v6023_v27  ;;  %6163 = vadd.xlane.f32.xlu0 %v6162_v17 }
 0xcac   : >> { %v6157_v33 = vadd.f32 %v9548_v22, %v6131_v37 }
 0xcad   : >> { %v6156_v54 = vadd.f32 %v9547_v51, %v6126_v52  ;;  %v7705_v34 = vpop.f32.mrb[76].mxu1 }
 0xcae   : >> { %v6135_v23 = vpop.f32.mrb[77].mxu1  ;;  %v6141_v59 = vadd.f32 %v7705_v34, %v6023_v27  ;;  %v6171_v49 = vsel %vm443_vm0, %v6157_v33, 0.0 }
 0xcaf   : >> { %v6136_v19 = vadd.f32 %v6135_v23, %v6023_v27  ;;  %v6168_v25 = vsel %vm443_vm0, %v6156_v54, 0.0 }
 0xcb0   : >> { %6169 = vadd.xlane.f32.xlu0 %v6168_v25  ;;  %v6159_v48 = vadd.f32 %v9550_v36, %v6141_v59 }
 0xcb1   : >> { %v6158_v55 = vadd.f32 %v9549_v18, %v6136_v19  ;;  %v7708_v44 = vpop.f32.mrb[78].mxu1 }
 0xcb2   : >> { %v6145_v0 = vpop.f32.mrb[79].mxu1  ;;  %v6151_v58 = vadd.f32 %v7708_v44, %v6023_v27  ;;  %v6177_v50 = vsel %vm443_vm0, %v6159_v48, 0.0 }
 0xcb3   : >> { %v6146_v39 = vadd.f32 %v6145_v0, %v6023_v27  ;;  %v6174_v42 = vsel %vm443_vm0, %v6158_v55, 0.0  ;;  %v428_v0 = vld [vmem:[%s427_s20] sm:$0xff] }
 0xcb4   : >> { %6175 = vadd.xlane.f32.xlu1 %v6174_v42  ;;  %6172 = vadd.xlane.f32.xlu0 %v6171_v49  ;;  %v6161_v61 = vadd.f32 %v9552_v60, %v6151_v58  ;;  %v429_v49 = vld [vmem:[%s427_s20 + $0x8] sm:$0xff]  ;;  %v433_v58 = vld [vmem:[%s9297_s24] sm:$0xff] }
 0xcb5   : >> { %v6160_v30 = vadd.f32 %v9551_v43, %v6146_v39  ;;  %v7771_v36 = vpack.c.bf16 %v429_v49, %v428_v0  ;;  %v434_v39 = vld [vmem:[%s9297_s24 + $0x8] sm:$0xff]  ;;  %v437_v0 = vld [vmem:[%s9297_s24 + $0x20] sm:$0xff] }
 0xcb6   : >> { %v6183_v21 = vsel %vm443_vm0, %v6161_v61, 0.0  ;;  %v7775_v42 = vpack.c.bf16 %v434_v39, %v433_v58  ;;  %v438_v49 = vld [vmem:[%s9297_s24 + $0x28] sm:$0xff] }
 0xcb7   : >> { %v6180_v10 = vsel %vm443_vm0, %v6160_v30, 0.0  ;;  %7772 = vmatprep.subr.bf16.mxu0 %v7771_v36 }
 0xcb8   : >> { %6181 = vadd.xlane.f32.xlu1 %v6180_v10  ;;  %6178 = vadd.xlane.f32.xlu0 %v6177_v50 }
 0xcb9   : >> { %7774 = vmatpush3.bf16.msra.mxu0 %v7771_v36 }
 0xcbc   : >> { %6184 = vadd.xlane.f32.xlu0 %v6183_v21 }
 0xd37   : >> { %v6167_v62 = vpop.xlane.xlu1 %6166 }
 0xd38   : >> { %v6188_v11 = vmul.f32 0.05, %v6167_v62  ;;  %v6164_v38 = vpop.xlane.xlu0 %6163 }
 0xd39   : >> { %v6187_v4 = vmul.f32 0.05, %v6164_v38  ;;  %v6269_v38 = vsub.s32 1, %v9221_v6 }
 0xd3a   : >> { %v9246_v5 = vsub.f32 %v6155_v46, %v6188_v11 }
 0xd3b   : >> { %v9248_v41 = vsub.f32 %v6154_v45, %v6187_v4 }
 0xd3c   : >> { %v6204_v47 = vmul.f32 %v9246_v5, %v9246_v5 }
 0xd3d   : >> { %v6170_v53 = vpop.xlane.xlu0 %6169  ;;  %v6203_v24 = vmul.f32 %v9248_v41, %v9248_v41 }
 0xd3e   : >> { %v6189_v56 = vmul.f32 0.05, %v6170_v53  ;;  %v6214_v28 = vsel %vm443_vm0, %v6204_v47, 0.0 }
 0xd3f   : >> { %6215 = vadd.xlane.f32.xlu0 %v6214_v28  ;;  %v6211_v63 = vsel %vm443_vm0, %v6203_v24, 0.0 }
 0xd40   : >> { %v9256_v26 = vsub.f32 %v6156_v54, %v6189_v56  ;;  %6212 = vadd.xlane.f32.xlu1 %v6211_v63  ;;  %v6281_v56 = vsub.s32 2, %v9221_v6 }
 0xd41   : >> { %v6176_v27 = vpop.xlane.xlu1 %6175  ;;  %v6173_v29 = vpop.xlane.xlu0 %6172 }
 0xd42   : >> { %v6191_v40 = vmul.f32 0.05, %v6176_v27  ;;  %v6190_v20 = vmul.f32 0.05, %v6173_v29  ;;  %v6205_v32 = vmul.f32 %v9256_v26, %v9256_v26  ;;  %v9304_v27 = vrot.slane %v9227_v9, %v6269_v38 }
 0xd44   : >> { %v9260_v57 = vsub.f32 %v6158_v55, %v6191_v40  ;;  %v9262_v46 = vsub.f32 %v6157_v33, %v6190_v20  ;;  %v6217_v35 = vsel %vm443_vm0, %v6205_v32, 0.0 }
 0xd45   : >> { %v6182_v45 = vpop.xlane.xlu1 %6181  ;;  %6218 = vadd.xlane.f32.xlu1 %v6217_v35  ;;  %v6179_v31 = vpop.xlane.xlu0 %6178 }
 0xd46   : >> { %v6193_v8 = vmul.f32 0.05, %v6182_v45  ;;  %v6192_v37 = vmul.f32 0.05, %v6179_v31  ;;  %v6207_v7 = vmul.f32 %v9260_v57, %v9260_v57  ;;  %v6206_v17 = vmul.f32 %v9262_v46, %v9262_v46 }
 0xd48   : >> { %v9269_v52 = vsub.f32 %v6160_v30, %v6193_v8  ;;  %v9271_v51 = vsub.f32 %v6159_v48, %v6192_v37  ;;  %v6223_v54 = vsel %vm443_vm0, %v6207_v7, 0.0  ;;  %v6220_v34 = vsel %vm443_vm0, %v6206_v17, 0.0  ;;  %v430_v48 = vld [vmem:[%s427_s20 + $0x10] sm:$0xf] }
 0xd49   : >> { %6224 = vadd.xlane.f32.xlu1 %v6223_v54  ;;  %6221 = vadd.xlane.f32.xlu0 %v6220_v34  ;;  %v6185_v22 = vpop.xlane.xlu0 %6184  ;;  %v6282_v8 = vrot.slane %v9227_v9, %v6281_v56 }
 0xd4a   : >> { %v6194_v33 = vmul.f32 0.05, %v6185_v22  ;;  %v6209_v23 = vmul.f32 %v9269_v52, %v9269_v52  ;;  %v6208_v59 = vmul.f32 %v9271_v51, %v9271_v51  ;;  %7713 = vmatprep.subr.msk.mxu0 %vm468_vm1, %v430_v48 }
 0xd4b   : >> { %7714 = vmatpush3.msk.msra.mxu0 %vm468_vm1, %v430_v48  ;;  %vm6902_vm1 = vcmask (%p399_p5), 1044484  }
 0xd4c   : >> { %v9279_v19 = vsub.f32 %v6161_v61, %v6194_v33  ;;  %v6229_v25 = vsel %vm443_vm0, %v6209_v23, 0.0  ;;  %v6226_v18 = vsel %vm443_vm0, %v6208_v59, 0.0  ;;  %7776 = vmatprep.subr.bf16.mxu0 %v7775_v42  ;;  %v435_v23 = vld [vmem:[%s9297_s24 + $0x10] sm:$0xff]  ;;  %v436_v59 = vld [vmem:[%s9297_s24 + $0x18] sm:$0xff] }
 0xd4d   : >> { %6230 = vadd.xlane.f32.xlu1 %v6229_v25  ;;  %6227 = vadd.xlane.f32.xlu0 %v6226_v18 }
 0xd4e   : >> { %v6210_v55 = vmul.f32 %v9279_v19, %v9279_v19 }
 0xd50   : >> { %v6232_v44 = vsel %vm443_vm0, %v6210_v55, 0.0 }
 0xd51   : >> { %6233 = vadd.xlane.f32.xlu0 %v6232_v44  ;;  %v7779_v44 = vpack.c.bf16 %v436_v59, %v435_v23 }
 0xdcc   : >> { %v6216_v43 = vpop.xlane.xlu0 %6215 }
 0xdcd   : >> { %v6236_v30 = vmul.f32 0.05, %v6216_v43  ;;  %v6213_v60 = vpop.xlane.xlu1 %6212  ;;  %v7783_v43 = vpack.c.bf16 %v438_v49, %v437_v0 }
 0xdce   : >> { %v6235_v61 = vmul.f32 0.05, %v6213_v60 }
 0xdcf   : >> { %v6244_v10 = vadd.f32 1e-05, %v6236_v30 }
 0xdd0   : >> { %v6243_v50 = vadd.f32 1e-05, %v6235_v61  ;;  %v439_v61 = vld [vmem:[%s9297_s24 + $0x30] sm:$0xff] }
 0xdd1   : >> { %8023 = vrsqrt.f32 %v6244_v10  ;;  %v440_v10 = vld [vmem:[%s9297_s24 + $0x38] sm:$0xff] }
 0xdd2   : >> { %8025 = vrsqrt.f32 %v6243_v50  ;;  %v6219_v21 = vpop.xlane.xlu1 %6218  ;;  %v7787_v38 = vpack.c.bf16 %v440_v10, %v439_v61 }
 0xdd3   : >> { %v6237_v62 = vmul.f32 0.05, %v6219_v21 }
 0xdd5   : >> { %v6245_v11 = vadd.f32 1e-05, %v6237_v62 }
 0xdd6   : >> { %v6225_v4 = vpop.xlane.xlu1 %6224  ;;  %v6222_v47 = vpop.xlane.xlu0 %6221 }
 0xdd7   : >> { %8027 = vrsqrt.f32 %v6245_v11  ;;  %v6239_v53 = vmul.f32 0.05, %v6225_v4  ;;  %v6238_v24 = vmul.f32 0.05, %v6222_v47 }
 0xdd9   : >> { %v6247_v28 = vadd.f32 1e-05, %v6239_v53  ;;  %v6246_v63 = vadd.f32 1e-05, %v6238_v24 }
 0xdda   : >> { %v6231_v29 = vpop.xlane.xlu1 %6230  ;;  %v6228_v40 = vpop.xlane.xlu0 %6227 }
 0xddb   : >> { %v8024_v20 = vpop.eup %8023  ;;  %8029 = vrsqrt.f32 %v6247_v28  ;;  %v6241_v32 = vmul.f32 0.05, %v6231_v29  ;;  %v6240_v35 = vmul.f32 0.05, %v6228_v40 }
 0xddc   : >> { %v8026_v45 = vpop.eup %8025  ;;  %v6260_v31 = vmul.f32 %v8024_v20, %v9246_v5  ;;  %8031 = vrsqrt.f32 %v6246_v63  ;;  %v441_v63 = vld [vmem:[%s9297_s24 + $0x40] sm:$0xff] }
 0xddd   : >> { %v6249_v37 = vadd.f32 1e-05, %v6241_v32  ;;  %v6248_v7 = vadd.f32 1e-05, %v6240_v35  ;;  %v6259_v17 = vmul.f32 %v8026_v45, %v9248_v41 }
 0xdde   : >> { %v6234_v54 = vpop.xlane.xlu0 %6233  ;;  %v6272_v34 = vmul.f32 %v9304_v27, %v6260_v31 }
 0xddf   : >> { %8033 = vrsqrt.f32 %v6249_v37  ;;  %v6242_v22 = vmul.f32 0.05, %v6234_v54  ;;  %v6271_v33 = vmul.f32 %v9304_v27, %v6259_v17 }
 0xde0   : >> { %8035 = vrsqrt.f32 %v6248_v7  ;;  %v9315_v55 = vadd.f32 %v6282_v8, %v6272_v34 }
 0xde1   : >> { %v8028_v5 = vpop.eup %8027  ;;  %v6250_v25 = vadd.f32 1e-05, %v6242_v22  ;;  %v9313_v18 = vadd.f32 %v6282_v8, %v6271_v33 }
 0xde2   : >> { %v6261_v41 = vmul.f32 %v8028_v5, %v9256_v26 }
 0xde3   : >> { %8037 = vrsqrt.f32 %v6250_v25  ;;  %7715 = vmatprep.mubr.msk.f32.mxu0 %vm443_vm0, %v9313_v18 }
 0xde4   : >> { %7716 = vmatmul.mubr.msk.f32.vlgmr.msra.gmra.mrb[64].mxu0 %vm443_vm0, %v9315_v55  ;;  %v6273_v36 = vmul.f32 %v9304_v27, %v6261_v41 }
 0xde5   : >> { %v8030_v48 = vpop.eup %8029  ;;  %7778 = vmatpush3.bf16.msra.mxu0 %v7775_v42 }
 0xde6   : >> { %v8032_v58 = vpop.eup %8031  ;;  %v9325_v39 = vadd.f32 %v6282_v8, %v6273_v36  ;;  %v6263_v26 = vmul.f32 %v8030_v48, %v9260_v57  ;;  %7780 = vmatprep.subr.bf16.mxu0 %v7779_v44 }
 0xde7   : >> { %v6262_v30 = vmul.f32 %v8032_v58, %v9262_v46  ;;  %v6439_v58 = vsub.s32 5, %v9221_v6 }
 0xde8   : >> { %7718 = vmatprep.mubr.msk.f32.mxu0 %vm443_vm0, %v9325_v39  ;;  %v6275_v60 = vmul.f32 %v9304_v27, %v6263_v26 }
 0xde9   : >> { %v8034_v50 = vpop.eup %8033  ;;  %v6274_v21 = vmul.f32 %v9304_v27, %v6262_v30  ;;  %7782 = vmatpush3.bf16.msra.mxu0 %v7779_v44  ;;  %v6440_v26 = vrot.slane %v9227_v9, %v6439_v58 }
 0xdea   : >> { %v8036_v42 = vpop.eup %8035  ;;  %v9335_v62 = vadd.f32 %v6282_v8, %v6275_v60  ;;  %v6265_v57 = vmul.f32 %v8034_v50, %v9269_v52  ;;  %7784 = vmatprep.subr.bf16.mxu0 %v7783_v43 }
 0xdeb   : >> { %v9338_v11 = vadd.f32 %v6282_v8, %v6274_v21  ;;  %v6264_v46 = vmul.f32 %v8036_v42, %v9271_v51 }
 0xdec   : >> { %v6277_v4 = vmul.f32 %v9304_v27, %v6265_v57 }
 0xded   : >> { %v8038_v47 = vpop.eup %8037  ;;  %7719 = vmatmul.mubr.msk.f32.gmra.mrb[66].mxu0 %vm443_vm0, %v9338_v11  ;;  %v6276_v53 = vmul.f32 %v9304_v27, %v6264_v46 }
 0xdee   : >> { %7721 = vmatprep.mubr.msk.f32.mxu0 %vm443_vm0, %v9335_v62  ;;  %v9347_v52 = vadd.f32 %v6282_v8, %v6277_v4  ;;  %v6266_v24 = vmul.f32 %v8038_v47, %v9279_v19  ;;  %7786 = vmatpush3.bf16.msra.mxu0 %v7783_v43  ;;  %v442_v19 = vld [vmem:[%s9297_s24 + $0x48] sm:$0xff] }
 0xdef   : >> { %v9350_v51 = vadd.f32 %v6282_v8, %v6276_v53  ;;  %7788 = vmatprep.subr.bf16.mxu0 %v7787_v38  ;;  %v7791_v29 = vpack.c.bf16 %v442_v19, %v441_v63 }
 0xdf0   : >> { %v6278_v56 = vmul.f32 %v9304_v27, %v6266_v24  ;;  %v7150_v27 = vld [vmem:[%s425_s26] ss:$0 sm:$0xff] }
 0xdf1   : >> { %7722 = vmatmul.mubr.msk.f32.gmra.mrb[68].mxu0 %vm443_vm0, %v9350_v51 }
 0xdf2   : >> { %7724 = vmatprep.mubr.msk.f32.mxu0 %vm443_vm0, %v9347_v52  ;;  %v9357_v28 = vadd.f32 %v6282_v8, %v6278_v56  ;;  %7790 = vmatpush3.bf16.msra.mxu0 %v7787_v38 }
 0xdf3   : >> { %7792 = vmatprep.subr.bf16.mxu0 %v7791_v29 }
 0xdf5   : >> { %7725 = vmatmul.mubr.msk.f32.gmra.mrb[70].mxu0 %vm443_vm0, %v9357_v28 }
 0xdf6   : >> { %7794 = vmatpush3.bf16.msra.mxu0 %v7791_v29 }
 0xeb7   : >> { %v7717_v40 = vpop.f32.mrb[64].mxu0 }
 0xeb8   : >> { %v6396_v20 = vadd.f32 %v7717_v40, %v7150_v27  ;;  %v6390_v32 = vpop.f32.mrb[65].mxu0 }
 0xeb9   : >> { %v6391_v35 = vadd.f32 %v7150_v27, %v6390_v32 }
 0xeba   : >> { %v6430_v31 = vmax.f32 %v6396_v20, 0.0 }
 0xebb   : >> { %v6429_v45 = vmax.f32 %v6391_v35, 0.0 }
 0xebd   : >> { %7747 = vmatprep.mubr.msk.f32.mxu0 %vm6441_vm7, %v6429_v45 }
 0xebe   : >> { %7748 = vmatmul.mubr.msk.f32.vlgmr.msra.gmra.mrb[72].mxu0 %vm6441_vm7, %v6430_v31 }
 0xec0   : >> { %v7720_v8 = vpop.f32.mrb[66].mxu0 }
 0xec1   : >> { %v6406_v37 = vadd.f32 %v7720_v8, %v7150_v27  ;;  %v6400_v7 = vpop.f32.mrb[67].mxu0 }
 0xec2   : >> { %v6401_v17 = vadd.f32 %v7150_v27, %v6400_v7 }
 0xec3   : >> { %v6432_v22 = vmax.f32 %v6406_v37, 0.0 }
 0xec4   : >> { %v6431_v54 = vmax.f32 %v6401_v17, 0.0  ;;  %v7723_v34 = vpop.f32.mrb[68].mxu0 }
 0xec5   : >> { %v6416_v33 = vadd.f32 %v7723_v34, %v7150_v27  ;;  %v6410_v23 = vpop.f32.mrb[69].mxu0 }
 0xec6   : >> { %v6411_v59 = vadd.f32 %v7150_v27, %v6410_v23  ;;  %7750 = vmatprep.mubr.msk.f32.mxu0 %vm6441_vm7, %v6431_v54 }
 0xec7   : >> { %7751 = vmatmul.mubr.msk.f32.gmra.mrb[74].mxu0 %vm6441_vm7, %v6432_v22  ;;  %v6434_v41 = vmax.f32 %v6416_v33, 0.0 }
 0xec8   : >> { %v6433_v5 = vmax.f32 %v6411_v59, 0.0  ;;  %v7726_v25 = vpop.f32.mrb[70].mxu0 }
 0xec9   : >> { %v6426_v44 = vadd.f32 %v7726_v25, %v7150_v27  ;;  %v6420_v0 = vpop.f32.mrb[71].mxu0 }
 0xeca   : >> { %v6421_v49 = vadd.f32 %v7150_v27, %v6420_v0  ;;  %7753 = vmatprep.mubr.msk.f32.mxu0 %vm6441_vm7, %v6433_v5 }
 0xecb   : >> { %7754 = vmatmul.mubr.msk.f32.gmra.mrb[76].mxu0 %vm6441_vm7, %v6434_v41  ;;  %v6436_v48 = vmax.f32 %v6426_v44, 0.0 }
 0xecc   : >> { %v6435_v36 = vmax.f32 %v6421_v49, 0.0 }
 0xece   : >> { %7756 = vmatprep.mubr.msk.f32.mxu0 %vm6441_vm7, %v6435_v36 }
 0xecf   : >> { %7757 = vmatmul.mubr.msk.f32.gmra.mrb[78].mxu0 %vm6441_vm7, %v6436_v48  ;;  %vm6914_vm7 = vcmask (%p399_p5), 7168  }
 0xf91   : >> { %v7749_v43 = vpop.f32.mrb[72].mxu0 }
 0xf92   : >> { %v6538_v30 = vadd.f32 %v7749_v43, %v6440_v26  ;;  %v6532_v60 = vpop.f32.mrb[73].mxu0 }
 0xf93   : >> { %v6533_v61 = vadd.f32 %v6532_v60, %v6440_v26 }
 0xf94   : >> { %v6572_v10 = vadd.f32 %v6538_v30, %v9315_v55 }
 0xf95   : >> { %v6571_v50 = vadd.f32 %v6533_v61, %v9313_v18 }
 0xf96   : >> { %v6582_v21 = vsel %vm443_vm0, %v6572_v10, 0.0 }
 0xf97   : >> { %6583 = vadd.xlane.f32.xlu0 %v6582_v21  ;;  %v6579_v42 = vsel %vm443_vm0, %v6571_v50, 0.0 }
 0xf98   : >> { %6580 = vadd.xlane.f32.xlu1 %v6579_v42 }
 0xf9a   : >> { %v7752_v57 = vpop.f32.mrb[74].mxu0 }
 0xf9b   : >> { %v6548_v46 = vadd.f32 %v7752_v57, %v6440_v26  ;;  %v6542_v38 = vpop.f32.mrb[75].mxu0 }
 0xf9c   : >> { %v6543_v4 = vadd.f32 %v6542_v38, %v6440_v26 }
 0xf9d   : >> { %v6574_v47 = vadd.f32 %v6548_v46, %v9338_v11 }
 0xf9e   : >> { %v6573_v53 = vadd.f32 %v6543_v4, %v9325_v39  ;;  %v7755_v24 = vpop.f32.mrb[76].mxu0 }
 0xf9f   : >> { %v6558_v56 = vadd.f32 %v7755_v24, %v6440_v26  ;;  %v6552_v63 = vpop.f32.mrb[77].mxu0  ;;  %v6588_v55 = vsel %vm443_vm0, %v6574_v47, 0.0 }
 0xfa0   : >> { %v6553_v18 = vadd.f32 %v6552_v63, %v6440_v26  ;;  %6589 = vadd.xlane.f32.xlu0 %v6588_v55  ;;  %v6585_v19 = vsel %vm443_vm0, %v6573_v53, 0.0 }
 0xfa1   : >> { %v6576_v29 = vadd.f32 %v6558_v56, %v9350_v51  ;;  %6586 = vadd.xlane.f32.xlu1 %v6585_v19 }
 0xfa2   : >> { %v6575_v27 = vadd.f32 %v6553_v18, %v9335_v62  ;;  %v7758_v40 = vpop.f32.mrb[78].mxu0 }
 0xfa3   : >> { %v6568_v20 = vadd.f32 %v7758_v40, %v6440_v26  ;;  %v6562_v32 = vpop.f32.mrb[79].mxu0  ;;  %v6594_v11 = vsel %vm443_vm0, %v6576_v29, 0.0 }
 0xfa4   : >> { %v6563_v39 = vadd.f32 %v6562_v32, %v6440_v26  ;;  %6595 = vadd.xlane.f32.xlu0 %v6594_v11  ;;  %v6591_v35 = vsel %vm443_vm0, %v6575_v27, 0.0  ;;  %v6685_v11 = vsub.s32 3, %v9221_v6 }
 0xfa5   : >> { %v6578_v45 = vadd.f32 %v6568_v20, %v9357_v28  ;;  %6592 = vadd.xlane.f32.xlu1 %v6591_v35 }
 0xfa6   : >> { %v6577_v31 = vadd.f32 %v6563_v39, %v9347_v52 }
 0xfa7   : >> { %v6600_v8 = vsel %vm443_vm0, %v6578_v45, 0.0 }
 0xfa8   : >> { %6601 = vadd.xlane.f32.xlu0 %v6600_v8  ;;  %v6597_v51 = vsel %vm443_vm0, %v6577_v31, 0.0 }
 0xfa9   : >> { %6598 = vadd.xlane.f32.xlu1 %v6597_v51 }
0x1024   : >> { %v6584_v62 = vpop.xlane.xlu0 %6583 }
0x1025   : >> { %v6604_v37 = vmul.f32 0.05, %v6584_v62  ;;  %v6581_v7 = vpop.xlane.xlu1 %6580 }
0x1026   : >> { %v6603_v17 = vmul.f32 0.05, %v6581_v7 }
0x1027   : >> { %v9393_v54 = vsub.f32 %v6572_v10, %v6604_v37  ;;  %v6686_v37 = vrot.slane %v9227_v9, %v6685_v11 }
0x1028   : >> { %v9395_v34 = vsub.f32 %v6571_v50, %v6603_v17 }
0x1029   : >> { %v6620_v28 = vmul.f32 %v9393_v54, %v9393_v54 }
0x102a   : >> { %v6619_v52 = vmul.f32 %v9395_v34, %v9395_v34 }
0x102b   : >> { %v6630_v22 = vsel %vm443_vm0, %v6620_v28, 0.0 }
0x102c   : >> { %6631 = vadd.xlane.f32.xlu0 %v6630_v22  ;;  %v6627_v33 = vsel %vm443_vm0, %v6619_v52, 0.0 }
0x102d   : >> { %v6590_v23 = vpop.xlane.xlu0 %6589  ;;  %6628 = vadd.xlane.f32.xlu1 %v6627_v33 }
0x102e   : >> { %v6606_v59 = vmul.f32 0.05, %v6590_v23  ;;  %v6587_v5 = vpop.xlane.xlu1 %6586 }
0x102f   : >> { %v6605_v25 = vmul.f32 0.05, %v6587_v5 }
0x1030   : >> { %v9403_v41 = vsub.f32 %v6574_v47, %v6606_v59 }
0x1031   : >> { %v9405_v44 = vsub.f32 %v6573_v53, %v6605_v25  ;;  %v6596_v0 = vpop.xlane.xlu0 %6595 }
0x1032   : >> { %v6608_v49 = vmul.f32 0.05, %v6596_v0  ;;  %v6593_v36 = vpop.xlane.xlu1 %6592  ;;  %v6622_v48 = vmul.f32 %v9403_v41, %v9403_v41 }
0x1033   : >> { %v6607_v58 = vmul.f32 0.05, %v6593_v36  ;;  %v6621_v26 = vmul.f32 %v9405_v44, %v9405_v44 }
0x1034   : >> { %v9411_v43 = vsub.f32 %v6576_v29, %v6608_v49  ;;  %v6636_v30 = vsel %vm443_vm0, %v6622_v48, 0.0 }
0x1035   : >> { %v9414_v60 = vsub.f32 %v6575_v27, %v6607_v58  ;;  %6637 = vadd.xlane.f32.xlu0 %v6636_v30  ;;  %v6602_v61 = vpop.xlane.xlu0 %6601  ;;  %v6633_v10 = vsel %vm443_vm0, %v6621_v26, 0.0 }
0x1036   : >> { %v6610_v50 = vmul.f32 0.05, %v6602_v61  ;;  %6634 = vadd.xlane.f32.xlu1 %v6633_v10  ;;  %v6599_v21 = vpop.xlane.xlu1 %6598  ;;  %v6624_v42 = vmul.f32 %v9411_v43, %v9411_v43 }
0x1037   : >> { %v6609_v57 = vmul.f32 0.05, %v6599_v21  ;;  %v6623_v46 = vmul.f32 %v9414_v60, %v9414_v60 }
0x1038   : >> { %v9421_v38 = vsub.f32 %v6578_v45, %v6610_v50  ;;  %v6642_v4 = vsel %vm443_vm0, %v6624_v42, 0.0 }
0x1039   : >> { %v9424_v47 = vsub.f32 %v6577_v31, %v6609_v57  ;;  %6643 = vadd.xlane.f32.xlu0 %v6642_v4  ;;  %v6639_v53 = vsel %vm443_vm0, %v6623_v46, 0.0  ;;  %v6697_v31 = vsub.s32 4, %v9221_v6 }
0x103a   : >> { %6640 = vadd.xlane.f32.xlu1 %v6639_v53  ;;  %v6626_v24 = vmul.f32 %v9421_v38, %v9421_v38 }
0x103b   : >> { %v6625_v56 = vmul.f32 %v9424_v47, %v9424_v47  ;;  %v6698_v33 = vrot.slane %v9227_v9, %v6697_v31 }
0x103c   : >> { %v6648_v63 = vsel %vm443_vm0, %v6626_v24, 0.0 }
0x103d   : >> { %6649 = vadd.xlane.f32.xlu0 %v6648_v63  ;;  %v6645_v55 = vsel %vm443_vm0, %v6625_v56, 0.0 }
0x103e   : >> { %6646 = vadd.xlane.f32.xlu1 %v6645_v55 }
0x10b9   : >> { %v6632_v18 = vpop.xlane.xlu0 %6631 }
0x10ba   : >> { %v6652_v19 = vmul.f32 0.05, %v6632_v18  ;;  %v6629_v29 = vpop.xlane.xlu1 %6628 }
0x10bb   : >> { %v6651_v27 = vmul.f32 0.05, %v6629_v29 }
0x10bc   : >> { %v6660_v40 = vadd.f32 1e-05, %v6652_v19 }
0x10bd   : >> { %v6659_v20 = vadd.f32 1e-05, %v6651_v27 }
0x10be   : >> { %8039 = vrsqrt.f32 %v6660_v40 }
0x10bf   : >> { %8041 = vrsqrt.f32 %v6659_v20 }
0x10c2   : >> { %v6638_v32 = vpop.xlane.xlu0 %6637 }
0x10c3   : >> { %v6654_v39 = vmul.f32 0.05, %v6638_v32  ;;  %v6635_v35 = vpop.xlane.xlu1 %6634 }
0x10c4   : >> { %v6653_v45 = vmul.f32 0.05, %v6635_v35 }
0x10c5   : >> { %v6662_v8 = vadd.f32 1e-05, %v6654_v39 }
0x10c6   : >> { %v6661_v51 = vadd.f32 1e-05, %v6653_v45  ;;  %v6644_v62 = vpop.xlane.xlu0 %6643 }
0x10c7   : >> { %8043 = vrsqrt.f32 %v6662_v8  ;;  %v6656_v7 = vmul.f32 0.05, %v6644_v62  ;;  %v6641_v17 = vpop.xlane.xlu1 %6640 }
0x10c8   : >> { %v8040_v28 = vpop.eup %8039  ;;  %8045 = vrsqrt.f32 %v6661_v51  ;;  %v6655_v52 = vmul.f32 0.05, %v6641_v17 }
0x10c9   : >> { %v8042_v22 = vpop.eup %8041  ;;  %v6676_v23 = vmul.f32 %v8040_v28, %v9393_v54  ;;  %v6664_v59 = vadd.f32 1e-05, %v6656_v7 }
0x10ca   : >> { %v6675_v5 = vmul.f32 %v8042_v22, %v9395_v34  ;;  %v6663_v6 = vadd.f32 1e-05, %v6655_v52  ;;  %v6650_v25 = vpop.xlane.xlu0 %6649 }
0x10cb   : >> { %v6688_v0 = vmul.f32 %v6686_v37, %v6676_v23  ;;  %8047 = vrsqrt.f32 %v6664_v59  ;;  %v6658_v49 = vmul.f32 0.05, %v6650_v25  ;;  %v6647_v36 = vpop.xlane.xlu1 %6646 }
0x10cc   : >> { %v6687_v48 = vmul.f32 %v6686_v37, %v6675_v5  ;;  %8049 = vrsqrt.f32 %v6663_v6  ;;  %v6657_v58 = vmul.f32 0.05, %v6647_v36 }
0x10cd   : >> { %v6700_v26 = vadd.f32 %v6698_v33, %v6688_v0   ;;  %v6666_v30 = vadd.f32 1e-05, %v6658_v49 }
0x10ce   : >> { %v6699_v61 = vadd.f32 %v6698_v33, %v6687_v48   ;;  %v6665_v10 = vadd.f32 1e-05, %v6657_v58 }
0x10cf   : >> { %8051 = vrsqrt.f32 %v6666_v30  ;;  %v9559_v5 = vmov %v6700_v26 }
0x10d0   : >> { %8053 = vrsqrt.f32 %v6665_v10 }
0x10d1   : >> { %v8044_v9 = vpop.eup %8043 }
0x10d2   : >> { %v8046_v54 = vpop.eup %8045  ;;  %v6678_v50 = vmul.f32 %v8044_v9, %v9403_v41 }
0x10d3   : >> { %v6677_v34 = vmul.f32 %v8046_v54, %v9405_v44 }
0x10d4   : >> { %v6690_v21 = vmul.f32 %v6686_v37, %v6678_v50 }
0x10d5   : >> { %v8048_v42 = vpop.eup %8047  ;;  %v6689_v57 = vmul.f32 %v6686_v37, %v6677_v34 }
0x10d6   : >> { %v8050_v46 = vpop.eup %8049  ;;  %v6702_v53 = vadd.f32 %v6698_v33, %v6690_v21   ;;  %v6680_v4 = vmul.f32 %v8048_v42, %v9411_v43  ;;  %v6707_v43 = vld [vmem:[%s9519_s8] sm:$0xff] (%p399_p5) }
0x10d7   : >> { %v6701_v24 = vadd.f32 %v6698_v33, %v6689_v57   ;;  %v6679_v56 = vmul.f32 %v8050_v46, %v9414_v60  ;;  %v6709_v60 = vmul.f32 (%p399_p5), %v6707_v43, %v6700_v26 }
0x10d8   : >> { %v6692_v63 = vmul.f32 %v6686_v37, %v6680_v4  ;;  %v9557_v7 = vmov %v6702_v53  ;;  %v9560_v4 = vmov %v6699_v61  ;;  %v6711_v35 = vmul.f32 (%p399_p5), %v6707_v43, %v6702_v53 }
0x10d9   : >> { %v8052_v55 = vpop.eup %8051  ;;  %v6691_v18 = vmul.f32 %v6686_v37, %v6679_v56  ;;  %v9558_v6 = vmov %v6701_v24  ;;  %v6720_v45 = vsel (%p399_p5), %vm443_vm0, %v6709_v60, 0.0 }
0x10da   : >> { %v8054_v19 = vpop.eup %8053  ;;  %v6704_v29 = vadd.f32 %v6698_v33, %v6692_v63   ;;  %v6682_v27 = vmul.f32 %v8052_v55, %v9421_v38  ;;  %v6708_v38 = vmul.f32 (%p399_p5), %v6707_v43, %v6699_v61  ;;  %6721 = vadd.xlane.f32.xlu0 (%p399_p5), %v6720_v45  ;;  %v6726_v62 = vsel (%p399_p5), %vm443_vm0, %v6711_v35, 0.0 }
0x10db   : >> { %v6703_v41 = vadd.f32 %v6698_v33, %v6691_v18   ;;  %v6681_v44 = vmul.f32 %v8054_v19, %v9424_v47  ;;  %401 = sbr.rel (!%p399_p5) target bundleno = 24 (0x18), region = 106  ;;  %v6710_v47 = vmul.f32 (%p399_p5), %v6707_v43, %v6701_v24 }
0x10dc   : >> { %v6694_v40 = vmul.f32 %v6686_v37, %v6682_v27  ;;  %v9555_v9 = vmov %v6704_v29  ;;  %v6717_v31 = vsel (%p399_p5), %vm443_vm0, %v6708_v38, 0.0  ;;  %v6713_v17 = vmul.f32 (%p399_p5), %v6707_v43, %v6704_v29 }
0x10dd   : >> { %v6693_v20 = vmul.f32 %v6686_v37, %v6681_v44  ;;  %v9556_v8 = vmov %v6703_v41  ;;  %6718 = vadd.xlane.f32.xlu1 (%p399_p5), %v6717_v31  ;;  %v6723_v51 = vsel (%p399_p5), %vm443_vm0, %v6710_v47, 0.0  ;;  %v6712_v37 = vmul.f32 (%p399_p5), %v6707_v43, %v6703_v41 }
0x10de   : >> { %v6706_v32 = vadd.f32 %v6698_v33, %v6694_v40   ;;  %6724 = vadd.xlane.f32.xlu0 (%p399_p5), %v6723_v51  ;;  %v6732_v2 = vsel (%p399_p5), %vm443_vm0, %v6713_v17, 0.0 }
0x10df   : >> { %v6705_v39 = vadd.f32 %v6698_v33, %v6693_v20   ;;  %v6729_v1 = vsel (%p399_p5), %vm443_vm0, %v6712_v37, 0.0 }
0x10e0   : >> { %v9553_v11 = vmov %v6706_v32  ;;  %v6715_v12 = vmul.f32 (%p399_p5), %v6707_v43, %v6706_v32 }
0x10e1   : >> { %v9554_v10 = vmov %v6705_v39  ;;  %6727 = vadd.xlane.f32.xlu1 (%p399_p5), %v6726_v62  ;;  %v6714_v3 = vmul.f32 (%p399_p5), %v6707_v43, %v6705_v39 }
0x10e2   : > { %6730 = vadd.xlane.f32.xlu0 %v6729_v1  ;;  %v6738_v14 = vsel %vm443_vm0, %v6715_v12, 0.0  ;;  %v7168_v10 = vld [vmem:[#allocation2] ss:$0 sm:$0xff] }
0x10e3   : > { %v6735_v13 = vsel %vm443_vm0, %v6714_v3, 0.0 }
0x10e5   : > { %6733 = vadd.xlane.f32.xlu1 %v6732_v2 }
0x10e6   : > { %6736 = vadd.xlane.f32.xlu0 %v6735_v13 }
0x10e9   : > { %6739 = vadd.xlane.f32.xlu1 %v6738_v14 }
0x1167   : > { %v6722_v15 = vpop.xlane.xlu0 %6721 }
0x1168   : > { %v6747_v11 = vrot.slane %v6722_v15, 4 }
0x116a   : > { %v6719_v16 = vpop.xlane.xlu1 %6718  ;;  %v6748_v7 = vadd.f32 %v6747_v11, %v6722_v15 }
0x116b   : > { %v6741_v8 = vrot.slane %v6719_v16, 4  ;;  %v6725_v52 = vpop.xlane.xlu0 %6724 }
0x116c   : > { %v6749_v33 = vrot.slane %v6748_v7, 2  ;;  %v6753_v59 = vrot.slane %v6725_v52, 4 }
0x116d   : > { %v6742_v28 = vadd.f32 %v6741_v8, %v6719_v16 }
0x116e   : > { %v6728_v22 = vpop.xlane.xlu1 %6727  ;;  %v6750_v6 = vadd.f32 %v6749_v33, %v6748_v7  ;;  %v6754_v0 = vadd.f32 %v6753_v59, %v6725_v52 }
0x116f   : > { %v6743_v23 = vrot.slane %v6742_v28, 2  ;;  %v6759_v5 = vrot.slane %v6728_v22, 4  ;;  %v6731_v36 = vpop.xlane.xlu0 %6730 }
0x1170   : > { %v6751_v58 = vrot.slane %v6750_v6, 1  ;;  %v6755_v30 = vrot.slane %v6754_v0, 2  ;;  %v6765_v9 = vrot.slane %v6731_v36, 4 }
0x1171   : > { %v6744_v25 = vadd.f32 %v6743_v23, %v6742_v28  ;;  %v6760_v49 = vadd.f32 %v6759_v5, %v6728_v22 }
0x1172   : > { %v6734_v48 = vpop.xlane.xlu1 %6733  ;;  %v6752_v50 = vadd.f32 %v6751_v58, %v6750_v6  ;;  %v6756_v21 = vadd.f32 %v6755_v30, %v6754_v0  ;;  %v6766_v57 = vadd.f32 %v6765_v9, %v6731_v36 }
0x1173   : > { %v6745_v26 = vrot.slane %v6744_v25, 1  ;;  %v6761_v61 = vrot.slane %v6760_v49, 2  ;;  %v6771_v54 = vrot.slane %v6734_v48, 4  ;;  %v6737_v53 = vpop.xlane.xlu0 %6736 }
0x1174   : > { %v9475_v24 = vadd.f32 %v7168_v10, %v6752_v50  ;;  %v6757_v63 = vrot.slane %v6756_v21, 1  ;;  %v6767_v18 = vrot.slane %v6766_v57, 2  ;;  %v6777_v29 = vrot.slane %v6737_v53, 4 }
0x1175   : > { %v6746_v34 = vadd.f32 %v6745_v26, %v6744_v25  ;;  %v6762_v42 = vadd.f32 %v6761_v61, %v6760_v49  ;;  %v6772_v46 = vadd.f32 %v6771_v54, %v6734_v48 }
0x1176   : > { %v6740_v4 = vpop.xlane.xlu1 %6739  ;;  %v6805_v41 = vand.u32 2147483647, %v9475_v24  ;;  %v6758_v40 = vadd.f32 %v6757_v63, %v6756_v21  ;;  %v6768_v32 = vadd.f32 %v6767_v18, %v6766_v57  ;;  %v6778_v38 = vadd.f32 %v6777_v29, %v6737_v53 }
0x1177   : > { %v9477_v56 = vadd.f32 %v7168_v10, %v6746_v34  ;;  %v6763_v55 = vrot.slane %v6762_v42, 1  ;;  %v6773_v19 = vrot.slane %v6772_v46, 2  ;;  %v6783_v27 = vrot.slane %v6740_v4, 4 }
0x1178   : > { %v6813_v43 = vsub.f32 0.0, %v6805_v41  ;;  %v9481_v35 = vadd.f32 %v7168_v10, %v6758_v40  ;;  %v6769_v31 = vrot.slane %v6768_v32, 1  ;;  %v6779_v17 = vrot.slane %v6778_v38, 2 }
0x1179   : > { %v6804_v44 = vand.u32 2147483647, %v9477_v56  ;;  %v6764_v20 = vadd.f32 %v6763_v55, %v6762_v42  ;;  %v6774_v39 = vadd.f32 %v6773_v19, %v6772_v46  ;;  %v6784_v47 = vadd.f32 %v6783_v27, %v6740_v4 }
0x117a   : > { %v6822_v62 = vmul.f32 1.442695, %v6813_v43  ;;  %v6806_v2 = vand.u32 2147483647, %v9481_v35  ;;  %v6770_v12 = vadd.f32 %v6769_v31, %v6768_v32  ;;  %v6780_v14 = vadd.f32 %v6779_v17, %v6778_v38 }
0x117b   : > { %v6812_v60 = vsub.f32 0.0, %v6804_v44  ;;  %v9483_v45 = vadd.f32 %v7168_v10, %v6764_v20  ;;  %v6775_v51 = vrot.slane %v6774_v39, 1  ;;  %v6785_v1 = vrot.slane %v6784_v47, 2 }
0x117c   : > { %8055 = vpow2.f32 %v6822_v62  ;;  %v6814_v15 = vsub.f32 0.0, %v6806_v2  ;;  %v9487_v8 = vadd.f32 %v7168_v10, %v6770_v12  ;;  %v6781_v28 = vrot.slane %v6780_v14, 1 }
0x117d   : > { %v6820_v37 = vmul.f32 1.442695, %v6812_v60  ;;  %v6807_v3 = vand.u32 2147483647, %v9483_v45  ;;  %v6776_v13 = vadd.f32 %v6775_v51, %v6774_v39  ;;  %v6786_v11 = vadd.f32 %v6785_v1, %v6784_v47 }
0x117e   : > { %v6824_v52 = vmul.f32 1.442695, %v6814_v15  ;;  %v6808_v23 = vand.u32 2147483647, %v9487_v8  ;;  %v6782_v5 = vadd.f32 %v6781_v28, %v6780_v14  ;;  %vm6837_vm8 = vcmp.ge.f32.partialorder %v9475_v24, 0.0 }
0x117f   : > { %8057 = vpow2.f32 %v6820_v37  ;;  %v6815_v16 = vsub.f32 0.0, %v6807_v3  ;;  %v9489_v7 = vadd.f32 %v7168_v10, %v6776_v13  ;;  %v6787_v33 = vrot.slane %v6786_v11, 1 }
0x1180   : > { %8059 = vpow2.f32 %v6824_v52  ;;  %v6816_v25 = vsub.f32 0.0, %v6808_v23  ;;  %v9493_v49 = vadd.f32 %v7168_v10, %v6782_v5  ;;  %vm6838_vm9 = vcmp.ge.f32.partialorder %v9481_v35, 0.0 }
0x1181   : > { %v6826_v22 = vmul.f32 1.442695, %v6815_v16  ;;  %v6809_v59 = vand.u32 2147483647, %v9489_v7  ;;  %v6788_v6 = vadd.f32 %v6787_v33, %v6786_v11  ;;  %vm6839_vm10 = vcmp.ge.f32.partialorder %v9483_v45, 0.0 }
0x1182   : > { %v6828_v48 = vmul.f32 1.442695, %v6816_v25  ;;  %v6810_v26 = vand.u32 2147483647, %v9493_v49  ;;  %vm6836_vm12 = vcmp.ge.f32.partialorder %v9477_v56, 0.0  ;;  %vm6840_vm14 = vcmp.ge.f32.partialorder %v9487_v8, 0.0 }
0x1183   : > { %8061 = vpow2.f32 %v6826_v22  ;;  %v6817_v0 = vsub.f32 0.0, %v6809_v59  ;;  %v9495_v36 = vadd.f32 %v7168_v10, %v6788_v6  ;;  %vm6841_vm0 = vcmp.ge.f32.partialorder %v9489_v7, 0.0 }
0x1184   : > { %8063 = vpow2.f32 %v6828_v48  ;;  %v6818_v50 = vsub.f32 0.0, %v6810_v26  ;;  %vm6842_vm3 = vcmp.ge.f32.partialorder %v9493_v49, 0.0 }
0x1185   : > { %v6830_v58 = vmul.f32 1.442695, %v6817_v0  ;;  %v6811_v30 = vand.u32 2147483647, %v9495_v36  ;;  %vm6843_vm5 = vcmp.ge.f32.partialorder %v9495_v36, 0.0 }
0x1186   : > { %v8056_v61 = vpop.eup %8055  ;;  %v6832_v42 = vmul.f32 1.442695, %v6818_v50 }
0x1187   : > { %v6845_v54 = vadd.f32 1.0, %v8056_v61  ;;  %8065 = vpow2.f32 %v6830_v58  ;;  %v6819_v34 = vsub.f32 0.0, %v6811_v30 }
0x1189   : > { %v8058_v9 = vpop.eup %8057  ;;  %8067 = vrcp.f32 %v6845_v54  ;;  %v6834_v57 = vmul.f32 1.442695, %v6819_v34 }
0x118a   : > { %v6844_v21 = vadd.f32 1.0, %v8058_v9  ;;  %v8060_v46 = vpop.eup %8059  ;;  %8069 = vpow2.f32 %v6832_v42 }
0x118b   : > { %v6846_v53 = vadd.f32 1.0, %v8060_v46  ;;  %8071 = vpow2.f32 %v6834_v57 }
0x118c   : > { %8073 = vrcp.f32 %v6844_v21 }
0x118d   : > { %v8062_v10 = vpop.eup %8061  ;;  %8075 = vrcp.f32 %v6846_v53 }
0x118e   : > { %v6847_v4 = vadd.f32 1.0, %v8062_v10  ;;  %v8064_v63 = vpop.eup %8063 }
0x118f   : > { %v6848_v18 = vadd.f32 1.0, %v8064_v63 }
0x1190   : > { %8077 = vrcp.f32 %v6847_v4 }
0x1191   : > { %v8066_v55 = vpop.eup %8065  ;;  %8079 = vrcp.f32 %v6848_v18 }
0x1192   : > { %v6849_v19 = vadd.f32 1.0, %v8066_v55 }
0x1193   : > { %v8068_v29 = vpop.eup %8067 }
0x1194   : > { %v6869_v27 = vmul.f32 %v8068_v29, %v8056_v61  ;;  %8081 = vrcp.f32 %v6849_v19  ;;  %v8070_v41 = vpop.eup %8069 }
0x1195   : > { %v8072_v44 = vpop.eup %8071  ;;  %v6850_v40 = vadd.f32 1.0, %v8070_v41 }
0x1196   : > { %v8074_v20 = vpop.eup %8073  ;;  %v6851_v32 = vadd.f32 1.0, %v8072_v44  ;;  %v6877_v43 = vsel %vm6837_vm8, %v8068_v29, %v6869_v27 }
0x1197   : > { %v8076_v39 = vpop.eup %8075  ;;  %8083 = vrcp.f32 %v6850_v40  ;;  %v6868_v47 = vmul.f32 %v8074_v20, %v8058_v9  ;;  %v6892_v51 = vrot.slane %v6877_v43, 7 }
0x1198   : > { %v6870_v38 = vmul.f32 %v8076_v39, %v8060_v46  ;;  %8085 = vrcp.f32 %v6851_v32 }
0x1199   : > { %v6876_v2 = vsel %vm6836_vm12, %v8074_v20, %v6868_v47 }
0x119a   : > { %v8078_v60 = vpop.eup %8077  ;;  %v6878_v62 = vsel %vm6838_vm9, %v8076_v39, %v6870_v38  ;;  %v6894_v12 = vsel %vm6893_vm11, %v6892_v51, %v6876_v2 }
0x119b   : > { %v6871_v31 = vmul.f32 %v8078_v60, %v8062_v10  ;;  %v6895_v37 = vrot.slane %v6878_v62, 6  ;;  %v8080_v1 = vpop.eup %8079 }
0x119c   : > { %v6872_v3 = vmul.f32 %v8080_v1, %v8064_v63 }
0x119d   : > { %v6879_v17 = vsel %vm6839_vm10, %v8078_v60, %v6871_v31  ;;  %v6897_v14 = vsel %vm6896_vm13, %v6895_v37, %v6894_v12 }
0x119e   : > { %v8082_v24 = vpop.eup %8081  ;;  %v6898_v13 = vrot.slane %v6879_v17, 5  ;;  %v6880_v15 = vsel %vm6840_vm14, %v8080_v1, %v6872_v3 }
0x119f   : > { %v6873_v35 = vmul.f32 %v8082_v24, %v8066_v55  ;;  %v6901_v45 = vrot.slane %v6880_v15, 4 }
0x11a0   : > { %v6900_v56 = vsel %vm6899_vm15, %v6898_v13, %v6897_v14 }
0x11a1   : > { %v6881_v16 = vsel %vm6841_vm0, %v8082_v24, %v6873_v35  ;;  %v8084_v11 = vpop.eup %8083  ;;  %v6903_v33 = vsel %vm6902_vm1, %v6901_v45, %v6900_v56 }
0x11a2   : > { %v8086_v28 = vpop.eup %8085  ;;  %v6904_v52 = vrot.slane %v6881_v16, 3  ;;  %v6874_v22 = vmul.f32 %v8084_v11, %v8070_v41 }
0x11a3   : > { %v6875_v8 = vmul.f32 %v8086_v28, %v8072_v44 }
0x11a4   : > { %v6882_v23 = vsel %vm6842_vm3, %v8084_v11, %v6874_v22  ;;  %v6906_v5 = vsel %vm6905_vm2, %v6904_v52, %v6903_v33 }
0x11a5   : > { %v6907_v59 = vrot.slane %v6882_v23, 2  ;;  %v6883_v7 = vsel %vm6843_vm5, %v8086_v28, %v6875_v8 }
0x11a6   : > { %v6910_v6 = vrot.slane %v6883_v7, 1 }
0x11a7   : > { %v6909_v25 = vsel %vm6908_vm4, %v6907_v59, %v6906_v5 }
0x11a8   : > { %v6912_v0 = vsel %vm6911_vm6, %v6910_v6, %v6909_v25 }
0x11a9   : > { %6915 = vst.msk [vmem:[%s8258_s27] sm:$0xff] %vm6914_vm7, %v6912_v0 }
0x11aa PF: > { %s22_s15 = sadd.s32 1, %s8129_s15  }
0x11ab   : > { %p19_p6 = scmp.ge.s32.totalorder %s22_s15, 4  }
0x11ad   :  { %21 = sbr.rel (!%p19_p6) target bundleno = 3 (0x3), region = 117 }

</bundles_post_ra>
